<compile_context>
chip_gen: v5e
topology: v5e:2x2
jax: 0.10.0
libtpu: 0.0.40
codegen_flags: <defaults>
</compile_context>

<pallas_src>
import functools

import jax
import jax.numpy as jnp
from jax import lax
from jax.experimental import pallas as pl
from jax.experimental.pallas import tpu as pltpu

_EPS = 1e-5
_VMEM_LIMIT = 48 * 1024 * 1024    # safe across v5e/v6e (128 MiB) and v7x (64 MiB)
_VMEM_BUDGET = 40 * 1024 * 1024   # headroom check for the weight-resident path


def _round_up(x, m):
    return ((x + m - 1) // m) * m


def _leaky(x):
    return jnp.where(x >= 0.0, x, 0.2 * x)


# ---------------------------------------------------------------------------
# Pallas kernels
# ---------------------------------------------------------------------------

def _conv_single_k_kernel(x_ref, w_ref, b_ref, o_ref, *maybe_stats,
                          act, tm, m_valid, compute_stats):
    """One M block, full K in a single MXU dot; weights stay VMEM-resident.

    f32 epilogue: + bias, optional leaky-relu, optional per-channel BN
    sum / sum-of-squares partials over the valid rows of this block.
    """
    out = jnp.dot(x_ref[...], w_ref[...], preferred_element_type=jnp.float32)
    out = out + b_ref[...]

    if compute_stats:
        (stats_ref,) = maybe_stats
        if m_valid % tm == 0:            # no zero-padded rows at all (static)
            ov = out
        else:
            # program_id is used at the kernel top level only (interpret-safe).
            m_block = pl.program_id(0)
            row = m_block * tm + lax.broadcasted_iota(jnp.int32, (tm, 1), 0)
            ov = out * (row < m_valid).astype(jnp.float32)
        stats_ref[0, 0:1, :] = jnp.sum(ov, axis=0, keepdims=True)         # sum
        stats_ref[0, 1:2, :] = jnp.sum(ov * out, axis=0, keepdims=True)   # sum sq

    if act == "leaky":
        out = _leaky(out)
    o_ref[...] = out.astype(o_ref.dtype)


def _conv_multi_k_kernel(x_ref, w_ref, b_ref, o_ref, *rest,
                         act, tm, m_valid, compute_stats):
    """Fallback for large K: f32 VMEM accumulator over an 'arbitrary' K axis."""
    if compute_stats:
        stats_ref, acc_ref = rest
    else:
        (acc_ref,) = rest

    # Hoist ALL grid queries out of pl.when bodies (interpret-mode safe).
    m_block = pl.program_id(0)
    k_step = pl.program_id(1)
    k_last = pl.num_programs(1) - 1

    @pl.when(k_step == 0)
    def _():
        acc_ref[...] = jnp.zeros_like(acc_ref)

    acc_ref[...] += jnp.dot(x_ref[...], w_ref[...],
                            preferred_element_type=jnp.float32)

    @pl.when(k_step == k_last)
    def _():
        out = acc_ref[...] + b_ref[...]
        if compute_stats:
            if m_valid % tm == 0:
                ov = out
            else:
                row = m_block * tm + lax.broadcasted_iota(jnp.int32, (tm, 1), 0)
                ov = out * (row < m_valid).astype(jnp.float32)
            stats_ref[0, 0:1, :] = jnp.sum(ov, axis=0, keepdims=True)
            stats_ref[0, 1:2, :] = jnp.sum(ov * out, axis=0, keepdims=True)
        res = _leaky(out) if act == "leaky" else out
        o_ref[...] = res.astype(o_ref.dtype)


# ---------------------------------------------------------------------------
# im2col (single fused gather) + pallas_call wrapper
# ---------------------------------------------------------------------------

def _extract_patches(x_nhwc, kh, kw, stride, pad):
    """NHWC -> patches [N*Ho*Wo, Cin*kh*kw]; feature order is (c, kh, kw)."""
    patches = lax.conv_general_dilated_patches(
        x_nhwc,
        filter_shape=(kh, kw),
        window_strides=(stride, stride),
        padding=((pad, pad), (pad, pad)),
        dimension_numbers=("NHWC", "HWIO", "NHWC"))
    n, ho, wo, k = patches.shape
    return patches.reshape(n * ho * wo, k), (n, ho, wo)


def conv2d_pallas(x_nhwc, w_oihw, b, *, stride, pad, act="none",
                  compute_stats=False, out_dtype=jnp.bfloat16):
    """Conv2d (PyTorch OIHW weights) via im2col + fused Pallas MXU matmul.

    Returns (y_nhwc, None) or (y_nhwc, (mean, var)) with training-mode batch
    statistics (biased variance) when compute_stats is True.
    """
    cout, cin, kh, kw = w_oihw.shape
    assert x_nhwc.shape[-1] == cin

    # Pad Cin to a multiple of 8 (conv1: 3 -> 8) so K = Cin*kh*kw is already a
    # multiple of 128 for 4x4 kernels -> no K-pad of the big patch matrix.
    cin_p = _round_up(cin, 8)
    if cin_p != cin:
        x_nhwc = jnp.pad(x_nhwc, ((0, 0), (0, 0), (0, 0), (0, cin_p - cin)))
        w_oihw = jnp.pad(w_oihw, ((0, 0), (0, cin_p - cin), (0, 0), (0, 0)))

    patches, (n, ho, wo) = _extract_patches(x_nhwc.astype(jnp.bfloat16),
                                            kh, kw, stride, pad)
    m, k = patches.shape
    kp = _round_up(k, 128)
    coutp = _round_up(cout, 128)
    tm = min(512, _round_up(m, 8))
    mp = _round_up(m, tm)
    if mp != m or kp != k:
        patches = jnp.pad(patches, ((0, mp - m), (0, kp - k)))
    nb_m = mp // tm

    # Weight matrix [K, Coutp] in the same (c, kh, kw) row order as the patches.
    w_mat = jnp.transpose(w_oihw, (1, 2, 3, 0)).reshape(k, cout)
    w_mat = jnp.pad(w_mat, ((0, kp - k), (0, coutp - cout))).astype(jnp.bfloat16)
    b_vec = jnp.pad(b.astype(jnp.float32), (0, coutp - cout)).reshape(1, coutp)

    out_bytes = 2 if out_dtype == jnp.bfloat16 else 4
    vmem_need = (2 * tm * kp * 2            # double-buffered patch tiles (bf16)
                 + 2 * kp * coutp * 2       # resident weight (2 bufs, constant idx)
                 + 2 * tm * coutp * out_bytes
                 + 2 * 8 * coutp * 4 + 2 * coutp * 4)
    single_k = vmem_need <= _VMEM_BUDGET

    if compute_stats:
        stat_shape = jax.ShapeDtypeStruct((nb_m, 8, coutp), jnp.float32)

    if single_k:
        kernel = functools.partial(_conv_single_k_kernel, act=act, tm=tm,
                                   m_valid=m, compute_stats=compute_stats)
        in_specs = [
            pl.BlockSpec((tm, kp), lambda i: (i, 0)),      # patches
            pl.BlockSpec((kp, coutp), lambda i: (0, 0)),   # weights (VMEM-resident)
            pl.BlockSpec((1, coutp), lambda i: (0, 0)),    # bias
        ]
        out_spec_y = pl.BlockSpec((tm, coutp), lambda i: (i, 0))
        if compute_stats:
            out_shape = (jax.ShapeDtypeStruct((mp, coutp), out_dtype), stat_shape)
            out_specs = (out_spec_y,
                         pl.BlockSpec((1, 8, coutp), lambda i: (i, 0, 0)))
        else:
            out_shape = jax.ShapeDtypeStruct((mp, coutp), out_dtype)
            out_specs = out_spec_y
        res = pl.pallas_call(
            kernel,
            out_shape=out_shape,
            grid=(nb_m,),
            in_specs=in_specs,
            out_specs=out_specs,
            compiler_params=pltpu.CompilerParams(
                dimension_semantics=("parallel",),
                vmem_limit_bytes=_VMEM_LIMIT),
        )(patches, w_mat, b_vec)
    else:
        tk = 512 if kp % 512 == 0 else (256 if kp % 256 == 0 else 128)
        nb_k = kp // tk
        kernel = functools.partial(_conv_multi_k_kernel, act=act, tm=tm,
                                   m_valid=m, compute_stats=compute_stats)
        in_specs = [
            pl.BlockSpec((tm, tk), lambda i, j: (i, j)),
            pl.BlockSpec((tk, coutp), lambda i, j: (j, 0)),
            pl.BlockSpec((1, coutp), lambda i, j: (0, 0)),
        ]
        out_spec_y = pl.BlockSpec((tm, coutp), lambda i, j: (i, 0))
        if compute_stats:
            out_shape = (jax.ShapeDtypeStruct((mp, coutp), out_dtype), stat_shape)
            out_specs = (out_spec_y,
                         pl.BlockSpec((1, 8, coutp), lambda i, j: (i, 0, 0)))
        else:
            out_shape = jax.ShapeDtypeStruct((mp, coutp), out_dtype)
            out_specs = out_spec_y
        res = pl.pallas_call(
            kernel,
            out_shape=out_shape,
            grid=(nb_m, nb_k),
            in_specs=in_specs,
            out_specs=out_specs,
            scratch_shapes=[pltpu.VMEM((tm, coutp), jnp.float32)],
            compiler_params=pltpu.CompilerParams(
                dimension_semantics=("parallel", "arbitrary"),
                vmem_limit_bytes=_VMEM_LIMIT),
        )(patches, w_mat, b_vec)

    if compute_stats:
        y_all, stats = res
    else:
        y_all, stats = res, None

    y = y_all
    if mp != m:
        y = y[:m]
    if coutp != cout:
        y = y[:, :cout]
    y = y.reshape(n, ho, wo, cout)

    if not compute_stats:
        return y, None

    cnt = float(m)
    ssum = jnp.sum(stats[:, 0, :cout], axis=0)
    ssq = jnp.sum(stats[:, 1, :cout], axis=0)
    mean = ssum / cnt
    var = jnp.maximum(ssq / cnt - mean * mean, 0.0)   # biased (training-mode) var
    return y, (mean, var)


# ---------------------------------------------------------------------------
# Parameter init (normal_init(mean=0, std=0.02); BN gamma=1, beta=0)
# ---------------------------------------------------------------------------

def init_discriminator_params(key, d=16):
    def conv_params(k, cout, cin, ks):
        w = 0.02 * jax.random.normal(k, (cout, cin, ks, ks), jnp.float32)
        b = jnp.zeros((cout,), jnp.float32)
        return w, b

    ks = jax.random.split(key, 5)
    return {
        "conv1": conv_params(ks[0], d, 3, 4),
        "conv2": conv_params(ks[1], d * 2, d, 4),
        "conv3": conv_params(ks[2], d * 4, d * 2, 4),
        "conv4": conv_params(ks[3], d * 8, d * 4, 4),
        "conv5": conv_params(ks[4], 1, d * 8, 4),
        "bn2": (jnp.ones((d * 2,), jnp.float32), jnp.zeros((d * 2,), jnp.float32)),
        "bn3": (jnp.ones((d * 4,), jnp.float32), jnp.zeros((d * 4,), jnp.float32)),
        "bn4": (jnp.ones((d * 8,), jnp.float32), jnp.zeros((d * 8,), jnp.float32)),
    }


# ---------------------------------------------------------------------------
# Forward pass (matches discriminator.forward, training-mode BatchNorm)
# ---------------------------------------------------------------------------

def discriminator_forward(params, x_nchw):
    # NCHW (PyTorch) -> NHWC; activations travel in bf16, all epilogue math f32.
    x = jnp.transpose(x_nchw, (0, 2, 3, 1))

    w, b = params["conv1"]
    x, _ = conv2d_pallas(x, w, b, stride=2, pad=1, act="leaky")

    for cname, bname in (("conv2", "bn2"), ("conv3", "bn3"), ("conv4", "bn4")):
        w, b = params[cname]
        y, (mean, var) = conv2d_pallas(x, w, b, stride=2, pad=1, act="none",
                                       compute_stats=True)
        gamma, beta = params[bname]
        scale = gamma / jnp.sqrt(var + _EPS)
        shift = beta - mean * scale
        yf = y.astype(jnp.float32) * scale + shift
        x = _leaky(yf).astype(jnp.bfloat16)

    # conv5: M == batch, Cout == 1 -> a Pallas launch would be ~all padding;
    # do it as a tiny XLA dot + sigmoid.
    w5, b5 = params["conv5"]
    co5, ci5, kh5, kw5 = w5.shape
    p5, (n5, ho5, wo5) = _extract_patches(x.astype(jnp.float32), kh5, kw5, 1, 0)
    wm5 = jnp.transpose(w5, (1, 2, 3, 0)).reshape(ci5 * kh5 * kw5, co5)
    out = jax.nn.sigmoid(p5 @ wm5 + b5).reshape(n5, ho5, wo5, co5)

    # NHWC -> NCHW to match PyTorch output convention
    return jnp.transpose(out, (0, 3, 1, 2))


# ---------------------------------------------------------------------------
# Pure-JAX f32 reference (same training-mode BN semantics) for validation
# ---------------------------------------------------------------------------

def _reference_forward(params, x_nchw):
    x = x_nchw.astype(jnp.float32)

    def conv(v, w, b, s, p):
        y = lax.conv_general_dilated(v, w, (s, s), ((p, p), (p, p)),
                                     dimension_numbers=("NCHW", "OIHW", "NCHW"))
        return y + b.reshape(1, -1, 1, 1)

    def bn(y, gamma, beta):
        mean = jnp.mean(y, axis=(0, 2, 3), keepdims=True)
        var = jnp.mean((y - mean) ** 2, axis=(0, 2, 3), keepdims=True)
        return ((y - mean) / jnp.sqrt(var + _EPS)) * gamma.reshape(1, -1, 1, 1) \
            + beta.reshape(1, -1, 1, 1)

    w, b = params["conv1"]
    x = _leaky(conv(x, w, b, 2, 1))
    for cname, bname in (("conv2", "bn2"), ("conv3", "bn3"), ("conv4", "bn4")):
        w, b = params[cname]
        g, be = params[bname]
        x = _leaky(bn(conv(x, w, b, 2, 1), g, be))
    w, b = params["conv5"]
    return jax.nn.sigmoid(conv(x, w, b, 1, 0))


if __name__ == "__main__":
    key = jax.random.PRNGKey(0)
    k_param, k_input = jax.random.split(key)

    d = 16                      # small width for the demo (module default 128)
    params = init_discriminator_params(k_param, d=d)

    # Discriminator expects 64x64 RGB images (64 -> 32 -> 16 -> 8 -> 4 -> 1).
    x = jax.random.normal(k_input, (2, 3, 64, 64), jnp.float32)

    out = jax.jit(discriminator_forward)(params, x)
    out = jax.block_until_ready(out)

    assert out.shape == (2, 1, 1, 1), out.shape
    assert bool(jnp.all(jnp.isfinite(out)))
    assert bool(jnp.all((out >= 0.0) & (out <= 1.0)))

    ref = _reference_forward(params, x)
    err = float(jnp.max(jnp.abs(out.astype(jnp.float32) - ref)))
    assert err < 5e-2, f"max abs error vs f32 reference: {err}"

    print("KERNEL_OK")
</pallas_src>

<mosaic_0001>
module attributes {stable_mosaic.version = 11 : i64} {
  func.func @_conv_single_k_kernel(%arg0: i32, %arg1: memref<512x128xbf16, #tpu.memory_space<vmem>>, %arg2: memref<128x128xbf16, #tpu.memory_space<vmem>>, %arg3: memref<1x128xf32, #tpu.memory_space<vmem>>, %arg4: memref<512x128xbf16, #tpu.memory_space<vmem>>) attributes {dimension_semantics = [#tpu.dimension_semantics<parallel>], iteration_bounds = array<i64: 4>, scalar_prefetch = 0 : i64, scratch_operands = 0 : i64, tpu.core_type = #tpu.core_type<tc>, window_params = [{transform_indices = @transform_0, window_bounds = array<i64: 512, 128>}, {pipeline_mode = #tpu.pipeline_mode<synchronous>, transform_indices = @transform_1, window_bounds = array<i64: 128, 128>}, {pipeline_mode = #tpu.pipeline_mode<synchronous>, transform_indices = @transform_2, window_bounds = array<i64: 1, 128>}, {transform_indices = @transform_3, window_bounds = array<i64: 512, 128>}]} {
    %c0 = arith.constant 0 : index
    %c0_0 = arith.constant 0 : index
    %0 = vector.load %arg1[%c0, %c0_0] : memref<512x128xbf16, #tpu.memory_space<vmem>>, vector<512x128xbf16>
    %c0_1 = arith.constant 0 : index
    %c0_2 = arith.constant 0 : index
    %1 = vector.load %arg2[%c0_1, %c0_2] : memref<128x128xbf16, #tpu.memory_space<vmem>>, vector<128x128xbf16>
    %cst = arith.constant dense<0.000000e+00> : vector<512x128xf32>
    %2 = tpu.matmul %0, %1, %cst {dimension_numbers = #tpu.dot_dimension_numbers<[1], [0], [0], [1], [0, 0, 1, 1], [], []>} : vector<512x128xbf16>, vector<128x128xbf16>, vector<512x128xf32> -> vector<512x128xf32>
    %c0_3 = arith.constant 0 : index
    %c0_4 = arith.constant 0 : index
    %3 = vector.load %arg3[%c0_3, %c0_4] : memref<1x128xf32, #tpu.memory_space<vmem>>, vector<1x128xf32>
    %4 = vector.broadcast %3 : vector<1x128xf32> to vector<512x128xf32>
    %5 = arith.addf %2, %4 : vector<512x128xf32>
    %cst_5 = arith.constant 0.000000e+00 : f32
    %6 = vector.broadcast %cst_5 : f32 to vector<512x128xf32>
    %7 = arith.cmpf oge, %5, %6 : vector<512x128xf32>
    %cst_6 = arith.constant 2.000000e-01 : f32
    %8 = vector.broadcast %cst_6 : f32 to vector<512x128xf32>
    %9 = arith.mulf %8, %5 : vector<512x128xf32>
    %10 = arith.select %7, %5, %9 : vector<512x128xi1>, vector<512x128xf32>
    %11 = arith.truncf %10 : vector<512x128xf32> to vector<512x128xbf16>
    %c0_7 = arith.constant 0 : index
    %c0_8 = arith.constant 0 : index
    %12 = vector.load %arg4[%c0_7, %c0_8] : memref<512x128xbf16, #tpu.memory_space<vmem>>, vector<512x128xbf16>
    tpu.vector_store %arg4[%c0_7, %c0_8], %11 {strides = array<i32>} : memref<512x128xbf16, #tpu.memory_space<vmem>>, vector<512x128xbf16>,
    return
  }
  func.func @transform_0(%arg0: i32) -> (i32, i32) {
    %c0_i32 = arith.constant 0 : i32
    %c0_i32_0 = arith.constant 0 : i32
    return %arg0, %c0_i32 : i32, i32
  }
  func.func @transform_1(%arg0: i32) -> (i32, i32) {
    %c0_i32 = arith.constant 0 : i32
    %c0_i32_0 = arith.constant 0 : i32
    %c0_i32_1 = arith.constant 0 : i32
    return %c0_i32, %c0_i32_0 : i32, i32
  }
  func.func @transform_2(%arg0: i32) -> (i32, i32) {
    %c0_i32 = arith.constant 0 : i32
    %c0_i32_0 = arith.constant 0 : i32
    %c0_i32_1 = arith.constant 0 : i32
    return %c0_i32, %c0_i32_0 : i32, i32
  }
  func.func @transform_3(%arg0: i32) -> (i32, i32) {
    %c0_i32 = arith.constant 0 : i32
    %c0_i32_0 = arith.constant 0 : i32
    return %arg0, %c0_i32 : i32, i32
  }
}

module attributes {stable_mosaic.version = 11 : i64} {
  func.func @_conv_single_k_kernel(%arg0: i32, %arg1: memref<512x256xbf16, #tpu.memory_space<vmem>>, %arg2: memref<256x128xbf16, #tpu.memory_space<vmem>>, %arg3: memref<1x128xf32, #tpu.memory_space<vmem>>, %arg4: memref<512x128xbf16, #tpu.memory_space<vmem>>, %arg5: memref<1x8x128xf32, #tpu.memory_space<vmem>>) attributes {dimension_semantics = [#tpu.dimension_semantics<parallel>], iteration_bounds = array<i64: 1>, scalar_prefetch = 0 : i64, scratch_operands = 0 : i64, tpu.core_type = #tpu.core_type<tc>, window_params = [{transform_indices = @transform_0, window_bounds = array<i64: 512, 256>}, {pipeline_mode = #tpu.pipeline_mode<synchronous>, transform_indices = @transform_1, window_bounds = array<i64: 256, 128>}, {pipeline_mode = #tpu.pipeline_mode<synchronous>, transform_indices = @transform_2, window_bounds = array<i64: 1, 128>}, {transform_indices = @transform_3, window_bounds = array<i64: 512, 128>}, {transform_indices = @transform_4, window_bounds = array<i64: 1, 8, 128>}]} {
    %c0 = arith.constant 0 : index
    %c0_0 = arith.constant 0 : index
    %0 = vector.load %arg1[%c0, %c0_0] : memref<512x256xbf16, #tpu.memory_space<vmem>>, vector<512x256xbf16>
    %c0_1 = arith.constant 0 : index
    %c0_2 = arith.constant 0 : index
    %1 = vector.load %arg2[%c0_1, %c0_2] : memref<256x128xbf16, #tpu.memory_space<vmem>>, vector<256x128xbf16>
    %cst = arith.constant dense<0.000000e+00> : vector<512x128xf32>
    %2 = tpu.matmul %0, %1, %cst {dimension_numbers = #tpu.dot_dimension_numbers<[1], [0], [0], [1], [0, 0, 1, 1], [], []>} : vector<512x256xbf16>, vector<256x128xbf16>, vector<512x128xf32> -> vector<512x128xf32>
    %c0_3 = arith.constant 0 : index
    %c0_4 = arith.constant 0 : index
    %3 = vector.load %arg3[%c0_3, %c0_4] : memref<1x128xf32, #tpu.memory_space<vmem>>, vector<1x128xf32>
    %4 = vector.broadcast %3 : vector<1x128xf32> to vector<512x128xf32>
    %5 = arith.addf %2, %4 : vector<512x128xf32>
    %cst_5 = arith.constant dense<0.000000e+00> : vector<128xf32>
    %6 = vector.multi_reduction <add>, %5, %cst_5 [0] : vector<512x128xf32> to vector<128xf32>
    %7 = vector.shape_cast %6 : vector<128xf32> to vector<1x128xf32>
    %c0_6 = arith.constant 0 : index
    %c0_7 = arith.constant 0 : index
    %c0_8 = arith.constant 0 : index
    %8 = vector.load %arg5[%c0_6, %c0_7, %c0_8] : memref<1x8x128xf32, #tpu.memory_space<vmem>>, vector<1x1x128xf32>
    %9 = vector.shape_cast %8 : vector<1x1x128xf32> to vector<1x128xf32>
    %10 = vector.shape_cast %7 : vector<1x128xf32> to vector<1x1x128xf32>
    tpu.vector_store %arg5[%c0_6, %c0_7, %c0_8], %10 {strides = array<i32>} : memref<1x8x128xf32, #tpu.memory_space<vmem>>, vector<1x1x128xf32>,
    %11 = arith.mulf %5, %5 : vector<512x128xf32>
    %cst_9 = arith.constant dense<0.000000e+00> : vector<128xf32>
    %12 = vector.multi_reduction <add>, %11, %cst_9 [0] : vector<512x128xf32> to vector<128xf32>
    %13 = vector.shape_cast %12 : vector<128xf32> to vector<1x128xf32>
    %c0_10 = arith.constant 0 : index
    %c1 = arith.constant 1 : index
    %c0_11 = arith.constant 0 : index
    %14 = vector.load %arg5[%c0_10, %c1, %c0_11] : memref<1x8x128xf32, #tpu.memory_space<vmem>>, vector<1x1x128xf32>
    %15 = vector.shape_cast %14 : vector<1x1x128xf32> to vector<1x128xf32>
    %16 = vector.shape_cast %13 : vector<1x128xf32> to vector<1x1x128xf32>
    tpu.vector_store %arg5[%c0_10, %c1, %c0_11], %16 {strides = array<i32>} : memref<1x8x128xf32, #tpu.memory_space<vmem>>, vector<1x1x128xf32>,
    %17 = arith.truncf %5 : vector<512x128xf32> to vector<512x128xbf16>
    %c0_12 = arith.constant 0 : index
    %c0_13 = arith.constant 0 : index
    %18 = vector.load %arg4[%c0_12, %c0_13] : memref<512x128xbf16, #tpu.memory_space<vmem>>, vector<512x128xbf16>
    tpu.vector_store %arg4[%c0_12, %c0_13], %17 {strides = array<i32>} : memref<512x128xbf16, #tpu.memory_space<vmem>>, vector<512x128xbf16>,
    return
  }
  func.func @transform_0(%arg0: i32) -> (i32, i32) {
    %c0_i32 = arith.constant 0 : i32
    %c0_i32_0 = arith.constant 0 : i32
    return %arg0, %c0_i32 : i32, i32
  }
  func.func @transform_1(%arg0: i32) -> (i32, i32) {
    %c0_i32 = arith.constant 0 : i32
    %c0_i32_0 = arith.constant 0 : i32
    %c0_i32_1 = arith.constant 0 : i32
    return %c0_i32, %c0_i32_0 : i32, i32
  }
  func.func @transform_2(%arg0: i32) -> (i32, i32) {
    %c0_i32 = arith.constant 0 : i32
    %c0_i32_0 = arith.constant 0 : i32
    %c0_i32_1 = arith.constant 0 : i32
    return %c0_i32, %c0_i32_0 : i32, i32
  }
  func.func @transform_3(%arg0: i32) -> (i32, i32) {
    %c0_i32 = arith.constant 0 : i32
    %c0_i32_0 = arith.constant 0 : i32
    return %arg0, %c0_i32 : i32, i32
  }
  func.func @transform_4(%arg0: i32) -> (i32, i32, i32) {
    %c0_i32 = arith.constant 0 : i32
    %c0_i32_0 = arith.constant 0 : i32
    %c0_i32_1 = arith.constant 0 : i32
    return %arg0, %c0_i32, %c0_i32_0 : i32, i32, i32
  }
}

module attributes {stable_mosaic.version = 11 : i64} {
  func.func @_conv_single_k_kernel(%arg0: i32, %arg1: memref<128x512xbf16, #tpu.memory_space<vmem>>, %arg2: memref<512x128xbf16, #tpu.memory_space<vmem>>, %arg3: memref<1x128xf32, #tpu.memory_space<vmem>>, %arg4: memref<128x128xbf16, #tpu.memory_space<vmem>>, %arg5: memref<1x8x128xf32, #tpu.memory_space<vmem>>) attributes {dimension_semantics = [#tpu.dimension_semantics<parallel>], iteration_bounds = array<i64: 1>, scalar_prefetch = 0 : i64, scratch_operands = 0 : i64, tpu.core_type = #tpu.core_type<tc>, window_params = [{transform_indices = @transform_0, window_bounds = array<i64: 128, 512>}, {pipeline_mode = #tpu.pipeline_mode<synchronous>, transform_indices = @transform_1, window_bounds = array<i64: 512, 128>}, {pipeline_mode = #tpu.pipeline_mode<synchronous>, transform_indices = @transform_2, window_bounds = array<i64: 1, 128>}, {transform_indices = @transform_3, window_bounds = array<i64: 128, 128>}, {transform_indices = @transform_4, window_bounds = array<i64: 1, 8, 128>}]} {
    %c0 = arith.constant 0 : index
    %c0_0 = arith.constant 0 : index
    %0 = vector.load %arg1[%c0, %c0_0] : memref<128x512xbf16, #tpu.memory_space<vmem>>, vector<128x512xbf16>
    %c0_1 = arith.constant 0 : index
    %c0_2 = arith.constant 0 : index
    %1 = vector.load %arg2[%c0_1, %c0_2] : memref<512x128xbf16, #tpu.memory_space<vmem>>, vector<512x128xbf16>
    %cst = arith.constant dense<0.000000e+00> : vector<128x128xf32>
    %2 = tpu.matmul %0, %1, %cst {dimension_numbers = #tpu.dot_dimension_numbers<[1], [0], [0], [1], [0, 0, 1, 1], [], []>} : vector<128x512xbf16>, vector<512x128xbf16>, vector<128x128xf32> -> vector<128x128xf32>
    %c0_3 = arith.constant 0 : index
    %c0_4 = arith.constant 0 : index
    %3 = vector.load %arg3[%c0_3, %c0_4] : memref<1x128xf32, #tpu.memory_space<vmem>>, vector<1x128xf32>
    %4 = vector.broadcast %3 : vector<1x128xf32> to vector<128x128xf32>
    %5 = arith.addf %2, %4 : vector<128x128xf32>
    %cst_5 = arith.constant dense<0.000000e+00> : vector<128xf32>
    %6 = vector.multi_reduction <add>, %5, %cst_5 [0] : vector<128x128xf32> to vector<128xf32>
    %7 = vector.shape_cast %6 : vector<128xf32> to vector<1x128xf32>
    %c0_6 = arith.constant 0 : index
    %c0_7 = arith.constant 0 : index
    %c0_8 = arith.constant 0 : index
    %8 = vector.load %arg5[%c0_6, %c0_7, %c0_8] : memref<1x8x128xf32, #tpu.memory_space<vmem>>, vector<1x1x128xf32>
    %9 = vector.shape_cast %8 : vector<1x1x128xf32> to vector<1x128xf32>
    %10 = vector.shape_cast %7 : vector<1x128xf32> to vector<1x1x128xf32>
    tpu.vector_store %arg5[%c0_6, %c0_7, %c0_8], %10 {strides = array<i32>} : memref<1x8x128xf32, #tpu.memory_space<vmem>>, vector<1x1x128xf32>,
    %11 = arith.mulf %5, %5 : vector<128x128xf32>
    %cst_9 = arith.constant dense<0.000000e+00> : vector<128xf32>
    %12 = vector.multi_reduction <add>, %11, %cst_9 [0] : vector<128x128xf32> to vector<128xf32>
    %13 = vector.shape_cast %12 : vector<128xf32> to vector<1x128xf32>
    %c0_10 = arith.constant 0 : index
    %c1 = arith.constant 1 : index
    %c0_11 = arith.constant 0 : index
    %14 = vector.load %arg5[%c0_10, %c1, %c0_11] : memref<1x8x128xf32, #tpu.memory_space<vmem>>, vector<1x1x128xf32>
    %15 = vector.shape_cast %14 : vector<1x1x128xf32> to vector<1x128xf32>
    %16 = vector.shape_cast %13 : vector<1x128xf32> to vector<1x1x128xf32>
    tpu.vector_store %arg5[%c0_10, %c1, %c0_11], %16 {strides = array<i32>} : memref<1x8x128xf32, #tpu.memory_space<vmem>>, vector<1x1x128xf32>,
    %17 = arith.truncf %5 : vector<128x128xf32> to vector<128x128xbf16>
    %c0_12 = arith.constant 0 : index
    %c0_13 = arith.constant 0 : index
    %18 = vector.load %arg4[%c0_12, %c0_13] : memref<128x128xbf16, #tpu.memory_space<vmem>>, vector<128x128xbf16>
    tpu.vector_store %arg4[%c0_12, %c0_13], %17 {strides = array<i32>} : memref<128x128xbf16, #tpu.memory_space<vmem>>, vector<128x128xbf16>,
    return
  }
  func.func @transform_0(%arg0: i32) -> (i32, i32) {
    %c0_i32 = arith.constant 0 : i32
    %c0_i32_0 = arith.constant 0 : i32
    return %arg0, %c0_i32 : i32, i32
  }
  func.func @transform_1(%arg0: i32) -> (i32, i32) {
    %c0_i32 = arith.constant 0 : i32
    %c0_i32_0 = arith.constant 0 : i32
    %c0_i32_1 = arith.constant 0 : i32
    return %c0_i32, %c0_i32_0 : i32, i32
  }
  func.func @transform_2(%arg0: i32) -> (i32, i32) {
    %c0_i32 = arith.constant 0 : i32
    %c0_i32_0 = arith.constant 0 : i32
    %c0_i32_1 = arith.constant 0 : i32
    return %c0_i32, %c0_i32_0 : i32, i32
  }
  func.func @transform_3(%arg0: i32) -> (i32, i32) {
    %c0_i32 = arith.constant 0 : i32
    %c0_i32_0 = arith.constant 0 : i32
    return %arg0, %c0_i32 : i32, i32
  }
  func.func @transform_4(%arg0: i32) -> (i32, i32, i32) {
    %c0_i32 = arith.constant 0 : i32
    %c0_i32_0 = arith.constant 0 : i32
    %c0_i32_1 = arith.constant 0 : i32
    return %arg0, %c0_i32, %c0_i32_0 : i32, i32, i32
  }
}

module attributes {stable_mosaic.version = 11 : i64} {
  func.func @_conv_single_k_kernel(%arg0: i32, %arg1: memref<32x1024xbf16, #tpu.memory_space<vmem>>, %arg2: memref<1024x128xbf16, #tpu.memory_space<vmem>>, %arg3: memref<1x128xf32, #tpu.memory_space<vmem>>, %arg4: memref<32x128xbf16, #tpu.memory_space<vmem>>, %arg5: memref<1x8x128xf32, #tpu.memory_space<vmem>>) attributes {dimension_semantics = [#tpu.dimension_semantics<parallel>], iteration_bounds = array<i64: 1>, scalar_prefetch = 0 : i64, scratch_operands = 0 : i64, tpu.core_type = #tpu.core_type<tc>, window_params = [{transform_indices = @transform_0, window_bounds = array<i64: 32, 1024>}, {pipeline_mode = #tpu.pipeline_mode<synchronous>, transform_indices = @transform_1, window_bounds = array<i64: 1024, 128>}, {pipeline_mode = #tpu.pipeline_mode<synchronous>, transform_indices = @transform_2, window_bounds = array<i64: 1, 128>}, {transform_indices = @transform_3, window_bounds = array<i64: 32, 128>}, {transform_indices = @transform_4, window_bounds = array<i64: 1, 8, 128>}]} {
    %c0 = arith.constant 0 : index
    %c0_0 = arith.constant 0 : index
    %0 = vector.load %arg1[%c0, %c0_0] : memref<32x1024xbf16, #tpu.memory_space<vmem>>, vector<32x1024xbf16>
    %c0_1 = arith.constant 0 : index
    %c0_2 = arith.constant 0 : index
    %1 = vector.load %arg2[%c0_1, %c0_2] : memref<1024x128xbf16, #tpu.memory_space<vmem>>, vector<1024x128xbf16>
    %cst = arith.constant dense<0.000000e+00> : vector<32x128xf32>
    %2 = tpu.matmul %0, %1, %cst {dimension_numbers = #tpu.dot_dimension_numbers<[1], [0], [0], [1], [0, 0, 1, 1], [], []>} : vector<32x1024xbf16>, vector<1024x128xbf16>, vector<32x128xf32> -> vector<32x128xf32>
    %c0_3 = arith.constant 0 : index
    %c0_4 = arith.constant 0 : index
    %3 = vector.load %arg3[%c0_3, %c0_4] : memref<1x128xf32, #tpu.memory_space<vmem>>, vector<1x128xf32>
    %4 = vector.broadcast %3 : vector<1x128xf32> to vector<32x128xf32>
    %5 = arith.addf %2, %4 : vector<32x128xf32>
    %cst_5 = arith.constant dense<0.000000e+00> : vector<128xf32>
    %6 = vector.multi_reduction <add>, %5, %cst_5 [0] : vector<32x128xf32> to vector<128xf32>
    %7 = vector.shape_cast %6 : vector<128xf32> to vector<1x128xf32>
    %c0_6 = arith.constant 0 : index
    %c0_7 = arith.constant 0 : index
    %c0_8 = arith.constant 0 : index
    %8 = vector.load %arg5[%c0_6, %c0_7, %c0_8] : memref<1x8x128xf32, #tpu.memory_space<vmem>>, vector<1x1x128xf32>
    %9 = vector.shape_cast %8 : vector<1x1x128xf32> to vector<1x128xf32>
    %10 = vector.shape_cast %7 : vector<1x128xf32> to vector<1x1x128xf32>
    tpu.vector_store %arg5[%c0_6, %c0_7, %c0_8], %10 {strides = array<i32>} : memref<1x8x128xf32, #tpu.memory_space<vmem>>, vector<1x1x128xf32>,
    %11 = arith.mulf %5, %5 : vector<32x128xf32>
    %cst_9 = arith.constant dense<0.000000e+00> : vector<128xf32>
    %12 = vector.multi_reduction <add>, %11, %cst_9 [0] : vector<32x128xf32> to vector<128xf32>
    %13 = vector.shape_cast %12 : vector<128xf32> to vector<1x128xf32>
    %c0_10 = arith.constant 0 : index
    %c1 = arith.constant 1 : index
    %c0_11 = arith.constant 0 : index
    %14 = vector.load %arg5[%c0_10, %c1, %c0_11] : memref<1x8x128xf32, #tpu.memory_space<vmem>>, vector<1x1x128xf32>
    %15 = vector.shape_cast %14 : vector<1x1x128xf32> to vector<1x128xf32>
    %16 = vector.shape_cast %13 : vector<1x128xf32> to vector<1x1x128xf32>
    tpu.vector_store %arg5[%c0_10, %c1, %c0_11], %16 {strides = array<i32>} : memref<1x8x128xf32, #tpu.memory_space<vmem>>, vector<1x1x128xf32>,
    %17 = arith.truncf %5 : vector<32x128xf32> to vector<32x128xbf16>
    %c0_12 = arith.constant 0 : index
    %c0_13 = arith.constant 0 : index
    %18 = vector.load %arg4[%c0_12, %c0_13] : memref<32x128xbf16, #tpu.memory_space<vmem>>, vector<32x128xbf16>
    tpu.vector_store %arg4[%c0_12, %c0_13], %17 {strides = array<i32>} : memref<32x128xbf16, #tpu.memory_space<vmem>>, vector<32x128xbf16>,
    return
  }
  func.func @transform_0(%arg0: i32) -> (i32, i32) {
    %c0_i32 = arith.constant 0 : i32
    %c0_i32_0 = arith.constant 0 : i32
    return %arg0, %c0_i32 : i32, i32
  }
  func.func @transform_1(%arg0: i32) -> (i32, i32) {
    %c0_i32 = arith.constant 0 : i32
    %c0_i32_0 = arith.constant 0 : i32
    %c0_i32_1 = arith.constant 0 : i32
    return %c0_i32, %c0_i32_0 : i32, i32
  }
  func.func @transform_2(%arg0: i32) -> (i32, i32) {
    %c0_i32 = arith.constant 0 : i32
    %c0_i32_0 = arith.constant 0 : i32
    %c0_i32_1 = arith.constant 0 : i32
    return %c0_i32, %c0_i32_0 : i32, i32
  }
  func.func @transform_3(%arg0: i32) -> (i32, i32) {
    %c0_i32 = arith.constant 0 : i32
    %c0_i32_0 = arith.constant 0 : i32
    return %arg0, %c0_i32 : i32, i32
  }
  func.func @transform_4(%arg0: i32) -> (i32, i32, i32) {
    %c0_i32 = arith.constant 0 : i32
    %c0_i32_0 = arith.constant 0 : i32
    %c0_i32_1 = arith.constant 0 : i32
    return %arg0, %c0_i32, %c0_i32_0 : i32, i32, i32
  }
}

</mosaic_0001>

<bundles_post_ra>
// kernel: discriminator_forward.4
= control target key start
LH: loop header
LB: loop body
LE: loop exit
PB: predicated region body
PF: predicated region fallthrough
CT: control target
= control target key end

     0   :  { %s1506_s12 = smov 0   ;;  %s1691_s0 = inlined_call_operand.vmem [shape: bf16[2048,128], index: 0, kind: input, shape index: {}]   ;;  %s1692_s1 = inlined_call_operand.vmem [shape: bf16[128,128], index: 1, kind: input, shape index: {}]   ;;  %s1693_s2 = inlined_call_operand.vmem [shape: f32[1,128], index: 2, kind: input, shape index: {}]   ;;  %s1694_s3 = inlined_call_operand.vmem [shape: bf16[2048,128], index: 3, kind: output, shape index: {}]  }
   0x1 LB: > { %s1043_s13 = sadd.s32 4294967295, %s1484_s12   ;;  %p1047_p0 = scmp.ge.s32.totalorder %s1484_s12, 1  ;;  %s1484_s12 = sphi %s1506_s12, %s13_s12  }
   0x2   : > { %p138_p1 = scmp.lt.s32.totalorder %s1484_s12, 5 }
   0x4   : > { %p139_p2 = pnand %p1047_p0, %p138_p1 }
   0x5   : > { %s1048_s22 = sshll.u32 (!%p139_p2), %s1043_s13, 6 }
   0x6   : > { %142 = sbr.rel (%p139_p2) target bundleno = 305 (0x131), region = 32  ;;  %p163_p3 = scmp.lt.s32.totalorder (!%p139_p2), %s1048_s22, 255 }
   0xb   : > { %v1253_v0 = vld [vmem:[%s1692_s1 + $0x38] sm:$0xff]  ;;  %v1252_v1 = vld [vmem:[%s1692_s1 + $0x30] sm:$0xff]  ;;  %v1251_v2 = vld [vmem:[%s1692_s1 + $0x28] sm:$0xff]  ;;  %s1696_s22 = smov (!%p163_p3, %s1048_s22), 255 }
   0xc   : > { %498 = vmatpush.bf16.msra.mxu0 %v1253_v0  ;;  %1445 = vmatpush.bf16.msra.mxu1 %v1253_v0  ;;  %v1250_v3 = vld [vmem:[%s1692_s1 + $0x20] sm:$0xff]  ;;  %v1249_v4 = vld [vmem:[%s1692_s1 + $0x18] sm:$0xff]  ;;  %v1248_v5 = vld [vmem:[%s1692_s1 + $0x10] sm:$0xff]  ;;  %s1049_s29 = sshll.u32 %s1696_s22, 2 }
   0xd   : > { %1446 = vmatpush.bf16.msra.mxu2 %v1253_v0  ;;  %1447 = vmatpush.bf16.msra.mxu3 %v1253_v0  ;;  %v1247_v6 = vld [vmem:[%s1692_s1 + $0x8] sm:$0xff]  ;;  %v1246_v7 = vld [vmem:[%s1692_s1] sm:$0xff]  ;;  %s1546_s7 = scalar_lea.vmem %s1691_s0, %s1049_s29  ;;  %s1596_s13 = scalar_lea.vmem %s1694_s3, %s1049_s29 }
   0xe   : > { %v1214_v8 = vld [vmem:[%s1546_s7] sm:$0xff]  ;;  %v1215_v12 = vld [vmem:[%s1546_s7 + $0x8] sm:$0xff]  ;;  %v1216_v16 = vld [vmem:[%s1546_s7 + $0x10] sm:$0xff] }
   0xf   : > { %v1222_v9 = vld [vmem:[%s1546_s7 + $0x40] sm:$0xff]  ;;  %v1223_v13 = vld [vmem:[%s1546_s7 + $0x48] sm:$0xff]  ;;  %v1224_v17 = vld [vmem:[%s1546_s7 + $0x50] sm:$0xff] }
  0x10   : > { %499 = vmatpush.bf16.msra.mxu0 %v1252_v1  ;;  %1448 = vmatpush.bf16.msra.mxu1 %v1252_v1  ;;  %v1230_v10 = vld [vmem:[%s1546_s7 + $0x80] sm:$0xff]  ;;  %v1231_v14 = vld [vmem:[%s1546_s7 + $0x88] sm:$0xff]  ;;  %v1232_v18 = vld [vmem:[%s1546_s7 + $0x90] sm:$0xff] }
  0x11   : > { %1449 = vmatpush.bf16.msra.mxu2 %v1252_v1  ;;  %1450 = vmatpush.bf16.msra.mxu3 %v1252_v1  ;;  %v1238_v11 = vld [vmem:[%s1546_s7 + $0xc0] sm:$0xff]  ;;  %v1239_v15 = vld [vmem:[%s1546_s7 + $0xc8] sm:$0xff]  ;;  %v1240_v19 = vld [vmem:[%s1546_s7 + $0xd0] sm:$0xff] }
  0x12   : > { %v1217_v20 = vld [vmem:[%s1546_s7 + $0x18] sm:$0xff]  ;;  %v1218_v24 = vld [vmem:[%s1546_s7 + $0x20] sm:$0xff]  ;;  %v1219_v28 = vld [vmem:[%s1546_s7 + $0x28] sm:$0xff] }
  0x13   : > { %v1225_v21 = vld [vmem:[%s1546_s7 + $0x58] sm:$0xff]  ;;  %v1226_v25 = vld [vmem:[%s1546_s7 + $0x60] sm:$0xff]  ;;  %v1227_v29 = vld [vmem:[%s1546_s7 + $0x68] sm:$0xff] }
  0x14   : > { %500 = vmatpush.bf16.msra.mxu0 %v1251_v2  ;;  %1451 = vmatpush.bf16.msra.mxu1 %v1251_v2  ;;  %v1233_v22 = vld [vmem:[%s1546_s7 + $0x98] sm:$0xff]  ;;  %v1234_v26 = vld [vmem:[%s1546_s7 + $0xa0] sm:$0xff]  ;;  %v1235_v30 = vld [vmem:[%s1546_s7 + $0xa8] sm:$0xff] }
  0x15   : > { %1452 = vmatpush.bf16.msra.mxu2 %v1251_v2  ;;  %1453 = vmatpush.bf16.msra.mxu3 %v1251_v2  ;;  %v1241_v23 = vld [vmem:[%s1546_s7 + $0xd8] sm:$0xff]  ;;  %v1242_v27 = vld [vmem:[%s1546_s7 + $0xe0] sm:$0xff]  ;;  %v1243_v31 = vld [vmem:[%s1546_s7 + $0xe8] sm:$0xff] }
  0x16   : > { %v1220_v32 = vld [vmem:[%s1546_s7 + $0x30] sm:$0xff]  ;;  %v1221_v36 = vld [vmem:[%s1546_s7 + $0x38] sm:$0xff]  ;;  %v1583_v42 = vld [vmem:[%s1693_s2] ss:$0 sm:$0xff] }
  0x17   : > { %v1228_v33 = vld [vmem:[%s1546_s7 + $0x70] sm:$0xff]  ;;  %v1229_v37 = vld [vmem:[%s1546_s7 + $0x78] sm:$0xff] }
  0x18   : > { %501 = vmatpush.bf16.msra.mxu0 %v1250_v3  ;;  %1454 = vmatpush.bf16.msra.mxu1 %v1250_v3  ;;  %v1236_v34 = vld [vmem:[%s1546_s7 + $0xb0] sm:$0xff]  ;;  %v1237_v38 = vld [vmem:[%s1546_s7 + $0xb8] sm:$0xff] }
  0x19   : > { %1455 = vmatpush.bf16.msra.mxu2 %v1250_v3  ;;  %1456 = vmatpush.bf16.msra.mxu3 %v1250_v3  ;;  %v1244_v35 = vld [vmem:[%s1546_s7 + $0xf0] sm:$0xff]  ;;  %v1245_v39 = vld [vmem:[%s1546_s7 + $0xf8] sm:$0xff] }
  0x1c   : > { %502 = vmatpush.bf16.msra.mxu0 %v1249_v4  ;;  %1457 = vmatpush.bf16.msra.mxu1 %v1249_v4 }
  0x1d   : > { %1458 = vmatpush.bf16.msra.mxu2 %v1249_v4  ;;  %1459 = vmatpush.bf16.msra.mxu3 %v1249_v4 }
  0x20   : > { %503 = vmatpush.bf16.msra.mxu0 %v1248_v5  ;;  %1460 = vmatpush.bf16.msra.mxu1 %v1248_v5 }
  0x21   : > { %1461 = vmatpush.bf16.msra.mxu2 %v1248_v5  ;;  %1462 = vmatpush.bf16.msra.mxu3 %v1248_v5 }
  0x24   : > { %504 = vmatpush.bf16.msra.mxu0 %v1247_v6  ;;  %1463 = vmatpush.bf16.msra.mxu1 %v1247_v6 }
  0x25   : > { %1464 = vmatpush.bf16.msra.mxu2 %v1247_v6  ;;  %1465 = vmatpush.bf16.msra.mxu3 %v1247_v6 }
  0x28   : > { %505 = vmatpush.bf16.msra.mxu0 %v1246_v7  ;;  %1466 = vmatpush.bf16.msra.mxu1 %v1246_v7 }
  0x29   : > { %1467 = vmatpush.bf16.msra.mxu2 %v1246_v7  ;;  %1468 = vmatpush.bf16.msra.mxu3 %v1246_v7 }
  0x2b   : > { %506 = vmatmul.bf16.vlgmr.msra.gmra.mxu0 %v1214_v8  ;;  %546 = vmatmul.bf16.vlgmr.msra.gmra.mxu1 %v1222_v9 }
  0x2c   : > { %586 = vmatmul.bf16.vlgmr.msra.gmra.mxu2 %v1230_v10  ;;  %626 = vmatmul.bf16.vlgmr.msra.gmra.mxu3 %v1238_v11 }
  0x3b   : > { %511 = vmatmul.bf16.gmra.mxu0 %v1215_v12  ;;  %551 = vmatmul.bf16.gmra.mxu1 %v1223_v13 }
  0x3c   : > { %591 = vmatmul.bf16.gmra.mxu2 %v1231_v14  ;;  %631 = vmatmul.bf16.gmra.mxu3 %v1239_v15 }
  0x4b   : > { %516 = vmatmul.bf16.gmra.mxu0 %v1216_v16  ;;  %556 = vmatmul.bf16.gmra.mxu1 %v1224_v17 }
  0x4c   : > { %596 = vmatmul.bf16.gmra.mxu2 %v1232_v18  ;;  %636 = vmatmul.bf16.gmra.mxu3 %v1240_v19 }
  0x5b   : > { %521 = vmatmul.bf16.gmra.mxu0 %v1217_v20  ;;  %561 = vmatmul.bf16.gmra.mxu1 %v1225_v21 }
  0x5c   : > { %601 = vmatmul.bf16.gmra.mxu2 %v1233_v22  ;;  %641 = vmatmul.bf16.gmra.mxu3 %v1241_v23 }
  0x6b   : > { %526 = vmatmul.bf16.gmra.mxu0 %v1218_v24  ;;  %566 = vmatmul.bf16.gmra.mxu1 %v1226_v25 }
  0x6c   : > { %606 = vmatmul.bf16.gmra.mxu2 %v1234_v26  ;;  %646 = vmatmul.bf16.gmra.mxu3 %v1242_v27 }
  0x7b   : > { %531 = vmatmul.bf16.gmra.mxu0 %v1219_v28  ;;  %571 = vmatmul.bf16.gmra.mxu1 %v1227_v29 }
  0x7c   : > { %611 = vmatmul.bf16.gmra.mxu2 %v1235_v30  ;;  %651 = vmatmul.bf16.gmra.mxu3 %v1243_v31 }
  0x8b   : > { %536 = vmatmul.bf16.gmra.mxu0 %v1220_v32  ;;  %576 = vmatmul.bf16.gmra.mxu1 %v1228_v33 }
  0x8c   : > { %616 = vmatmul.bf16.gmra.mxu2 %v1236_v34  ;;  %656 = vmatmul.bf16.gmra.mxu3 %v1244_v35 }
  0x9b   : > { %541 = vmatmul.bf16.gmra.mxu0 %v1221_v36  ;;  %581 = vmatmul.bf16.gmra.mxu1 %v1229_v37 }
  0x9c   : > { %621 = vmatmul.bf16.gmra.mxu2 %v1237_v38  ;;  %661 = vmatmul.bf16.gmra.mxu3 %v1245_v39 }
  0xa8   : > { %v507_v40 = vpop.f32.mrf.mxu0  ;;  %v547_v41 = vpop.f32.mrf.mxu1 }
  0xa9   : > { %v508_v43 = vadd.f32 %v1583_v42, %v507_v40  ;;  %v548_v44 = vadd.f32 %v1583_v42, %v547_v41 }
  0xab   : > { %v731_v49 = vmul.f32 0.2, %v508_v43  ;;  %v747_v50 = vmul.f32 0.2, %v548_v44  ;;  %vm667_vm0 = vcmp.ge.f32.partialorder %v508_v43, 0.0  ;;  %vm683_vm1 = vcmp.ge.f32.partialorder %v548_v44, 0.0 }
  0xad   : > { %v795_v57 = vsel %vm667_vm0, %v508_v43, %v731_v49  ;;  %v811_v58 = vsel %vm683_vm1, %v548_v44, %v747_v50 }
  0xaf   : > { %v587_v45 = vpop.f32.mrf.mxu2  ;;  %v627_v46 = vpop.f32.mrf.mxu3 }
  0xb0   : > { %v509_v47 = vpop.f32.mrf.mxu0  ;;  %v549_v48 = vpop.f32.mrf.mxu1  ;;  %v588_v55 = vadd.f32 %v1583_v42, %v587_v45  ;;  %v628_v56 = vadd.f32 %v1583_v42, %v627_v46 }
  0xb1   : > { %v510_v51 = vadd.f32 %v1583_v42, %v509_v47  ;;  %v550_v52 = vadd.f32 %v1583_v42, %v549_v48 }
  0xb2   : > { %v763_v1 = vmul.f32 0.2, %v588_v55  ;;  %v779_v2 = vmul.f32 0.2, %v628_v56  ;;  %vm699_vm4 = vcmp.ge.f32.partialorder %v588_v55, 0.0  ;;  %vm715_vm5 = vcmp.ge.f32.partialorder %v628_v56, 0.0 }
  0xb3   : > { %vm668_vm2 = vcmp.ge.f32.partialorder %v510_v51, 0.0  ;;  %v732_v53 = vmul.f32 0.2, %v510_v51  ;;  %vm684_vm3 = vcmp.ge.f32.partialorder %v550_v52, 0.0  ;;  %v748_v54 = vmul.f32 0.2, %v550_v52 }
  0xb4   : > { %v827_v9 = vsel %vm699_vm4, %v588_v55, %v763_v1  ;;  %v843_v10 = vsel %vm715_vm5, %v628_v56, %v779_v2 }
  0xb5   : > { %v796_v59 = vsel %vm668_vm2, %v510_v51, %v732_v53  ;;  %v812_v60 = vsel %vm684_vm3, %v550_v52, %v748_v54 }
  0xb6   : > { %v1257_v61 = vpack.c.bf16 %v796_v59, %v795_v57  ;;  %v1297_v62 = vpack.c.bf16 %v812_v60, %v811_v58 }
  0xb7   : > { %v589_v63 = vpop.f32.mrf.mxu2  ;;  %v629_v0 = vpop.f32.mrf.mxu3 }
  0xb8   : > { %1258 = vst [vmem:[%s1596_s13] sm:$0xff] %v1257_v61   ;;  %v590_v3 = vadd.f32 %v1583_v42, %v589_v63  ;;  %v630_v4 = vadd.f32 %v1583_v42, %v629_v0  ;;  %v512_v5 = vpop.f32.mrf.mxu0  ;;  %v552_v6 = vpop.f32.mrf.mxu1 }
  0xb9   : > { %1421 = vst [vmem:[%s1596_s13 + $0x40] sm:$0xff] %v1297_v62   ;;  %v513_v15 = vadd.f32 %v1583_v42, %v512_v5  ;;  %v553_v16 = vadd.f32 %v1583_v42, %v552_v6 }
  0xba   : > { %vm700_vm6 = vcmp.ge.f32.partialorder %v590_v3, 0.0  ;;  %v764_v7 = vmul.f32 0.2, %v590_v3  ;;  %vm716_vm7 = vcmp.ge.f32.partialorder %v630_v4, 0.0  ;;  %v780_v8 = vmul.f32 0.2, %v630_v4 }
  0xbb   : > { %v733_v21 = vmul.f32 0.2, %v513_v15  ;;  %v749_v22 = vmul.f32 0.2, %v553_v16  ;;  %vm669_vm8 = vcmp.ge.f32.partialorder %v513_v15, 0.0  ;;  %vm685_vm9 = vcmp.ge.f32.partialorder %v553_v16, 0.0 }
  0xbc   : > { %v828_v11 = vsel %vm700_vm6, %v590_v3, %v764_v7  ;;  %v844_v12 = vsel %vm716_vm7, %v630_v4, %v780_v8 }
  0xbd   : > { %v1337_v13 = vpack.c.bf16 %v828_v11, %v827_v9  ;;  %v1377_v14 = vpack.c.bf16 %v844_v12, %v843_v10  ;;  %v797_v29 = vsel %vm669_vm8, %v513_v15, %v733_v21  ;;  %v813_v30 = vsel %vm685_vm9, %v553_v16, %v749_v22 }
  0xbf   : > { %1429 = vst [vmem:[%s1596_s13 + $0x80] sm:$0xff] %v1337_v13   ;;  %v592_v17 = vpop.f32.mrf.mxu2  ;;  %v632_v18 = vpop.f32.mrf.mxu3 }
  0xc0   : > { %1437 = vst [vmem:[%s1596_s13 + $0xc0] sm:$0xff] %v1377_v14   ;;  %v514_v19 = vpop.f32.mrf.mxu0  ;;  %v554_v20 = vpop.f32.mrf.mxu1  ;;  %v593_v27 = vadd.f32 %v1583_v42, %v592_v17  ;;  %v633_v28 = vadd.f32 %v1583_v42, %v632_v18 }
  0xc1   : > { %v515_v23 = vadd.f32 %v1583_v42, %v514_v19  ;;  %v555_v24 = vadd.f32 %v1583_v42, %v554_v20 }
  0xc2   : > { %v765_v37 = vmul.f32 0.2, %v593_v27  ;;  %v781_v38 = vmul.f32 0.2, %v633_v28  ;;  %vm701_vm12 = vcmp.ge.f32.partialorder %v593_v27, 0.0  ;;  %vm717_vm13 = vcmp.ge.f32.partialorder %v633_v28, 0.0 }
  0xc3   : > { %vm670_vm10 = vcmp.ge.f32.partialorder %v515_v23, 0.0  ;;  %v734_v25 = vmul.f32 0.2, %v515_v23  ;;  %vm686_vm11 = vcmp.ge.f32.partialorder %v555_v24, 0.0  ;;  %v750_v26 = vmul.f32 0.2, %v555_v24 }
  0xc4   : > { %v829_v46 = vsel %vm701_vm12, %v593_v27, %v765_v37  ;;  %v845_v47 = vsel %vm717_vm13, %v633_v28, %v781_v38 }
  0xc5   : > { %v798_v31 = vsel %vm670_vm10, %v515_v23, %v734_v25  ;;  %v814_v32 = vsel %vm686_vm11, %v555_v24, %v750_v26 }
  0xc6   : > { %v1262_v33 = vpack.c.bf16 %v798_v31, %v797_v29  ;;  %v1302_v34 = vpack.c.bf16 %v814_v32, %v813_v30 }
  0xc7   : > { %v594_v35 = vpop.f32.mrf.mxu2  ;;  %v634_v36 = vpop.f32.mrf.mxu3 }
  0xc8   : > { %1414 = vst [vmem:[%s1596_s13 + $0x8] sm:$0xff] %v1262_v33   ;;  %v595_v39 = vadd.f32 %v1583_v42, %v594_v35  ;;  %v635_v40 = vadd.f32 %v1583_v42, %v634_v36  ;;  %v517_v41 = vpop.f32.mrf.mxu0  ;;  %v557_v43 = vpop.f32.mrf.mxu1 }
  0xc9   : > { %1422 = vst [vmem:[%s1596_s13 + $0x48] sm:$0xff] %v1302_v34   ;;  %v518_v52 = vadd.f32 %v1583_v42, %v517_v41  ;;  %v558_v53 = vadd.f32 %v1583_v42, %v557_v43 }
  0xca   : > { %vm702_vm14 = vcmp.ge.f32.partialorder %v595_v39, 0.0  ;;  %v766_v44 = vmul.f32 0.2, %v595_v39  ;;  %vm718_vm15 = vcmp.ge.f32.partialorder %v635_v40, 0.0  ;;  %v782_v45 = vmul.f32 0.2, %v635_v40 }
  0xcb   : > { %v735_v58 = vmul.f32 0.2, %v518_v52  ;;  %v751_v59 = vmul.f32 0.2, %v558_v53  ;;  %vm671_vm0 = vcmp.ge.f32.partialorder %v518_v52, 0.0  ;;  %vm687_vm1 = vcmp.ge.f32.partialorder %v558_v53, 0.0 }
  0xcc   : > { %v830_v48 = vsel %vm702_vm14, %v595_v39, %v766_v44  ;;  %v846_v49 = vsel %vm718_vm15, %v635_v40, %v782_v45 }
  0xcd   : > { %v1342_v50 = vpack.c.bf16 %v830_v48, %v829_v46  ;;  %v1382_v51 = vpack.c.bf16 %v846_v49, %v845_v47  ;;  %v799_v2 = vsel %vm671_vm0, %v518_v52, %v735_v58  ;;  %v815_v3 = vsel %vm687_vm1, %v558_v53, %v751_v59 }
  0xcf   : > { %1430 = vst [vmem:[%s1596_s13 + $0x88] sm:$0xff] %v1342_v50   ;;  %v597_v54 = vpop.f32.mrf.mxu2  ;;  %v637_v55 = vpop.f32.mrf.mxu3 }
  0xd0   : > { %1438 = vst [vmem:[%s1596_s13 + $0xc8] sm:$0xff] %v1382_v51   ;;  %v519_v56 = vpop.f32.mrf.mxu0  ;;  %v559_v57 = vpop.f32.mrf.mxu1  ;;  %v598_v0 = vadd.f32 %v1583_v42, %v597_v54  ;;  %v638_v1 = vadd.f32 %v1583_v42, %v637_v55 }
  0xd1   : > { %v520_v60 = vadd.f32 %v1583_v42, %v519_v56  ;;  %v560_v61 = vadd.f32 %v1583_v42, %v559_v57 }
  0xd2   : > { %v767_v10 = vmul.f32 0.2, %v598_v0  ;;  %v783_v11 = vmul.f32 0.2, %v638_v1  ;;  %vm703_vm4 = vcmp.ge.f32.partialorder %v598_v0, 0.0  ;;  %vm719_vm5 = vcmp.ge.f32.partialorder %v638_v1, 0.0 }
  0xd3   : > { %vm672_vm2 = vcmp.ge.f32.partialorder %v520_v60, 0.0  ;;  %v736_v62 = vmul.f32 0.2, %v520_v60  ;;  %vm688_vm3 = vcmp.ge.f32.partialorder %v560_v61, 0.0  ;;  %v752_v63 = vmul.f32 0.2, %v560_v61 }
  0xd4   : > { %v831_v18 = vsel %vm703_vm4, %v598_v0, %v767_v10  ;;  %v847_v19 = vsel %vm719_vm5, %v638_v1, %v783_v11 }
  0xd5   : > { %v800_v4 = vsel %vm672_vm2, %v520_v60, %v736_v62  ;;  %v816_v5 = vsel %vm688_vm3, %v560_v61, %v752_v63 }
  0xd6   : > { %v1267_v6 = vpack.c.bf16 %v800_v4, %v799_v2  ;;  %v1307_v7 = vpack.c.bf16 %v816_v5, %v815_v3 }
  0xd7   : > { %v599_v8 = vpop.f32.mrf.mxu2  ;;  %v639_v9 = vpop.f32.mrf.mxu3 }
  0xd8   : > { %1415 = vst [vmem:[%s1596_s13 + $0x10] sm:$0xff] %v1267_v6   ;;  %v600_v12 = vadd.f32 %v1583_v42, %v599_v8  ;;  %v640_v13 = vadd.f32 %v1583_v42, %v639_v9  ;;  %v522_v14 = vpop.f32.mrf.mxu0  ;;  %v562_v15 = vpop.f32.mrf.mxu1 }
  0xd9   : > { %1423 = vst [vmem:[%s1596_s13 + $0x50] sm:$0xff] %v1307_v7   ;;  %v523_v24 = vadd.f32 %v1583_v42, %v522_v14  ;;  %v563_v25 = vadd.f32 %v1583_v42, %v562_v15 }
  0xda   : > { %vm704_vm6 = vcmp.ge.f32.partialorder %v600_v12, 0.0  ;;  %v768_v16 = vmul.f32 0.2, %v600_v12  ;;  %vm720_vm7 = vcmp.ge.f32.partialorder %v640_v13, 0.0  ;;  %v784_v17 = vmul.f32 0.2, %v640_v13 }
  0xdb   : > { %v737_v30 = vmul.f32 0.2, %v523_v24  ;;  %v753_v31 = vmul.f32 0.2, %v563_v25  ;;  %vm673_vm8 = vcmp.ge.f32.partialorder %v523_v24, 0.0  ;;  %vm689_vm9 = vcmp.ge.f32.partialorder %v563_v25, 0.0 }
  0xdc   : > { %v832_v20 = vsel %vm704_vm6, %v600_v12, %v768_v16  ;;  %v848_v21 = vsel %vm720_vm7, %v640_v13, %v784_v17 }
  0xdd   : > { %v1347_v22 = vpack.c.bf16 %v832_v20, %v831_v18  ;;  %v1387_v23 = vpack.c.bf16 %v848_v21, %v847_v19  ;;  %v801_v38 = vsel %vm673_vm8, %v523_v24, %v737_v30  ;;  %v817_v39 = vsel %vm689_vm9, %v563_v25, %v753_v31 }
  0xdf   : > { %1431 = vst [vmem:[%s1596_s13 + $0x90] sm:$0xff] %v1347_v22   ;;  %v602_v26 = vpop.f32.mrf.mxu2  ;;  %v642_v27 = vpop.f32.mrf.mxu3 }
  0xe0   : > { %1439 = vst [vmem:[%s1596_s13 + $0xd0] sm:$0xff] %v1387_v23   ;;  %v524_v28 = vpop.f32.mrf.mxu0  ;;  %v564_v29 = vpop.f32.mrf.mxu1  ;;  %v603_v36 = vadd.f32 %v1583_v42, %v602_v26  ;;  %v643_v37 = vadd.f32 %v1583_v42, %v642_v27 }
  0xe1   : > { %v525_v32 = vadd.f32 %v1583_v42, %v524_v28  ;;  %v565_v33 = vadd.f32 %v1583_v42, %v564_v29 }
  0xe2   : > { %v769_v47 = vmul.f32 0.2, %v603_v36  ;;  %v785_v48 = vmul.f32 0.2, %v643_v37  ;;  %vm705_vm12 = vcmp.ge.f32.partialorder %v603_v36, 0.0  ;;  %vm721_vm13 = vcmp.ge.f32.partialorder %v643_v37, 0.0 }
  0xe3   : > { %vm674_vm10 = vcmp.ge.f32.partialorder %v525_v32, 0.0  ;;  %v738_v34 = vmul.f32 0.2, %v525_v32  ;;  %vm690_vm11 = vcmp.ge.f32.partialorder %v565_v33, 0.0  ;;  %v754_v35 = vmul.f32 0.2, %v565_v33 }
  0xe4   : > { %v833_v55 = vsel %vm705_vm12, %v603_v36, %v769_v47  ;;  %v849_v56 = vsel %vm721_vm13, %v643_v37, %v785_v48 }
  0xe5   : > { %v802_v40 = vsel %vm674_vm10, %v525_v32, %v738_v34  ;;  %v818_v41 = vsel %vm690_vm11, %v565_v33, %v754_v35 }
  0xe6   : > { %v1272_v43 = vpack.c.bf16 %v802_v40, %v801_v38  ;;  %v1312_v44 = vpack.c.bf16 %v818_v41, %v817_v39 }
  0xe7   : > { %v604_v45 = vpop.f32.mrf.mxu2  ;;  %v644_v46 = vpop.f32.mrf.mxu3 }
  0xe8   : > { %1416 = vst [vmem:[%s1596_s13 + $0x18] sm:$0xff] %v1272_v43   ;;  %v605_v49 = vadd.f32 %v1583_v42, %v604_v45  ;;  %v645_v50 = vadd.f32 %v1583_v42, %v644_v46  ;;  %v527_v51 = vpop.f32.mrf.mxu0  ;;  %v567_v52 = vpop.f32.mrf.mxu1 }
  0xe9   : > { %1424 = vst [vmem:[%s1596_s13 + $0x58] sm:$0xff] %v1312_v44   ;;  %v528_v61 = vadd.f32 %v1583_v42, %v527_v51  ;;  %v568_v62 = vadd.f32 %v1583_v42, %v567_v52 }
  0xea   : > { %vm706_vm14 = vcmp.ge.f32.partialorder %v605_v49, 0.0  ;;  %v770_v53 = vmul.f32 0.2, %v605_v49  ;;  %vm722_vm15 = vcmp.ge.f32.partialorder %v645_v50, 0.0  ;;  %v786_v54 = vmul.f32 0.2, %v645_v50 }
  0xeb   : > { %v739_v3 = vmul.f32 0.2, %v528_v61  ;;  %v755_v4 = vmul.f32 0.2, %v568_v62  ;;  %vm675_vm0 = vcmp.ge.f32.partialorder %v528_v61, 0.0  ;;  %vm691_vm1 = vcmp.ge.f32.partialorder %v568_v62, 0.0 }
  0xec   : > { %v834_v57 = vsel %vm706_vm14, %v605_v49, %v770_v53  ;;  %v850_v58 = vsel %vm722_vm15, %v645_v50, %v786_v54 }
  0xed   : > { %v1352_v59 = vpack.c.bf16 %v834_v57, %v833_v55  ;;  %v1392_v60 = vpack.c.bf16 %v850_v58, %v849_v56  ;;  %v803_v11 = vsel %vm675_vm0, %v528_v61, %v739_v3  ;;  %v819_v12 = vsel %vm691_vm1, %v568_v62, %v755_v4 }
  0xef   : > { %1432 = vst [vmem:[%s1596_s13 + $0x98] sm:$0xff] %v1352_v59   ;;  %v607_v63 = vpop.f32.mrf.mxu2  ;;  %v647_v0 = vpop.f32.mrf.mxu3 }
  0xf0   : > { %1440 = vst [vmem:[%s1596_s13 + $0xd8] sm:$0xff] %v1392_v60   ;;  %v529_v1 = vpop.f32.mrf.mxu0  ;;  %v569_v2 = vpop.f32.mrf.mxu1  ;;  %v608_v9 = vadd.f32 %v1583_v42, %v607_v63  ;;  %v648_v10 = vadd.f32 %v1583_v42, %v647_v0 }
  0xf1   : > { %v530_v5 = vadd.f32 %v1583_v42, %v529_v1  ;;  %v570_v6 = vadd.f32 %v1583_v42, %v569_v2 }
  0xf2   : > { %v771_v19 = vmul.f32 0.2, %v608_v9  ;;  %v787_v20 = vmul.f32 0.2, %v648_v10  ;;  %vm707_vm4 = vcmp.ge.f32.partialorder %v608_v9, 0.0  ;;  %vm723_vm5 = vcmp.ge.f32.partialorder %v648_v10, 0.0 }
  0xf3   : > { %vm676_vm2 = vcmp.ge.f32.partialorder %v530_v5, 0.0  ;;  %v740_v7 = vmul.f32 0.2, %v530_v5  ;;  %vm692_vm3 = vcmp.ge.f32.partialorder %v570_v6, 0.0  ;;  %v756_v8 = vmul.f32 0.2, %v570_v6 }
  0xf4   : > { %v835_v27 = vsel %vm707_vm4, %v608_v9, %v771_v19  ;;  %v851_v28 = vsel %vm723_vm5, %v648_v10, %v787_v20 }
  0xf5   : > { %v804_v13 = vsel %vm676_vm2, %v530_v5, %v740_v7  ;;  %v820_v14 = vsel %vm692_vm3, %v570_v6, %v756_v8 }
  0xf6   : > { %v1277_v15 = vpack.c.bf16 %v804_v13, %v803_v11  ;;  %v1317_v16 = vpack.c.bf16 %v820_v14, %v819_v12 }
  0xf7   : > { %v609_v17 = vpop.f32.mrf.mxu2  ;;  %v649_v18 = vpop.f32.mrf.mxu3 }
  0xf8   : > { %1417 = vst [vmem:[%s1596_s13 + $0x20] sm:$0xff] %v1277_v15   ;;  %v610_v21 = vadd.f32 %v1583_v42, %v609_v17  ;;  %v650_v22 = vadd.f32 %v1583_v42, %v649_v18  ;;  %v532_v23 = vpop.f32.mrf.mxu0  ;;  %v572_v24 = vpop.f32.mrf.mxu1 }
  0xf9   : > { %1425 = vst [vmem:[%s1596_s13 + $0x60] sm:$0xff] %v1317_v16   ;;  %v533_v33 = vadd.f32 %v1583_v42, %v532_v23  ;;  %v573_v34 = vadd.f32 %v1583_v42, %v572_v24 }
  0xfa   : > { %vm708_vm6 = vcmp.ge.f32.partialorder %v610_v21, 0.0  ;;  %v772_v25 = vmul.f32 0.2, %v610_v21  ;;  %vm724_vm7 = vcmp.ge.f32.partialorder %v650_v22, 0.0  ;;  %v788_v26 = vmul.f32 0.2, %v650_v22 }
  0xfb   : > { %v741_v39 = vmul.f32 0.2, %v533_v33  ;;  %v757_v40 = vmul.f32 0.2, %v573_v34  ;;  %vm677_vm8 = vcmp.ge.f32.partialorder %v533_v33, 0.0  ;;  %vm693_vm9 = vcmp.ge.f32.partialorder %v573_v34, 0.0 }
  0xfc   : > { %v836_v29 = vsel %vm708_vm6, %v610_v21, %v772_v25  ;;  %v852_v30 = vsel %vm724_vm7, %v650_v22, %v788_v26 }
  0xfd   : > { %v1357_v31 = vpack.c.bf16 %v836_v29, %v835_v27  ;;  %v1397_v32 = vpack.c.bf16 %v852_v30, %v851_v28  ;;  %v805_v48 = vsel %vm677_vm8, %v533_v33, %v741_v39  ;;  %v821_v49 = vsel %vm693_vm9, %v573_v34, %v757_v40 }
  0xff   : > { %1433 = vst [vmem:[%s1596_s13 + $0xa0] sm:$0xff] %v1357_v31   ;;  %v612_v35 = vpop.f32.mrf.mxu2  ;;  %v652_v36 = vpop.f32.mrf.mxu3 }
 0x100   : > { %1441 = vst [vmem:[%s1596_s13 + $0xe0] sm:$0xff] %v1397_v32   ;;  %v534_v37 = vpop.f32.mrf.mxu0  ;;  %v574_v38 = vpop.f32.mrf.mxu1  ;;  %v613_v46 = vadd.f32 %v1583_v42, %v612_v35  ;;  %v653_v47 = vadd.f32 %v1583_v42, %v652_v36 }
 0x101   : > { %v535_v41 = vadd.f32 %v1583_v42, %v534_v37  ;;  %v575_v43 = vadd.f32 %v1583_v42, %v574_v38 }
 0x102   : > { %v773_v56 = vmul.f32 0.2, %v613_v46  ;;  %v789_v57 = vmul.f32 0.2, %v653_v47  ;;  %vm709_vm12 = vcmp.ge.f32.partialorder %v613_v46, 0.0  ;;  %vm725_vm13 = vcmp.ge.f32.partialorder %v653_v47, 0.0 }
 0x103   : > { %vm678_vm10 = vcmp.ge.f32.partialorder %v535_v41, 0.0  ;;  %v742_v44 = vmul.f32 0.2, %v535_v41  ;;  %vm694_vm11 = vcmp.ge.f32.partialorder %v575_v43, 0.0  ;;  %v758_v45 = vmul.f32 0.2, %v575_v43 }
 0x104   : > { %v837_v0 = vsel %vm709_vm12, %v613_v46, %v773_v56  ;;  %v853_v1 = vsel %vm725_vm13, %v653_v47, %v789_v57 }
 0x105   : > { %v806_v50 = vsel %vm678_vm10, %v535_v41, %v742_v44  ;;  %v822_v51 = vsel %vm694_vm11, %v575_v43, %v758_v45 }
 0x106   : > { %v1282_v52 = vpack.c.bf16 %v806_v50, %v805_v48  ;;  %v1322_v53 = vpack.c.bf16 %v822_v51, %v821_v49 }
 0x107   : > { %v614_v54 = vpop.f32.mrf.mxu2  ;;  %v654_v55 = vpop.f32.mrf.mxu3 }
 0x108   : > { %1418 = vst [vmem:[%s1596_s13 + $0x28] sm:$0xff] %v1282_v52   ;;  %v615_v58 = vadd.f32 %v1583_v42, %v614_v54  ;;  %v655_v59 = vadd.f32 %v1583_v42, %v654_v55  ;;  %v537_v60 = vpop.f32.mrf.mxu0  ;;  %v577_v61 = vpop.f32.mrf.mxu1 }
 0x109   : > { %1426 = vst [vmem:[%s1596_s13 + $0x68] sm:$0xff] %v1322_v53   ;;  %v538_v6 = vadd.f32 %v1583_v42, %v537_v60  ;;  %v578_v7 = vadd.f32 %v1583_v42, %v577_v61 }
 0x10a   : > { %vm710_vm14 = vcmp.ge.f32.partialorder %v615_v58, 0.0  ;;  %v774_v62 = vmul.f32 0.2, %v615_v58  ;;  %vm726_vm15 = vcmp.ge.f32.partialorder %v655_v59, 0.0  ;;  %v790_v63 = vmul.f32 0.2, %v655_v59 }
 0x10b   : > { %v743_v12 = vmul.f32 0.2, %v538_v6  ;;  %v759_v13 = vmul.f32 0.2, %v578_v7  ;;  %vm679_vm0 = vcmp.ge.f32.partialorder %v538_v6, 0.0  ;;  %vm695_vm1 = vcmp.ge.f32.partialorder %v578_v7, 0.0 }
 0x10c   : > { %v838_v2 = vsel %vm710_vm14, %v615_v58, %v774_v62  ;;  %v854_v3 = vsel %vm726_vm15, %v655_v59, %v790_v63 }
 0x10d   : > { %v1362_v4 = vpack.c.bf16 %v838_v2, %v837_v0  ;;  %v1402_v5 = vpack.c.bf16 %v854_v3, %v853_v1  ;;  %v807_v20 = vsel %vm679_vm0, %v538_v6, %v743_v12  ;;  %v823_v21 = vsel %vm695_vm1, %v578_v7, %v759_v13 }
 0x10f   : > { %1434 = vst [vmem:[%s1596_s13 + $0xa8] sm:$0xff] %v1362_v4   ;;  %v617_v8 = vpop.f32.mrf.mxu2  ;;  %v657_v9 = vpop.f32.mrf.mxu3 }
 0x110   : > { %1442 = vst [vmem:[%s1596_s13 + $0xe8] sm:$0xff] %v1402_v5   ;;  %v539_v10 = vpop.f32.mrf.mxu0  ;;  %v579_v11 = vpop.f32.mrf.mxu1  ;;  %v618_v18 = vadd.f32 %v1583_v42, %v617_v8  ;;  %v658_v19 = vadd.f32 %v1583_v42, %v657_v9 }
 0x111   : > { %v540_v14 = vadd.f32 %v1583_v42, %v539_v10  ;;  %v580_v15 = vadd.f32 %v1583_v42, %v579_v11 }
 0x112   : > { %v775_v28 = vmul.f32 0.2, %v618_v18  ;;  %v791_v29 = vmul.f32 0.2, %v658_v19  ;;  %vm711_vm4 = vcmp.ge.f32.partialorder %v618_v18, 0.0  ;;  %vm727_vm5 = vcmp.ge.f32.partialorder %v658_v19, 0.0 }
 0x113   : > { %vm680_vm2 = vcmp.ge.f32.partialorder %v540_v14, 0.0  ;;  %v744_v16 = vmul.f32 0.2, %v540_v14  ;;  %vm696_vm3 = vcmp.ge.f32.partialorder %v580_v15, 0.0  ;;  %v760_v17 = vmul.f32 0.2, %v580_v15 }
 0x114   : > { %v839_v36 = vsel %vm711_vm4, %v618_v18, %v775_v28  ;;  %v855_v37 = vsel %vm727_vm5, %v658_v19, %v791_v29 }
 0x115   : > { %v808_v22 = vsel %vm680_vm2, %v540_v14, %v744_v16  ;;  %v824_v23 = vsel %vm696_vm3, %v580_v15, %v760_v17 }
 0x116   : > { %v1287_v24 = vpack.c.bf16 %v808_v22, %v807_v20  ;;  %v1327_v25 = vpack.c.bf16 %v824_v23, %v823_v21 }
 0x117   : > { %v619_v26 = vpop.f32.mrf.mxu2  ;;  %v659_v27 = vpop.f32.mrf.mxu3 }
 0x118   : > { %1419 = vst [vmem:[%s1596_s13 + $0x30] sm:$0xff] %v1287_v24   ;;  %v620_v30 = vadd.f32 %v1583_v42, %v619_v26  ;;  %v660_v31 = vadd.f32 %v1583_v42, %v659_v27  ;;  %v542_v32 = vpop.f32.mrf.mxu0  ;;  %v582_v33 = vpop.f32.mrf.mxu1 }
 0x119   : > { %1427 = vst [vmem:[%s1596_s13 + $0x70] sm:$0xff] %v1327_v25   ;;  %v543_v43 = vadd.f32 %v1583_v42, %v542_v32  ;;  %v583_v44 = vadd.f32 %v1583_v42, %v582_v33 }
 0x11a   : > { %vm712_vm6 = vcmp.ge.f32.partialorder %v620_v30, 0.0  ;;  %v776_v34 = vmul.f32 0.2, %v620_v30  ;;  %vm728_vm7 = vcmp.ge.f32.partialorder %v660_v31, 0.0  ;;  %v792_v35 = vmul.f32 0.2, %v660_v31 }
 0x11b   : > { %v745_v49 = vmul.f32 0.2, %v543_v43  ;;  %v761_v50 = vmul.f32 0.2, %v583_v44  ;;  %vm681_vm8 = vcmp.ge.f32.partialorder %v543_v43, 0.0  ;;  %vm697_vm9 = vcmp.ge.f32.partialorder %v583_v44, 0.0 }
 0x11c   : > { %v840_v38 = vsel %vm712_vm6, %v620_v30, %v776_v34  ;;  %v856_v39 = vsel %vm728_vm7, %v660_v31, %v792_v35 }
 0x11d   : > { %v1367_v40 = vpack.c.bf16 %v840_v38, %v839_v36  ;;  %v1407_v41 = vpack.c.bf16 %v856_v39, %v855_v37  ;;  %v809_v57 = vsel %vm681_vm8, %v543_v43, %v745_v49  ;;  %v825_v58 = vsel %vm697_vm9, %v583_v44, %v761_v50 }
 0x11f   : > { %1435 = vst [vmem:[%s1596_s13 + $0xb0] sm:$0xff] %v1367_v40   ;;  %v622_v45 = vpop.f32.mrf.mxu2  ;;  %v662_v46 = vpop.f32.mrf.mxu3 }
 0x120   : > { %1443 = vst [vmem:[%s1596_s13 + $0xf0] sm:$0xff] %v1407_v41   ;;  %v544_v47 = vpop.f32.mrf.mxu0  ;;  %v584_v48 = vpop.f32.mrf.mxu1  ;;  %v623_v55 = vadd.f32 %v1583_v42, %v622_v45  ;;  %v663_v56 = vadd.f32 %v1583_v42, %v662_v46 }
 0x121   : > { %v545_v51 = vadd.f32 %v1583_v42, %v544_v47  ;;  %v585_v52 = vadd.f32 %v1583_v42, %v584_v48 }
 0x122   : > { %v777_v1 = vmul.f32 0.2, %v623_v55  ;;  %v793_v2 = vmul.f32 0.2, %v663_v56  ;;  %vm713_vm12 = vcmp.ge.f32.partialorder %v623_v55, 0.0  ;;  %vm729_vm13 = vcmp.ge.f32.partialorder %v663_v56, 0.0 }
 0x123   : > { %vm682_vm10 = vcmp.ge.f32.partialorder %v545_v51, 0.0  ;;  %v746_v53 = vmul.f32 0.2, %v545_v51  ;;  %vm698_vm11 = vcmp.ge.f32.partialorder %v585_v52, 0.0  ;;  %v762_v54 = vmul.f32 0.2, %v585_v52 }
 0x124   : > { %v841_v7 = vsel %vm713_vm12, %v623_v55, %v777_v1  ;;  %v857_v8 = vsel %vm729_vm13, %v663_v56, %v793_v2 }
 0x125   : > { %v810_v59 = vsel %vm682_vm10, %v545_v51, %v746_v53  ;;  %v826_v60 = vsel %vm698_vm11, %v585_v52, %v762_v54 }
 0x126   : > { %v1292_v61 = vpack.c.bf16 %v810_v59, %v809_v57  ;;  %v1332_v62 = vpack.c.bf16 %v826_v60, %v825_v58 }
 0x127   : > { %v624_v63 = vpop.f32.mrf.mxu2  ;;  %v664_v0 = vpop.f32.mrf.mxu3 }
 0x128   : > { %1420 = vst [vmem:[%s1596_s13 + $0x38] sm:$0xff] %v1292_v61   ;;  %v625_v3 = vadd.f32 %v1583_v42, %v624_v63  ;;  %v665_v4 = vadd.f32 %v1583_v42, %v664_v0 }
 0x129   : > { %1428 = vst [vmem:[%s1596_s13 + $0x78] sm:$0xff] %v1332_v62  }
 0x12a   : > { %vm714_vm14 = vcmp.ge.f32.partialorder %v625_v3, 0.0  ;;  %v778_v5 = vmul.f32 0.2, %v625_v3  ;;  %vm730_vm15 = vcmp.ge.f32.partialorder %v665_v4, 0.0  ;;  %v794_v6 = vmul.f32 0.2, %v665_v4 }
 0x12c   : > { %v842_v9 = vsel %vm714_vm14, %v625_v3, %v778_v5  ;;  %v858_v10 = vsel %vm730_vm15, %v665_v4, %v794_v6 }
 0x12d   : > { %v1372_v11 = vpack.c.bf16 %v842_v9, %v841_v7  ;;  %v1412_v12 = vpack.c.bf16 %v858_v10, %v857_v8 }
 0x12f   : > { %1436 = vst [vmem:[%s1596_s13 + $0xb8] sm:$0xff] %v1372_v11  }
 0x130   : > { %1444 = vst [vmem:[%s1596_s13 + $0xf8] sm:$0xff] %v1412_v12  }
 0x131 PF: > { %s13_s12 = sadd.s32 1, %s1484_s12  }
 0x132   : > { %p10_p4 = scmp.ge.s32.totalorder %s13_s12, 6  }
 0x134   :  { %12 = sbr.rel (!%p10_p4) target bundleno = 1 (0x1), region = 62 }

// kernel: discriminator_forward.5
= control target key start
LH: loop header
LB: loop body
LE: loop exit
PB: predicated region body
PF: predicated region fallthrough
CT: control target
= control target key end

     0   :  { %s2661_s1 = inlined_call_operand.vmem [shape: bf16[256,128], index: 1, kind: input, shape index: {}]   ;;  %s2662_s2 = inlined_call_operand.vmem [shape: f32[1,128], index: 2, kind: input, shape index: {}]   ;;  %s2663_s0 = inlined_call_operand.vmem [shape: bf16[512,256], index: 0, kind: input, shape index: {}]   ;;  %s2664_s3 = inlined_call_operand.vmem [shape: bf16[512,128], index: 3, kind: output, shape index: {0}]   ;;  %s2665_s4 = inlined_call_operand.vmem [shape: f32[1,8,128], index: 4, kind: output, shape index: {1}]  }
   0x1   :  { %v1601_v0 = vld [vmem:[%s2661_s1 + $0x38] sm:$0xff]  ;;  %v1600_v2 = vld [vmem:[%s2661_s1 + $0x30] sm:$0xff]  ;;  %v1599_v4 = vld [vmem:[%s2661_s1 + $0x28] sm:$0xff] }
   0x2   :  { %v1609_v1 = vld [vmem:[%s2661_s1 + $0x78] sm:$0xff]  ;;  %532 = vmatpush.bf16.msra.mxu0 %v1601_v0  ;;  %v1608_v3 = vld [vmem:[%s2661_s1 + $0x70] sm:$0xff]  ;;  %1801 = vmatpush.bf16.msra.mxu2 %v1601_v0  ;;  %v1607_v5 = vld [vmem:[%s2661_s1 + $0x68] sm:$0xff] }
   0x3   :  { %701 = vmatpush.bf16.msra.mxu1 %v1609_v1  ;;  %1809 = vmatpush.bf16.msra.mxu3 %v1609_v1  ;;  %v1598_v6 = vld [vmem:[%s2661_s1 + $0x20] sm:$0xff]  ;;  %v1597_v8 = vld [vmem:[%s2661_s1 + $0x18] sm:$0xff]  ;;  %v1596_v10 = vld [vmem:[%s2661_s1 + $0x10] sm:$0xff] }
   0x4   :  { %v1606_v7 = vld [vmem:[%s2661_s1 + $0x60] sm:$0xff]  ;;  %v1605_v9 = vld [vmem:[%s2661_s1 + $0x58] sm:$0xff]  ;;  %v1604_v11 = vld [vmem:[%s2661_s1 + $0x50] sm:$0xff] }
   0x5   :  { %v1595_v12 = vld [vmem:[%s2661_s1 + $0x8] sm:$0xff]  ;;  %v1594_v14 = vld [vmem:[%s2661_s1] sm:$0xff]  ;;  %v1220_v22 = vld [vmem:[%s2663_s0 + $0x10] sm:$0xf] }
   0x6   :  { %533 = vmatpush.bf16.msra.mxu0 %v1600_v2  ;;  %1802 = vmatpush.bf16.msra.mxu2 %v1600_v2  ;;  %v1603_v13 = vld [vmem:[%s2661_s1 + $0x48] sm:$0xff]  ;;  %v1602_v15 = vld [vmem:[%s2661_s1 + $0x40] sm:$0xff]  ;;  %v1533_v23 = vld [vmem:[%s2663_s0 + $0x14] sm:$0xf0] }
   0x7   :  { %702 = vmatpush.bf16.msra.mxu1 %v1608_v3  ;;  %1810 = vmatpush.bf16.msra.mxu3 %v1608_v3  ;;  %v1212_v16 = vld [vmem:[%s2663_s0] sm:$0xf]  ;;  %v1531_v17 = vld [vmem:[%s2663_s0 + $0x4] sm:$0xf0]  ;;  %v1530_v18 = vld [vmem:[%s2663_s0 + $0x4] sm:$0xf]  ;;  %v1221_v26 = vor.u32 %v1533_v23, %v1220_v22 }
   0x8   :  { %v1214_v19 = vld [vmem:[%s2663_s0 + $0x8] sm:$0xf0]  ;;  %v1213_v20 = vor.u32 %v1531_v17, %v1212_v16  ;;  %v1532_v24 = vld [vmem:[%s2663_s0 + $0x14] sm:$0xf]  ;;  %v1222_v25 = vld [vmem:[%s2663_s0 + $0x18] sm:$0xf0] }
   0x9   :  { %v1217_v21 = vor.u32 %v1530_v18, %v1214_v19  ;;  %v1225_v27 = vor.u32 %v1532_v24, %v1222_v25  ;;  %v1340_v28 = vld [vmem:[%s2663_s0 + $0x100] sm:$0xf]  ;;  %v1563_v29 = vld [vmem:[%s2663_s0 + $0x104] sm:$0xf0]  ;;  %v1562_v31 = vld [vmem:[%s2663_s0 + $0x104] sm:$0xf] }
   0xa   :  { %534 = vmatpush.bf16.msra.mxu0 %v1599_v4  ;;  %1803 = vmatpush.bf16.msra.mxu2 %v1599_v4  ;;  %v1341_v30 = vor.u32 %v1563_v29, %v1340_v28  ;;  %v1342_v32 = vld [vmem:[%s2663_s0 + $0x108] sm:$0xf0]  ;;  %v1228_v34 = vld [vmem:[%s2663_s0 + $0x20] sm:$0xf]  ;;  %v1535_v35 = vld [vmem:[%s2663_s0 + $0x24] sm:$0xf0] }
   0xb   :  { %703 = vmatpush.bf16.msra.mxu1 %v1607_v5  ;;  %1811 = vmatpush.bf16.msra.mxu3 %v1607_v5  ;;  %v1345_v33 = vor.u32 %v1562_v31, %v1342_v32  ;;  %v1534_v36 = vld [vmem:[%s2663_s0 + $0x24] sm:$0xf]  ;;  %v1230_v37 = vld [vmem:[%s2663_s0 + $0x28] sm:$0xf0]  ;;  %v1229_v38 = vor.u32 %v1535_v35, %v1228_v34  ;;  %v1348_v40 = vld [vmem:[%s2663_s0 + $0x110] sm:$0xf] }
   0xc   :  { %v1233_v39 = vor.u32 %v1534_v36, %v1230_v37  ;;  %v1565_v41 = vld [vmem:[%s2663_s0 + $0x114] sm:$0xf0]  ;;  %v1564_v43 = vld [vmem:[%s2663_s0 + $0x114] sm:$0xf]  ;;  %v1350_v44 = vld [vmem:[%s2663_s0 + $0x118] sm:$0xf0] }
   0xd   :  { %v1349_v42 = vor.u32 %v1565_v41, %v1348_v40  ;;  %v1353_v45 = vor.u32 %v1564_v43, %v1350_v44  ;;  %v1236_v46 = vld [vmem:[%s2663_s0 + $0x30] sm:$0xf]  ;;  %v1537_v47 = vld [vmem:[%s2663_s0 + $0x34] sm:$0xf0]  ;;  %v1536_v48 = vld [vmem:[%s2663_s0 + $0x34] sm:$0xf] }
   0xe   :  { %535 = vmatpush.bf16.msra.mxu0 %v1598_v6  ;;  %1804 = vmatpush.bf16.msra.mxu2 %v1598_v6  ;;  %v1238_v49 = vld [vmem:[%s2663_s0 + $0x38] sm:$0xf0]  ;;  %v1237_v50 = vor.u32 %v1537_v47, %v1236_v46  ;;  %v1356_v52 = vld [vmem:[%s2663_s0 + $0x120] sm:$0xf]  ;;  %v1567_v53 = vld [vmem:[%s2663_s0 + $0x124] sm:$0xf0] }
   0xf   :  { %704 = vmatpush.bf16.msra.mxu1 %v1606_v7  ;;  %1812 = vmatpush.bf16.msra.mxu3 %v1606_v7  ;;  %v1241_v51 = vor.u32 %v1536_v48, %v1238_v49  ;;  %v1357_v54 = vor.u32 %v1567_v53, %v1356_v52  ;;  %v1566_v55 = vld [vmem:[%s2663_s0 + $0x124] sm:$0xf]  ;;  %v1358_v56 = vld [vmem:[%s2663_s0 + $0x128] sm:$0xf0]  ;;  %v1244_v58 = vld [vmem:[%s2663_s0 + $0x40] sm:$0xf] }
  0x10   :  { %v1361_v57 = vor.u32 %v1566_v55, %v1358_v56  ;;  %v1539_v59 = vld [vmem:[%s2663_s0 + $0x44] sm:$0xf0]  ;;  %v1538_v60 = vld [vmem:[%s2663_s0 + $0x44] sm:$0xf]  ;;  %v1246_v61 = vld [vmem:[%s2663_s0 + $0x48] sm:$0xf0] }
  0x11   :  { %v1245_v62 = vor.u32 %v1539_v59, %v1244_v58  ;;  %v1249_v63 = vor.u32 %v1538_v60, %v1246_v61  ;;  %v1364_v0 = vld [vmem:[%s2663_s0 + $0x130] sm:$0xf]  ;;  %v1569_v1 = vld [vmem:[%s2663_s0 + $0x134] sm:$0xf0]  ;;  %v1568_v3 = vld [vmem:[%s2663_s0 + $0x134] sm:$0xf] }
  0x12   :  { %536 = vmatpush.bf16.msra.mxu0 %v1597_v8  ;;  %1805 = vmatpush.bf16.msra.mxu2 %v1597_v8  ;;  %v1365_v2 = vor.u32 %v1569_v1, %v1364_v0  ;;  %v1366_v4 = vld [vmem:[%s2663_s0 + $0x138] sm:$0xf0]  ;;  %v1252_v6 = vld [vmem:[%s2663_s0 + $0x50] sm:$0xf]  ;;  %v1541_v7 = vld [vmem:[%s2663_s0 + $0x54] sm:$0xf0] }
  0x13   :  { %705 = vmatpush.bf16.msra.mxu1 %v1605_v9  ;;  %1813 = vmatpush.bf16.msra.mxu3 %v1605_v9  ;;  %v1369_v5 = vor.u32 %v1568_v3, %v1366_v4  ;;  %v1540_v8 = vld [vmem:[%s2663_s0 + $0x54] sm:$0xf]  ;;  %v1254_v9 = vld [vmem:[%s2663_s0 + $0x58] sm:$0xf0]  ;;  %v1374_v16 = vld [vmem:[%s2663_s0 + $0x148] sm:$0xf0] }
  0x14   :  { %v1260_v18 = vld [vmem:[%s2663_s0 + $0x60] sm:$0xf]  ;;  %v1543_v19 = vld [vmem:[%s2663_s0 + $0x64] sm:$0xf0]  ;;  %v1380_v24 = vld [vmem:[%s2663_s0 + $0x150] sm:$0xf] }
  0x15   :  { %v1261_v22 = vor.u32 %v1543_v19, %v1260_v18  ;;  %v1573_v25 = vld [vmem:[%s2663_s0 + $0x154] sm:$0xf0]  ;;  %v1382_v28 = vld [vmem:[%s2663_s0 + $0x158] sm:$0xf0]  ;;  %v1544_v32 = vld [vmem:[%s2663_s0 + $0x74] sm:$0xf] }
  0x16   :  { %537 = vmatpush.bf16.msra.mxu0 %v1596_v10  ;;  %1806 = vmatpush.bf16.msra.mxu2 %v1596_v10  ;;  %v1253_v10 = vor.u32 %v1541_v7, %v1252_v6  ;;  %v1545_v31 = vld [vmem:[%s2663_s0 + $0x74] sm:$0xf0]  ;;  %v1388_v36 = vld [vmem:[%s2663_s0 + $0x160] sm:$0xf]  ;;  %v1575_v37 = vld [vmem:[%s2663_s0 + $0x164] sm:$0xf0] }
  0x17   :  { %706 = vmatpush.bf16.msra.mxu1 %v1604_v11  ;;  %1814 = vmatpush.bf16.msra.mxu3 %v1604_v11  ;;  %v1257_v11 = vor.u32 %v1540_v8, %v1254_v9  ;;  %v1390_v40 = vld [vmem:[%s2663_s0 + $0x168] sm:$0xf0]  ;;  %v1547_v43 = vld [vmem:[%s2663_s0 + $0x84] sm:$0xf0]  ;;  %v1546_v44 = vld [vmem:[%s2663_s0 + $0x84] sm:$0xf] }
  0x18   :  { %v1577_v52 = vld [vmem:[%s2663_s0 + $0x174] sm:$0xf0]  ;;  %v1398_v55 = vld [vmem:[%s2663_s0 + $0x178] sm:$0xf0]  ;;  %v1548_v1 = vld [vmem:[%s2663_s0 + $0x94] sm:$0xf] }
  0x19   :  { %v1549_v0 = vld [vmem:[%s2663_s0 + $0x94] sm:$0xf0]  ;;  %v1406_v18 = vld [vmem:[%s2663_s0 + $0x188] sm:$0xf0] }
  0x1a   :  { %538 = vmatpush.bf16.msra.mxu0 %v1595_v12  ;;  %1807 = vmatpush.bf16.msra.mxu2 %v1595_v12  ;;  %v1372_v12 = vld [vmem:[%s2663_s0 + $0x140] sm:$0xf] }
  0x1b   :  { %707 = vmatpush.bf16.msra.mxu1 %v1603_v13  ;;  %1815 = vmatpush.bf16.msra.mxu3 %v1603_v13  ;;  %v1571_v13 = vld [vmem:[%s2663_s0 + $0x144] sm:$0xf0] }
  0x1e   :  { %539 = vmatpush.bf16.msra.mxu0 %v1594_v14  ;;  %1808 = vmatpush.bf16.msra.mxu2 %v1594_v14  ;;  %v1373_v14 = vor.u32 %v1571_v13, %v1372_v12  ;;  %v1404_v13 = vld [vmem:[%s2663_s0 + $0x180] sm:$0xf] }
  0x1f   :  { %708 = vmatpush.bf16.msra.mxu1 %v1602_v15  ;;  %1816 = vmatpush.bf16.msra.mxu3 %v1602_v15  ;;  %v1570_v15 = vld [vmem:[%s2663_s0 + $0x144] sm:$0xf] }
  0x20   :  { %v1377_v17 = vor.u32 %v1570_v15, %v1374_v16 }
  0x21   :  { %540 = vmatmul.bf16.vlgmr.msra.gmra.mxu0 %v1213_v20  ;;  %620 = vmatmul.bf16.vlgmr.msra.gmra.mxu2 %v1341_v30  ;;  %v1542_v20 = vld [vmem:[%s2663_s0 + $0x64] sm:$0xf]  ;;  %v1268_v30 = vld [vmem:[%s2663_s0 + $0x70] sm:$0xf] }
  0x22   :  { %709 = vmatmul.bf16.vlgmr.msra.gmra.mxu1 %v1217_v21  ;;  %789 = vmatmul.bf16.vlgmr.msra.gmra.mxu3 %v1345_v33  ;;  %v1262_v21 = vld [vmem:[%s2663_s0 + $0x68] sm:$0xf0]  ;;  %v1270_v33 = vld [vmem:[%s2663_s0 + $0x78] sm:$0xf0]  ;;  %v1269_v34 = vor.u32 %v1545_v31, %v1268_v30  ;;  %v1551_v30 = vld [vmem:[%s2663_s0 + $0xa4] sm:$0xf0] }
  0x23   :  { %v1265_v23 = vor.u32 %v1542_v20, %v1262_v21  ;;  %v1273_v35 = vor.u32 %v1544_v32, %v1270_v33  ;;  %v1550_v31 = vld [vmem:[%s2663_s0 + $0xa4] sm:$0xf]  ;;  %v1294_v32 = vld [vmem:[%s2663_s0 + $0xa8] sm:$0xf0] }
  0x31   :  { %545 = vmatmul.bf16.gmra.mxu0 %v1221_v26  ;;  %625 = vmatmul.bf16.gmra.mxu2 %v1349_v42  ;;  %v1381_v26 = vor.u32 %v1573_v25, %v1380_v24  ;;  %v1276_v42 = vld [vmem:[%s2663_s0 + $0x80] sm:$0xf] }
  0x32   :  { %714 = vmatmul.bf16.gmra.mxu1 %v1225_v27  ;;  %794 = vmatmul.bf16.gmra.mxu3 %v1353_v45  ;;  %v1572_v27 = vld [vmem:[%s2663_s0 + $0x154] sm:$0xf]  ;;  %v1278_v45 = vld [vmem:[%s2663_s0 + $0x88] sm:$0xf0]  ;;  %v1277_v46 = vor.u32 %v1547_v43, %v1276_v42 }
  0x33   :  { %v1385_v29 = vor.u32 %v1572_v27, %v1382_v28  ;;  %v1281_v47 = vor.u32 %v1546_v44, %v1278_v45 }
  0x41   :  { %550 = vmatmul.bf16.gmra.mxu0 %v1229_v38  ;;  %630 = vmatmul.bf16.gmra.mxu2 %v1357_v54  ;;  %v1389_v38 = vor.u32 %v1575_v37, %v1388_v36  ;;  %v1576_v54 = vld [vmem:[%s2663_s0 + $0x174] sm:$0xf] }
  0x42   :  { %719 = vmatmul.bf16.gmra.mxu1 %v1233_v39  ;;  %799 = vmatmul.bf16.gmra.mxu3 %v1361_v57  ;;  %v1574_v39 = vld [vmem:[%s2663_s0 + $0x164] sm:$0xf]  ;;  %v1401_v57 = vor.u32 %v1576_v54, %v1398_v55  ;;  %v1414_v54 = vld [vmem:[%s2663_s0 + $0x198] sm:$0xf0] }
  0x43   :  { %v1393_v41 = vor.u32 %v1574_v39, %v1390_v40  ;;  %v1297_v39 = vor.u32 %v1550_v31, %v1294_v32 }
  0x51   :  { %555 = vmatmul.bf16.gmra.mxu0 %v1237_v50  ;;  %635 = vmatmul.bf16.gmra.mxu2 %v1365_v2  ;;  %v2087_v50 = vld [vmem:[%s2662_s2] ss:$0 sm:$0xff]  ;;  %v1286_v2 = vld [vmem:[%s2663_s0 + $0x98] sm:$0xf0] }
  0x52   :  { %724 = vmatmul.bf16.gmra.mxu1 %v1241_v51  ;;  %804 = vmatmul.bf16.gmra.mxu3 %v1369_v5  ;;  %v1396_v51 = vld [vmem:[%s2663_s0 + $0x170] sm:$0xf]  ;;  %v1289_v9 = vor.u32 %v1548_v1, %v1286_v2 }
  0x53   :  { %v1397_v53 = vor.u32 %v1577_v52, %v1396_v51  ;;  %v1300_v2 = vld [vmem:[%s2663_s0 + $0xb0] sm:$0xf] }
  0x61   :  { %560 = vmatmul.bf16.gmra.mxu0 %v1245_v62  ;;  %640 = vmatmul.bf16.gmra.mxu2 %v1373_v14  ;;  %v1579_v14 = vld [vmem:[%s2663_s0 + $0x184] sm:$0xf0] }
  0x62   :  { %729 = vmatmul.bf16.gmra.mxu1 %v1249_v63  ;;  %809 = vmatmul.bf16.gmra.mxu3 %v1377_v17  ;;  %v1284_v63 = vld [vmem:[%s2663_s0 + $0x90] sm:$0xf]  ;;  %v1405_v16 = vor.u32 %v1579_v14, %v1404_v13  ;;  %v1578_v17 = vld [vmem:[%s2663_s0 + $0x184] sm:$0xf] }
  0x63   :  { %v1285_v8 = vor.u32 %v1549_v0, %v1284_v63  ;;  %v1409_v21 = vor.u32 %v1578_v17, %v1406_v18 }
  0x71   :  { %565 = vmatmul.bf16.gmra.mxu0 %v1253_v10  ;;  %645 = vmatmul.bf16.gmra.mxu2 %v1381_v26 }
  0x72   :  { %734 = vmatmul.bf16.gmra.mxu1 %v1257_v11  ;;  %814 = vmatmul.bf16.gmra.mxu3 %v1385_v29  ;;  %v1292_v29 = vld [vmem:[%s2663_s0 + $0xa0] sm:$0xf] }
  0x81   :  { %570 = vmatmul.bf16.gmra.mxu0 %v1261_v22  ;;  %650 = vmatmul.bf16.gmra.mxu2 %v1389_v38  ;;  %v1293_v38 = vor.u32 %v1551_v30, %v1292_v29 }
  0x82   :  { %739 = vmatmul.bf16.gmra.mxu1 %v1265_v23  ;;  %819 = vmatmul.bf16.gmra.mxu3 %v1393_v41 }
  0x91   :  { %575 = vmatmul.bf16.gmra.mxu0 %v1269_v34  ;;  %655 = vmatmul.bf16.gmra.mxu2 %v1397_v53  ;;  %v1580_v53 = vld [vmem:[%s2663_s0 + $0x194] sm:$0xf] }
  0x92   :  { %744 = vmatmul.bf16.gmra.mxu1 %v1273_v35  ;;  %824 = vmatmul.bf16.gmra.mxu3 %v1401_v57  ;;  %v1417_v57 = vor.u32 %v1580_v53, %v1414_v54 }
  0x9e   :  { %v541_v48 = vpop.f32.mrf.mxu0 }
  0x9f   :  { %v710_v49 = vpop.f32.mrf.mxu1  ;;  %v542_v56 = vadd.f32 %v2087_v50, %v541_v48  ;;  %v1581_v48 = vld [vmem:[%s2663_s0 + $0x194] sm:$0xf0] }
  0xa1   :  { %580 = vmatmul.bf16.gmra.mxu0 %v1277_v46  ;;  %v711_v60 = vadd.f32 %v710_v49, %v542_v56  ;;  %660 = vmatmul.bf16.gmra.mxu2 %v1405_v16 }
  0xa2   :  { %749 = vmatmul.bf16.gmra.mxu1 %v1281_v47  ;;  %829 = vmatmul.bf16.gmra.mxu3 %v1409_v21  ;;  %v1412_v47 = vld [vmem:[%s2663_s0 + $0x190] sm:$0xf]  ;;  %v1583_v21 = vld [vmem:[%s2663_s0 + $0x1a4] sm:$0xf0] }
  0xa3   :  { %v940_v3 = vmul.f32 %v711_v60, %v711_v60  ;;  %v1413_v51 = vor.u32 %v1581_v48, %v1412_v47 }
  0xa4   :  { %v621_v26 = vpop.f32.mrf.mxu2 }
  0xa5   :  { %v790_v27 = vpop.f32.mrf.mxu3  ;;  %v622_v36 = vadd.f32 %v2087_v50, %v621_v26  ;;  %v1422_v26 = vld [vmem:[%s2663_s0 + $0x1a8] sm:$0xf0] }
  0xa6   :  { %v543_v58 = vpop.f32.mrf.mxu0 }
  0xa7   :  { %v712_v59 = vpop.f32.mrf.mxu1  ;;  %v544_v61 = vadd.f32 %v2087_v50, %v543_v58  ;;  %v2149_v44 = vadd.f32 %v790_v27, %v622_v36 }
  0xa9   :  { %v713_v62 = vadd.f32 %v712_v59, %v544_v61 }
  0xab   :  { %v870_v4 = vadd.f32 %v713_v62, %v711_v60  ;;  %v941_v5 = vmul.f32 %v713_v62, %v713_v62  ;;  %v1613_v6 = vpack.c.bf16 %v713_v62, %v711_v60 }
  0xac   :  { %v623_v43 = vpop.f32.mrf.mxu2 }
  0xad   :  { %v1004_v7 = vadd.f32 %v941_v5, %v940_v3  ;;  %1614 = vst [vmem:[%s2664_s3] sm:$0xff] %v1613_v6   ;;  %v624_v45 = vadd.f32 %v2087_v50, %v623_v43  ;;  %v792_v46 = vpop.f32.mrf.mxu3  ;;  %v1553_v3 = vld [vmem:[%s2663_s0 + $0xb4] sm:$0xf0]  ;;  %v1302_v5 = vld [vmem:[%s2663_s0 + $0xb8] sm:$0xf0] }
  0xae   :  { %v546_v10 = vpop.f32.mrf.mxu0 }
  0xaf   :  { %v715_v11 = vpop.f32.mrf.mxu1  ;;  %v547_v12 = vadd.f32 %v2087_v50, %v546_v10  ;;  %v2158_v52 = vadd.f32 %v792_v46, %v624_v45 }
  0xb1   :  { %v716_v15 = vadd.f32 %v715_v11, %v547_v12  ;;  %585 = vmatmul.bf16.gmra.mxu0 %v1285_v8  ;;  %665 = vmatmul.bf16.gmra.mxu2 %v1413_v51  ;;  %v1693_v58 = vpack.c.bf16 %v2158_v52, %v2149_v44  ;;  %v1301_v11 = vor.u32 %v1553_v3, %v1300_v2 }
  0xb2   :  { %754 = vmatmul.bf16.gmra.mxu1 %v1289_v9  ;;  %834 = vmatmul.bf16.gmra.mxu3 %v1417_v57 }
  0xb3   :  { %v871_v19 = vadd.f32 %v870_v4, %v716_v15  ;;  %v942_v20 = vmul.f32 %v716_v15, %v716_v15  ;;  %1785 = vst [vmem:[%s2664_s3 + $0x80] sm:$0xff] %v1693_v58   ;;  %v1552_v4 = vld [vmem:[%s2663_s0 + $0xb4] sm:$0xf] }
  0xb4   :  { %v626_v63 = vpop.f32.mrf.mxu2  ;;  %v1305_v12 = vor.u32 %v1552_v4, %v1302_v5 }
  0xb5   :  { %v1005_v22 = vadd.f32 %v1004_v7, %v942_v20  ;;  %v795_v0 = vpop.f32.mrf.mxu3  ;;  %v627_v9 = vadd.f32 %v2087_v50, %v626_v63  ;;  %v1420_v20 = vld [vmem:[%s2663_s0 + $0x1a0] sm:$0xf] }
  0xb6   :  { %v548_v23 = vpop.f32.mrf.mxu0 }
  0xb7   :  { %v717_v24 = vpop.f32.mrf.mxu1  ;;  %v549_v25 = vadd.f32 %v2087_v50, %v548_v23  ;;  %v2189_v17 = vadd.f32 %v795_v0, %v627_v9  ;;  %v1421_v23 = vor.u32 %v1583_v21, %v1420_v20  ;;  %v1584_v0 = vld [vmem:[%s2663_s0 + $0x1b4] sm:$0xf] }
  0xb9   :  { %v718_v28 = vadd.f32 %v717_v24, %v549_v25  ;;  %v1582_v25 = vld [vmem:[%s2663_s0 + $0x1a4] sm:$0xf] }
  0xba   :  { %v1425_v29 = vor.u32 %v1582_v25, %v1422_v26 }
  0xbb   :  { %v872_v33 = vadd.f32 %v871_v19, %v718_v28  ;;  %v943_v34 = vmul.f32 %v718_v28, %v718_v28  ;;  %v1618_v35 = vpack.c.bf16 %v718_v28, %v716_v15 }
  0xbc   :  { %v628_v16 = vpop.f32.mrf.mxu2 }
  0xbd   :  { %v1006_v37 = vadd.f32 %v1005_v22, %v943_v34  ;;  %1770 = vst [vmem:[%s2664_s3 + $0x8] sm:$0xff] %v1618_v35   ;;  %v629_v18 = vadd.f32 %v2087_v50, %v628_v16  ;;  %v797_v19 = vpop.f32.mrf.mxu3  ;;  %v1318_v16 = vld [vmem:[%s2663_s0 + $0xd8] sm:$0xf0] }
  0xbe   :  { %v551_v40 = vpop.f32.mrf.mxu0 }
  0xbf   :  { %v720_v41 = vpop.f32.mrf.mxu1  ;;  %v552_v42 = vadd.f32 %v2087_v50, %v551_v40  ;;  %v2198_v24 = vadd.f32 %v797_v19, %v629_v18  ;;  %v1554_v40 = vld [vmem:[%s2663_s0 + $0xc4] sm:$0xf] }
  0xc1   :  { %v721_v49 = vadd.f32 %v720_v41, %v552_v42  ;;  %590 = vmatmul.bf16.gmra.mxu0 %v1293_v38  ;;  %670 = vmatmul.bf16.gmra.mxu2 %v1421_v23  ;;  %v1698_v30 = vpack.c.bf16 %v2198_v24, %v2189_v17  ;;  %v1308_v38 = vld [vmem:[%s2663_s0 + $0xc0] sm:$0xf]  ;;  %v1310_v41 = vld [vmem:[%s2663_s0 + $0xc8] sm:$0xf0] }
  0xc2   :  { %759 = vmatmul.bf16.gmra.mxu1 %v1297_v39  ;;  %839 = vmatmul.bf16.gmra.mxu3 %v1425_v29  ;;  %v1555_v39 = vld [vmem:[%s2663_s0 + $0xc4] sm:$0xf0] }
  0xc3   :  { %v873_v55 = vadd.f32 %v872_v33, %v721_v49  ;;  %v944_v56 = vmul.f32 %v721_v49, %v721_v49  ;;  %1786 = vst [vmem:[%s2664_s3 + $0x88] sm:$0xff] %v1698_v30   ;;  %v1309_v48 = vor.u32 %v1555_v39, %v1308_v38  ;;  %v1586_v38 = vld [vmem:[%s2663_s0 + $0x1c4] sm:$0xf]  ;;  %v1438_v39 = vld [vmem:[%s2663_s0 + $0x1c8] sm:$0xf0] }
  0xc4   :  { %v631_v35 = vpop.f32.mrf.mxu2 }
  0xc5   :  { %v1007_v59 = vadd.f32 %v1006_v37, %v944_v56  ;;  %v800_v36 = vpop.f32.mrf.mxu3  ;;  %v632_v46 = vadd.f32 %v2087_v50, %v631_v35 }
  0xc6   :  { %v553_v60 = vpop.f32.mrf.mxu0 }
  0xc7   :  { %v722_v61 = vpop.f32.mrf.mxu1  ;;  %v554_v62 = vadd.f32 %v2087_v50, %v553_v60  ;;  %v2229_v56 = vadd.f32 %v800_v36, %v632_v46  ;;  %v1585_v60 = vld [vmem:[%s2663_s0 + $0x1b4] sm:$0xf0] }
  0xc9   :  { %v723_v1 = vadd.f32 %v722_v61, %v554_v62 }
  0xcb   :  { %v874_v6 = vadd.f32 %v873_v55, %v723_v1  ;;  %v945_v7 = vmul.f32 %v723_v1, %v723_v1  ;;  %v1623_v8 = vpack.c.bf16 %v723_v1, %v721_v49  ;;  %v1313_v49 = vor.u32 %v1554_v40, %v1310_v41  ;;  %v1430_v1 = vld [vmem:[%s2663_s0 + $0x1b8] sm:$0xf0] }
  0xcc   :  { %v633_v55 = vpop.f32.mrf.mxu2  ;;  %v1433_v4 = vor.u32 %v1584_v0, %v1430_v1 }
  0xcd   :  { %v1008_v10 = vadd.f32 %v1007_v59, %v945_v7  ;;  %1771 = vst [vmem:[%s2664_s3 + $0x10] sm:$0xff] %v1623_v8   ;;  %v634_v57 = vadd.f32 %v2087_v50, %v633_v55  ;;  %v802_v58 = vpop.f32.mrf.mxu3  ;;  %v1428_v59 = vld [vmem:[%s2663_s0 + $0x1b0] sm:$0xf]  ;;  %v1559_v55 = vld [vmem:[%s2663_s0 + $0xe4] sm:$0xf0] }
  0xce   :  { %v556_v13 = vpop.f32.mrf.mxu0  ;;  %v1429_v62 = vor.u32 %v1585_v60, %v1428_v59 }
  0xcf   :  { %v725_v14 = vpop.f32.mrf.mxu1  ;;  %v557_v15 = vadd.f32 %v2087_v50, %v556_v13  ;;  %v2238_v63 = vadd.f32 %v802_v58, %v634_v57  ;;  %v1316_v13 = vld [vmem:[%s2663_s0 + $0xd0] sm:$0xf]  ;;  %v1558_v57 = vld [vmem:[%s2663_s0 + $0xe4] sm:$0xf]  ;;  %v1326_v58 = vld [vmem:[%s2663_s0 + $0xe8] sm:$0xf0] }
  0xd1   :  { %v726_v22 = vadd.f32 %v725_v14, %v557_v15  ;;  %595 = vmatmul.bf16.gmra.mxu0 %v1301_v11  ;;  %675 = vmatmul.bf16.gmra.mxu2 %v1429_v62  ;;  %v1703_v5 = vpack.c.bf16 %v2238_v63, %v2229_v56  ;;  %v1557_v14 = vld [vmem:[%s2663_s0 + $0xd4] sm:$0xf0]  ;;  %v1556_v15 = vld [vmem:[%s2663_s0 + $0xd4] sm:$0xf] }
  0xd2   :  { %764 = vmatmul.bf16.gmra.mxu1 %v1305_v12  ;;  %844 = vmatmul.bf16.gmra.mxu3 %v1433_v4  ;;  %v1317_v23 = vor.u32 %v1557_v14, %v1316_v13  ;;  %v1321_v25 = vor.u32 %v1556_v15, %v1318_v16  ;;  %v1588_v15 = vld [vmem:[%s2663_s0 + $0x1d4] sm:$0xf]  ;;  %v1446_v16 = vld [vmem:[%s2663_s0 + $0x1d8] sm:$0xf0] }
  0xd3   :  { %v875_v27 = vadd.f32 %v874_v6, %v726_v22  ;;  %v946_v28 = vmul.f32 %v726_v22, %v726_v22  ;;  %1787 = vst [vmem:[%s2664_s3 + $0x90] sm:$0xff] %v1703_v5  }
  0xd5   :  { %v1009_v31 = vadd.f32 %v1008_v10, %v946_v28  ;;  %v636_v10 = vpop.f32.mrf.mxu2  ;;  %v805_v11 = vpop.f32.mrf.mxu3 }
  0xd6   :  { %v558_v32 = vpop.f32.mrf.mxu0  ;;  %v637_v21 = vadd.f32 %v2087_v50, %v636_v10  ;;  %v1444_v10 = vld [vmem:[%s2663_s0 + $0x1d0] sm:$0xf] }
  0xd7   :  { %v727_v33 = vpop.f32.mrf.mxu1  ;;  %v559_v34 = vadd.f32 %v2087_v50, %v558_v32 }
  0xd8   :  { %v2269_v30 = vadd.f32 %v805_v11, %v637_v21  ;;  %v1589_v11 = vld [vmem:[%s2663_s0 + $0x1d4] sm:$0xf0] }
  0xd9   :  { %v728_v37 = vadd.f32 %v727_v33, %v559_v34  ;;  %v1436_v33 = vld [vmem:[%s2663_s0 + $0x1c0] sm:$0xf]  ;;  %v1587_v34 = vld [vmem:[%s2663_s0 + $0x1c4] sm:$0xf0]  ;;  %v1445_v13 = vor.u32 %v1589_v11, %v1444_v10 }
  0xda   :  { %v1437_v36 = vor.u32 %v1587_v34, %v1436_v33  ;;  %v1560_v33 = vld [vmem:[%s2663_s0 + $0xf4] sm:$0xf]  ;;  %v1334_v34 = vld [vmem:[%s2663_s0 + $0xf8] sm:$0xf0] }
  0xdb   :  { %v876_v42 = vadd.f32 %v875_v27, %v728_v37  ;;  %v947_v43 = vmul.f32 %v728_v37, %v728_v37  ;;  %v1628_v45 = vpack.c.bf16 %v728_v37, %v726_v22 }
  0xdd   :  { %v1010_v47 = vadd.f32 %v1009_v31, %v947_v43  ;;  %1772 = vst [vmem:[%s2664_s3 + $0x18] sm:$0xff] %v1628_v45   ;;  %v638_v29 = vpop.f32.mrf.mxu2  ;;  %v807_v32 = vpop.f32.mrf.mxu3 }
  0xde   :  { %v561_v51 = vpop.f32.mrf.mxu0  ;;  %v639_v31 = vadd.f32 %v2087_v50, %v638_v29 }
  0xdf   :  { %v730_v53 = vpop.f32.mrf.mxu1  ;;  %v562_v54 = vadd.f32 %v2087_v50, %v561_v51 }
  0xe0   :  { %v2278_v37 = vadd.f32 %v807_v32, %v639_v31  ;;  %v1332_v31 = vld [vmem:[%s2663_s0 + $0xf0] sm:$0xf]  ;;  %v1561_v32 = vld [vmem:[%s2663_s0 + $0xf4] sm:$0xf0] }
  0xe1   :  { %v731_v61 = vadd.f32 %v730_v53, %v562_v54  ;;  %600 = vmatmul.bf16.gmra.mxu0 %v1309_v48  ;;  %680 = vmatmul.bf16.gmra.mxu2 %v1437_v36  ;;  %v1324_v54 = vld [vmem:[%s2663_s0 + $0xe0] sm:$0xf] }
  0xe2   :  { %769 = vmatmul.bf16.gmra.mxu1 %v1313_v49  ;;  %v1708_v43 = vpack.c.bf16 %v2278_v37, %v2269_v30  ;;  %v1325_v1 = vor.u32 %v1559_v55, %v1324_v54  ;;  %v1591_v54 = vld [vmem:[%s2663_s0 + $0x1e4] sm:$0xf0] }
  0xe3   :  { %v877_v2 = vadd.f32 %v876_v42, %v731_v61  ;;  %v948_v3 = vmul.f32 %v731_v61, %v731_v61  ;;  %v1441_v42 = vor.u32 %v1586_v38, %v1438_v39 }
  0xe4   :  { %1788 = vst [vmem:[%s2664_s3 + $0x98] sm:$0xff] %v1708_v43  }
  0xe5   :  { %v1011_v6 = vadd.f32 %v1010_v47, %v948_v3  ;;  %849 = vmatmul.bf16.gmra.mxu3 %v1441_v42  ;;  %v641_v49 = vpop.f32.mrf.mxu2  ;;  %v810_v51 = vpop.f32.mrf.mxu3  ;;  %v1337_v42 = vor.u32 %v1560_v33, %v1334_v34 }
  0xe6   :  { %v563_v7 = vpop.f32.mrf.mxu0  ;;  %v642_v62 = vadd.f32 %v2087_v50, %v641_v49 }
  0xe7   :  { %v732_v8 = vpop.f32.mrf.mxu1  ;;  %v564_v9 = vadd.f32 %v2087_v50, %v563_v7 }
  0xe8   :  { %v2309_v7 = vadd.f32 %v810_v51, %v642_v62 }
  0xe9   :  { %v733_v12 = vadd.f32 %v732_v8, %v564_v9 }
  0xeb   :  { %v878_v18 = vadd.f32 %v877_v2, %v733_v12  ;;  %v949_v19 = vmul.f32 %v733_v12, %v733_v12  ;;  %v1633_v20 = vpack.c.bf16 %v733_v12, %v731_v61  ;;  %v1329_v2 = vor.u32 %v1558_v57, %v1326_v58 }
  0xed   :  { %v1012_v22 = vadd.f32 %v1011_v6, %v949_v19  ;;  %1773 = vst [vmem:[%s2664_s3 + $0x20] sm:$0xff] %v1633_v20   ;;  %v643_v6 = vpop.f32.mrf.mxu2  ;;  %v812_v9 = vpop.f32.mrf.mxu3  ;;  %v1449_v20 = vor.u32 %v1588_v15, %v1446_v16 }
  0xee   :  { %v566_v26 = vpop.f32.mrf.mxu0  ;;  %v644_v8 = vadd.f32 %v2087_v50, %v643_v6 }
  0xef   :  { %v735_v27 = vpop.f32.mrf.mxu1  ;;  %v567_v28 = vadd.f32 %v2087_v50, %v566_v26 }
  0xf0   :  { %v2318_v14 = vadd.f32 %v812_v9, %v644_v8 }
  0xf1   :  { %v736_v35 = vadd.f32 %v735_v27, %v567_v28  ;;  %605 = vmatmul.bf16.gmra.mxu0 %v1317_v23  ;;  %685 = vmatmul.bf16.gmra.mxu2 %v1445_v13 }
  0xf2   :  { %774 = vmatmul.bf16.gmra.mxu1 %v1321_v25  ;;  %v1713_v21 = vpack.c.bf16 %v2318_v14, %v2309_v7 }
  0xf3   :  { %v879_v40 = vadd.f32 %v878_v18, %v736_v35  ;;  %v950_v41 = vmul.f32 %v736_v35, %v736_v35 }
  0xf4   :  { %1789 = vst [vmem:[%s2664_s3 + $0xa0] sm:$0xff] %v1713_v21  }
  0xf5   :  { %v1013_v45 = vadd.f32 %v1012_v22, %v950_v41  ;;  %854 = vmatmul.bf16.gmra.mxu3 %v1449_v20  ;;  %v646_v27 = vpop.f32.mrf.mxu2  ;;  %v815_v28 = vpop.f32.mrf.mxu3  ;;  %v1333_v41 = vor.u32 %v1561_v32, %v1332_v31  ;;  %v1592_v31 = vld [vmem:[%s2663_s0 + $0x1f4] sm:$0xf]  ;;  %v1462_v32 = vld [vmem:[%s2663_s0 + $0x1f8] sm:$0xf0] }
  0xf6   :  { %v568_v46 = vpop.f32.mrf.mxu0  ;;  %v647_v39 = vadd.f32 %v2087_v50, %v646_v27 }
  0xf7   :  { %v737_v47 = vpop.f32.mrf.mxu1  ;;  %v569_v48 = vadd.f32 %v2087_v50, %v568_v46 }
  0xf9   :  { %v738_v53 = vadd.f32 %v737_v47, %v569_v48  ;;  %v2349_v48 = vadd.f32 %v815_v28, %v647_v39 }
  0xfb   :  { %v880_v59 = vadd.f32 %v879_v40, %v738_v53  ;;  %v951_v60 = vmul.f32 %v738_v53, %v738_v53  ;;  %v1638_v61 = vpack.c.bf16 %v738_v53, %v736_v35  ;;  %v1452_v53 = vld [vmem:[%s2663_s0 + $0x1e0] sm:$0xf] }
  0xfc   :  { %v1453_v57 = vor.u32 %v1591_v54, %v1452_v53 }
  0xfd   :  { %v1014_v0 = vadd.f32 %v1013_v45, %v951_v60  ;;  %1774 = vst [vmem:[%s2664_s3 + $0x28] sm:$0xff] %v1638_v61   ;;  %v648_v47 = vpop.f32.mrf.mxu2  ;;  %v817_v51 = vpop.f32.mrf.mxu3  ;;  %v1454_v60 = vld [vmem:[%s2663_s0 + $0x1e8] sm:$0xf0] }
  0xfe   :  { %v571_v3 = vpop.f32.mrf.mxu0  ;;  %v649_v49 = vadd.f32 %v2087_v50, %v648_v47 }
  0xff   :  { %v740_v4 = vpop.f32.mrf.mxu1  ;;  %v572_v5 = vadd.f32 %v2087_v50, %v571_v3 }
 0x100   :  { %v2358_v58 = vadd.f32 %v817_v51, %v649_v49 }
 0x101   :  { %v741_v12 = vadd.f32 %v740_v4, %v572_v5  ;;  %610 = vmatmul.bf16.gmra.mxu0 %v1325_v1  ;;  %690 = vmatmul.bf16.gmra.mxu2 %v1453_v57 }
 0x102   :  { %779 = vmatmul.bf16.gmra.mxu1 %v1329_v2  ;;  %v1718_v1 = vpack.c.bf16 %v2358_v58, %v2349_v48 }
 0x103   :  { %v881_v18 = vadd.f32 %v880_v59, %v741_v12  ;;  %v952_v19 = vmul.f32 %v741_v12, %v741_v12  ;;  %v1590_v59 = vld [vmem:[%s2663_s0 + $0x1e4] sm:$0xf] }
 0x104   :  { %1790 = vst [vmem:[%s2664_s3 + $0xa8] sm:$0xff] %v1718_v1  }
 0x105   :  { %v1015_v22 = vadd.f32 %v1014_v0, %v952_v19  ;;  %v1457_v0 = vor.u32 %v1590_v59, %v1454_v60  ;;  %v651_v6 = vpop.f32.mrf.mxu2  ;;  %v820_v8 = vpop.f32.mrf.mxu3 }
 0x106   :  { %v573_v23 = vpop.f32.mrf.mxu0  ;;  %v652_v13 = vadd.f32 %v2087_v50, %v651_v6 }
 0x107   :  { %v742_v25 = vpop.f32.mrf.mxu1  ;;  %v574_v26 = vadd.f32 %v2087_v50, %v573_v23  ;;  %859 = vmatmul.bf16.gmra.mxu3 %v1457_v0 }
 0x108   :  { %v2377_v21 = vadd.f32 %v820_v8, %v652_v13 }
 0x109   :  { %v743_v29 = vadd.f32 %v742_v25, %v574_v26  ;;  %v1460_v25 = vld [vmem:[%s2663_s0 + $0x1f0] sm:$0xf]  ;;  %v1593_v26 = vld [vmem:[%s2663_s0 + $0x1f4] sm:$0xf0] }
 0x10a   :  { %v1461_v28 = vor.u32 %v1593_v26, %v1460_v25 }
 0x10b   :  { %v882_v35 = vadd.f32 %v881_v18, %v743_v29  ;;  %v953_v36 = vmul.f32 %v743_v29, %v743_v29  ;;  %v1643_v38 = vpack.c.bf16 %v743_v29, %v741_v12 }
 0x10d   :  { %v1016_v40 = vadd.f32 %v1015_v22, %v953_v36  ;;  %1775 = vst [vmem:[%s2664_s3 + $0x30] sm:$0xff] %v1643_v38   ;;  %v653_v20 = vpop.f32.mrf.mxu2  ;;  %v822_v23 = vpop.f32.mrf.mxu3 }
 0x10e   :  { %v576_v43 = vpop.f32.mrf.mxu0  ;;  %v654_v22 = vadd.f32 %v2087_v50, %v653_v20 }
 0x10f   :  { %v745_v45 = vpop.f32.mrf.mxu1  ;;  %v577_v46 = vadd.f32 %v2087_v50, %v576_v43 }
 0x110   :  { %v2386_v29 = vadd.f32 %v822_v23, %v654_v22 }
 0x111   :  { %v746_v55 = vadd.f32 %v745_v45, %v577_v46  ;;  %615 = vmatmul.bf16.gmra.mxu0 %v1333_v41  ;;  %695 = vmatmul.bf16.gmra.mxu2 %v1461_v28 }
 0x112   :  { %784 = vmatmul.bf16.gmra.mxu1 %v1337_v42  ;;  %v1723_v36 = vpack.c.bf16 %v2386_v29, %v2377_v21 }
 0x113   :  { %v883_v61 = vadd.f32 %v882_v35, %v746_v55  ;;  %v954_v62 = vmul.f32 %v746_v55, %v746_v55  ;;  %v1465_v35 = vor.u32 %v1592_v31, %v1462_v32 }
 0x114   :  { %1791 = vst [vmem:[%s2664_s3 + $0xb0] sm:$0xff] %v1723_v36  }
 0x115   :  { %v1017_v2 = vadd.f32 %v1016_v40, %v954_v62  ;;  %v656_v42 = vpop.f32.mrf.mxu2  ;;  %v825_v43 = vpop.f32.mrf.mxu3 }
 0x116   :  { %v578_v3 = vpop.f32.mrf.mxu0  ;;  %v657_v51 = vadd.f32 %v2087_v50, %v656_v42 }
 0x117   :  { %v747_v4 = vpop.f32.mrf.mxu1  ;;  %v579_v5 = vadd.f32 %v2087_v50, %v578_v3  ;;  %864 = vmatmul.bf16.gmra.mxu3 %v1465_v35 }
 0x118   :  { %v2405_v60 = vadd.f32 %v825_v43, %v657_v51 }
 0x119   :  { %v748_v9 = vadd.f32 %v747_v4, %v579_v5 }
 0x11b   :  { %v884_v10 = vadd.f32 %v883_v61, %v748_v9  ;;  %v955_v11 = vmul.f32 %v748_v9, %v748_v9  ;;  %v1648_v12 = vpack.c.bf16 %v748_v9, %v746_v55 }
 0x11d   :  { %v1018_v15 = vadd.f32 %v1017_v2, %v955_v11  ;;  %1776 = vst [vmem:[%s2664_s3 + $0x38] sm:$0xff] %v1648_v12   ;;  %v658_v59 = vpop.f32.mrf.mxu2  ;;  %v827_v62 = vpop.f32.mrf.mxu3 }
 0x11e   :  { %v581_v16 = vpop.f32.mrf.mxu0  ;;  %v659_v61 = vadd.f32 %v2087_v50, %v658_v59 }
 0x11f   :  { %v750_v18 = vpop.f32.mrf.mxu1  ;;  %v582_v19 = vadd.f32 %v2087_v50, %v581_v16 }
 0x120   :  { %v2408_v1 = vadd.f32 %v827_v62, %v659_v61 }
 0x121   :  { %v751_v27 = vadd.f32 %v750_v18, %v582_v19 }
 0x122   :  { %v1728_v4 = vpack.c.bf16 %v2408_v1, %v2405_v60 }
 0x123   :  { %v885_v33 = vadd.f32 %v884_v10, %v751_v27  ;;  %v956_v34 = vmul.f32 %v751_v27, %v751_v27 }
 0x124   :  { %1792 = vst [vmem:[%s2664_s3 + $0xb8] sm:$0xff] %v1728_v4  }
 0x125   :  { %v1019_v38 = vadd.f32 %v1018_v15, %v956_v34  ;;  %v661_v10 = vpop.f32.mrf.mxu2  ;;  %v830_v11 = vpop.f32.mrf.mxu3 }
 0x126   :  { %v583_v39 = vpop.f32.mrf.mxu0  ;;  %v662_v18 = vadd.f32 %v2087_v50, %v661_v10 }
 0x127   :  { %v752_v40 = vpop.f32.mrf.mxu1  ;;  %v584_v41 = vadd.f32 %v2087_v50, %v583_v39 }
 0x128   :  { %v2424_v25 = vadd.f32 %v830_v11, %v662_v18 }
 0x129   :  { %v753_v45 = vadd.f32 %v752_v40, %v584_v41 }
 0x12b   :  { %v886_v46 = vadd.f32 %v885_v33, %v753_v45  ;;  %v957_v47 = vmul.f32 %v753_v45, %v753_v45  ;;  %v1653_v49 = vpack.c.bf16 %v753_v45, %v751_v27 }
 0x12d   :  { %v1020_v53 = vadd.f32 %v1019_v38, %v957_v47  ;;  %1777 = vst [vmem:[%s2664_s3 + $0x40] sm:$0xff] %v1653_v49   ;;  %v663_v23 = vpop.f32.mrf.mxu2  ;;  %v832_v27 = vpop.f32.mrf.mxu3 }
 0x12e   :  { %v586_v54 = vpop.f32.mrf.mxu0  ;;  %v664_v26 = vadd.f32 %v2087_v50, %v663_v23 }
 0x12f   :  { %v755_v55 = vpop.f32.mrf.mxu1  ;;  %v587_v57 = vadd.f32 %v2087_v50, %v586_v54 }
 0x130   :  { %v2427_v28 = vadd.f32 %v832_v27, %v664_v26 }
 0x131   :  { %v756_v0 = vadd.f32 %v755_v55, %v587_v57 }
 0x132   :  { %v1733_v31 = vpack.c.bf16 %v2427_v28, %v2424_v25 }
 0x133   :  { %v887_v2 = vadd.f32 %v886_v46, %v756_v0  ;;  %v958_v3 = vmul.f32 %v756_v0, %v756_v0 }
 0x134   :  { %1793 = vst [vmem:[%s2664_s3 + $0xc0] sm:$0xff] %v1733_v31  }
 0x135   :  { %v1021_v5 = vadd.f32 %v1020_v53, %v958_v3  ;;  %v666_v36 = vpop.f32.mrf.mxu2  ;;  %v835_v38 = vpop.f32.mrf.mxu3 }
 0x136   :  { %v588_v6 = vpop.f32.mrf.mxu0  ;;  %v667_v42 = vadd.f32 %v2087_v50, %v666_v36 }
 0x137   :  { %v757_v8 = vpop.f32.mrf.mxu1  ;;  %v589_v9 = vadd.f32 %v2087_v50, %v588_v6 }
 0x138   :  { %v2446_v47 = vadd.f32 %v835_v38, %v667_v42 }
 0x139   :  { %v758_v12 = vadd.f32 %v757_v8, %v589_v9 }
 0x13b   :  { %v2416_v13 = vadd.f32 %v887_v2, %v758_v12  ;;  %v959_v15 = vmul.f32 %v758_v12, %v758_v12  ;;  %v1658_v16 = vpack.c.bf16 %v758_v12, %v756_v0 }
 0x13d   :  { %v2419_v19 = vadd.f32 %v1021_v5, %v959_v15  ;;  %1778 = vst [vmem:[%s2664_s3 + $0x48] sm:$0xff] %v1658_v16   ;;  %v668_v46 = vpop.f32.mrf.mxu2  ;;  %v837_v51 = vpop.f32.mrf.mxu3 }
 0x13e   :  { %v591_v20 = vpop.f32.mrf.mxu0  ;;  %v669_v49 = vadd.f32 %v2087_v50, %v668_v46 }
 0x13f   :  { %v760_v22 = vpop.f32.mrf.mxu1  ;;  %v592_v32 = vadd.f32 %v2087_v50, %v591_v20 }
 0x140   :  { %v2449_v53 = vadd.f32 %v837_v51, %v669_v49 }
 0x141   :  { %v2436_v39 = vadd.f32 %v760_v22, %v592_v32 }
 0x142   :  { %v1738_v54 = vpack.c.bf16 %v2449_v53, %v2446_v47 }
 0x144   :  { %1794 = vst [vmem:[%s2664_s3 + $0xc8] sm:$0xff] %v1738_v54  }
 0x145   :  { %v671_v62 = vpop.f32.mrf.mxu2  ;;  %v840_v0 = vpop.f32.mrf.mxu3 }
 0x146   :  { %v593_v33 = vpop.f32.mrf.mxu0  ;;  %v672_v5 = vadd.f32 %v2087_v50, %v671_v62 }
 0x147   :  { %v762_v34 = vpop.f32.mrf.mxu1  ;;  %v594_v35 = vadd.f32 %v2087_v50, %v593_v33 }
 0x148   :  { %v2468_v10 = vadd.f32 %v840_v0, %v672_v5 }
 0x149   :  { %v2438_v40 = vadd.f32 %v762_v34, %v594_v35 }
 0x14b   :  { %v1663_v41 = vpack.c.bf16 %v2438_v40, %v2436_v39 }
 0x14d   :  { %1779 = vst [vmem:[%s2664_s3 + $0x50] sm:$0xff] %v1663_v41   ;;  %v673_v9 = vpop.f32.mrf.mxu2  ;;  %v842_v12 = vpop.f32.mrf.mxu3 }
 0x14e   :  { %v596_v43 = vpop.f32.mrf.mxu0  ;;  %v674_v11 = vadd.f32 %v2087_v50, %v673_v9 }
 0x14f   :  { %v765_v45 = vpop.f32.mrf.mxu1  ;;  %v597_v55 = vadd.f32 %v2087_v50, %v596_v43 }
 0x150   :  { %v2471_v15 = vadd.f32 %v842_v12, %v674_v11 }
 0x151   :  { %v2458_v2 = vadd.f32 %v765_v45, %v597_v55 }
 0x152   :  { %v1743_v16 = vpack.c.bf16 %v2471_v15, %v2468_v10 }
 0x154   :  { %1795 = vst [vmem:[%s2664_s3 + $0xd0] sm:$0xff] %v1743_v16   ;;  %v960_v16 = vmul.f32 %v2436_v39, %v2436_v39 }
 0x155   :  { %v676_v26 = vpop.f32.mrf.mxu2  ;;  %v845_v27 = vpop.f32.mrf.mxu3 }
 0x156   :  { %v598_v57 = vpop.f32.mrf.mxu0  ;;  %v677_v34 = vadd.f32 %v2087_v50, %v676_v26 }
 0x157   :  { %v767_v59 = vpop.f32.mrf.mxu1  ;;  %v599_v61 = vadd.f32 %v2087_v50, %v598_v57 }
 0x158   :  { %v2484_v41 = vadd.f32 %v845_v27, %v677_v34  ;;  %v1023_v27 = vadd.f32 %v2419_v19, %v960_v16 }
 0x159   :  { %v2460_v3 = vadd.f32 %v767_v59, %v599_v61 }
 0x15b   :  { %v1668_v4 = vpack.c.bf16 %v2460_v3, %v2458_v2 }
 0x15d   :  { %1780 = vst [vmem:[%s2664_s3 + $0x58] sm:$0xff] %v1668_v4   ;;  %v678_v38 = vpop.f32.mrf.mxu2  ;;  %v847_v43 = vpop.f32.mrf.mxu3 }
 0x15e   :  { %v601_v6 = vpop.f32.mrf.mxu0  ;;  %v679_v42 = vadd.f32 %v2087_v50, %v678_v38 }
 0x15f   :  { %v770_v8 = vpop.f32.mrf.mxu1  ;;  %v602_v18 = vadd.f32 %v2087_v50, %v601_v6 }
 0x160   :  { %v2487_v45 = vadd.f32 %v847_v43, %v679_v42 }
 0x161   :  { %v771_v31 = vadd.f32 %v770_v8, %v602_v18 }
 0x162   :  { %v1748_v46 = vpack.c.bf16 %v2487_v45, %v2484_v41 }
 0x164   :  { %1796 = vst [vmem:[%s2664_s3 + $0xd8] sm:$0xff] %v1748_v46  }
 0x165   :  { %v681_v57 = vpop.f32.mrf.mxu2 }
 0x166   :  { %v603_v20 = vpop.f32.mrf.mxu0  ;;  %v682_v4 = vadd.f32 %v2087_v50, %v681_v57 }
 0x167   :  { %v772_v22 = vpop.f32.mrf.mxu1  ;;  %v604_v23 = vadd.f32 %v2087_v50, %v603_v20  ;;  %v961_v20 = vmul.f32 %v2438_v40, %v2438_v40 }
 0x168   :  { %v850_v59 = vpop.f32.mrf.mxu3 }
 0x169   :  { %v773_v32 = vadd.f32 %v772_v22, %v604_v23  ;;  %v2501_v12 = vadd.f32 %v850_v59, %v682_v4  ;;  %v889_v23 = vadd.f32 %v2416_v13, %v2436_v39  ;;  %v1024_v43 = vadd.f32 %v1023_v27, %v961_v20 }
 0x16a   :  { %v963_v13 = vmul.f32 %v2460_v3, %v2460_v3 }
 0x16b   :  { %v1673_v33 = vpack.c.bf16 %v773_v32, %v771_v31 }
 0x16d   :  { %1781 = vst [vmem:[%s2664_s3 + $0x60] sm:$0xff] %v1673_v33   ;;  %v683_v8 = vpop.f32.mrf.mxu2  ;;  %v962_v33 = vmul.f32 %v2458_v2, %v2458_v2 }
 0x16e   :  { %v606_v35 = vpop.f32.mrf.mxu0  ;;  %v684_v9 = vadd.f32 %v2087_v50, %v683_v8 }
 0x16f   :  { %v775_v36 = vpop.f32.mrf.mxu1  ;;  %v607_v49 = vadd.f32 %v2087_v50, %v606_v35 }
 0x170   :  { %v852_v11 = vpop.f32.mrf.mxu3 }
 0x171   :  { %v776_v61 = vadd.f32 %v775_v36, %v607_v49  ;;  %v2505_v18 = vadd.f32 %v852_v11, %v684_v9  ;;  %v890_v36 = vadd.f32 %v889_v23, %v2438_v40  ;;  %v965_v40 = vmul.f32 %v773_v32, %v773_v32 }
 0x173   :  { %v1753_v22 = vpack.c.bf16 %v2505_v18, %v2501_v12  ;;  %v891_v19 = vadd.f32 %v890_v36, %v2458_v2  ;;  %v966_v11 = vmul.f32 %v776_v61, %v776_v61 }
 0x175   :  { %1797 = vst [vmem:[%s2664_s3 + $0xe0] sm:$0xff] %v1753_v22   ;;  %v686_v42 = vpop.f32.mrf.mxu2 }
 0x176   :  { %v608_v51 = vpop.f32.mrf.mxu0 }
 0x177   :  { %v777_v54 = vpop.f32.mrf.mxu1  ;;  %v609_v55 = vadd.f32 %v2087_v50, %v608_v51  ;;  %v1025_v51 = vadd.f32 %v1024_v43, %v962_v33 }
 0x178   :  { %v855_v39 = vpop.f32.mrf.mxu3 }
 0x179   :  { %v778_v62 = vadd.f32 %v777_v54, %v609_v55  ;;  %v964_v54 = vmul.f32 %v771_v31, %v771_v31  ;;  %v892_v55 = vadd.f32 %v891_v19, %v2460_v3  ;;  %v1026_v59 = vadd.f32 %v1025_v51, %v963_v13 }
 0x17b   :  { %v1678_v0 = vpack.c.bf16 %v778_v62, %v776_v61  ;;  %v1027_v4 = vadd.f32 %v1026_v59, %v964_v54  ;;  %v967_v23 = vmul.f32 %v778_v62, %v778_v62 }
 0x17d   :  { %1782 = vst [vmem:[%s2664_s3 + $0x68] sm:$0xff] %v1678_v0   ;;  %v893_v0 = vadd.f32 %v892_v55, %v771_v31  ;;  %v688_v16 = vpop.f32.mrf.mxu2  ;;  %v1028_v22 = vadd.f32 %v1027_v4, %v965_v40 }
 0x17e   :  { %v611_v5 = vpop.f32.mrf.mxu0  ;;  %v689_v3 = vadd.f32 %v2087_v50, %v688_v16 }
 0x17f   :  { %v780_v6 = vpop.f32.mrf.mxu1  ;;  %v612_v26 = vadd.f32 %v2087_v50, %v611_v5  ;;  %v894_v9 = vadd.f32 %v893_v0, %v773_v32  ;;  %v1029_v33 = vadd.f32 %v1028_v22, %v966_v11  ;;  %v973_v11 = vmul.f32 %v2158_v52, %v2158_v52 }
 0x180   :  { %v857_v20 = vpop.f32.mrf.mxu3 }
 0x181   :  { %v781_v46 = vadd.f32 %v780_v6, %v612_v26  ;;  %v687_v6 = vadd.f32 %v2087_v50, %v686_v42  ;;  %v895_v31 = vadd.f32 %v894_v9, %v776_v61  ;;  %v2534_v27 = vadd.f32 %v857_v20, %v689_v3 }
 0x183   :  { %v2532_v26 = vadd.f32 %v855_v39, %v687_v6 }
 0x185   :  { %v1758_v36 = vpack.c.bf16 %v2534_v27, %v2532_v26  ;;  %v691_v51 = vpop.f32.mrf.mxu2 }
 0x186   :  { %v613_v34 = vpop.f32.mrf.mxu0 }
 0x187   :  { %v782_v35 = vpop.f32.mrf.mxu1  ;;  %v614_v38 = vadd.f32 %v2087_v50, %v613_v34  ;;  %v896_v34 = vadd.f32 %v895_v31, %v778_v62  ;;  %1798 = vst [vmem:[%s2664_s3 + $0xe8] sm:$0xff] %v1758_v36   ;;  %v1818_v62 = vld [vmem:[%s2662_s2] ss:$0 sm:$0xff]  ;;  %v974_v31 = vmul.f32 %v2189_v17, %v2189_v17 }
 0x188   :  { %v692_v16 = vadd.f32 %v1818_v62, %v691_v51 }
 0x189   :  { %v783_v49 = vadd.f32 %v782_v35, %v614_v38  ;;  %v968_v35 = vmul.f32 %v781_v46, %v781_v46  ;;  %v1030_v38 = vadd.f32 %v1029_v33, %v967_v23  ;;  %v897_v42 = vadd.f32 %v896_v34, %v781_v46 }
 0x18a   :  { %v860_v55 = vpop.f32.mrf.mxu3 }
 0x18b   :  { %v1683_v57 = vpack.c.bf16 %v783_v49, %v781_v46  ;;  %v969_v43 = vmul.f32 %v783_v49, %v783_v49  ;;  %v898_v61 = vadd.f32 %v897_v42, %v783_v49  ;;  %v2556_v33 = vadd.f32 %v860_v55, %v692_v16 }
 0x18d   :  { %1783 = vst [vmem:[%s2664_s3 + $0x70] sm:$0xff] %v1683_v57   ;;  %v693_v3 = vpop.f32.mrf.mxu2 }
 0x18e   :  { %v616_v5 = vpop.f32.mrf.mxu0  ;;  %v694_v20 = vadd.f32 %v1818_v62, %v693_v3 }
 0x18f   :  { %v785_v8 = vpop.f32.mrf.mxu1  ;;  %v617_v2 = vadd.f32 %v2087_v50, %v616_v5  ;;  %v1031_v50 = vadd.f32 %v1030_v38, %v968_v35  ;;  %v975_v35 = vmul.f32 %v2198_v24, %v2198_v24  ;;  %v976_v38 = vmul.f32 %v2229_v56, %v2229_v56 }
 0x191   :  { %v786_v32 = vadd.f32 %v785_v8, %v617_v2  ;;  %v1032_v57 = vadd.f32 %v1031_v50, %v969_v43  ;;  %v972_v8 = vmul.f32 %v2149_v44, %v2149_v44  ;;  %v977_v43 = vmul.f32 %v2238_v63, %v2238_v63 }
 0x192   :  { %v862_v22 = vpop.f32.mrf.mxu3 }
 0x193   :  { %v970_v39 = vmul.f32 %v786_v32, %v786_v32  ;;  %v899_v59 = vadd.f32 %v898_v61, %v786_v32  ;;  %v2558_v34 = vadd.f32 %v862_v22, %v694_v20 }
 0x195   :  { %v1033_v0 = vadd.f32 %v1032_v57, %v970_v39  ;;  %v1763_v36 = vpack.c.bf16 %v2558_v34, %v2556_v33  ;;  %v696_v50 = vpop.f32.mrf.mxu2  ;;  %v978_v39 = vmul.f32 %v2269_v30, %v2269_v30  ;;  %v980_v57 = vmul.f32 %v2309_v7, %v2309_v7 }
 0x196   :  { %v618_v13 = vpop.f32.mrf.mxu0 }
 0x197   :  { %v619_v19 = vadd.f32 %v1818_v62, %v618_v13  ;;  %v787_v54 = vpop.f32.mrf.mxu1  ;;  %1799 = vst [vmem:[%s2664_s3 + $0xf0] sm:$0xff] %v1763_v36  }
 0x199   :  { %v788_v46 = vadd.f32 %v787_v54, %v619_v19 }
 0x19a   :  { %v865_v61 = vpop.f32.mrf.mxu3 }
 0x19b   :  { %v900_v40 = vadd.f32 %v899_v59, %v788_v46  ;;  %v971_v4 = vmul.f32 %v788_v46, %v788_v46  ;;  %v1688_v5 = vpack.c.bf16 %v788_v46, %v786_v32  ;;  %v981_v46 = vmul.f32 %v2318_v14, %v2318_v14 }
 0x19d   :  { %v901_v49 = vadd.f32 %v900_v40, %v2149_v44  ;;  %v1034_v9 = vadd.f32 %v1033_v0, %v971_v4  ;;  %1784 = vst [vmem:[%s2664_s3 + $0x78] sm:$0xff] %v1688_v5   ;;  %v698_v4 = vpop.f32.mrf.mxu2 }
 0x19e   :  { %v699_v5 = vadd.f32 %v1818_v62, %v698_v4 }
 0x19f   :  { %v902_v2 = vadd.f32 %v901_v49, %v2158_v52  ;;  %v1035_v6 = vadd.f32 %v1034_v9, %v972_v8 }
 0x1a1   :  { %v903_v44 = vadd.f32 %v902_v2, %v2189_v17  ;;  %v1036_v23 = vadd.f32 %v1035_v6, %v973_v11 }
 0x1a2   :  { %v867_v8 = vpop.f32.mrf.mxu3 }
 0x1a3   :  { %v904_v52 = vadd.f32 %v903_v44, %v2198_v24  ;;  %v1037_v32 = vadd.f32 %v1036_v23, %v974_v31  ;;  %v2589_v2 = vadd.f32 %v867_v8, %v699_v5  ;;  %v999_v5 = vmul.f32 %v2534_v27, %v2534_v27 }
 0x1a5   :  { %v905_v42 = vadd.f32 %v904_v52, %v2229_v56  ;;  %v1038_v17 = vadd.f32 %v1037_v32, %v975_v35  ;;  %v979_v56 = vmul.f32 %v2278_v37, %v2278_v37  ;;  %v987_v35 = vmul.f32 %v2408_v1, %v2408_v1 }
 0x1a6   :  { %v988_v32 = vmul.f32 %v2424_v25, %v2424_v25 }
 0x1a7   :  { %v906_v13 = vadd.f32 %v905_v42, %v2238_v63  ;;  %v1039_v24 = vadd.f32 %v1038_v17, %v976_v38 }
 0x1a9   :  { %v907_v19 = vadd.f32 %v906_v13, %v2269_v30  ;;  %v1040_v51 = vadd.f32 %v1039_v24, %v977_v43  ;;  %v697_v30 = vadd.f32 %v1818_v62, %v696_v50  ;;  %v984_v62 = vmul.f32 %v2377_v21, %v2377_v21 }
 0x1ab   :  { %v908_v54 = vadd.f32 %v907_v19, %v2278_v37  ;;  %v1041_v55 = vadd.f32 %v1040_v51, %v978_v39  ;;  %v982_v37 = vmul.f32 %v2349_v48, %v2349_v48  ;;  %v866_v11 = vadd.f32 %v865_v61, %v697_v30 }
 0x1ac   :  { %v998_v30 = vmul.f32 %v2532_v26, %v2532_v26 }
 0x1ad   :  { %v909_v63 = vadd.f32 %v908_v54, %v2309_v7  ;;  %v1042_v59 = vadd.f32 %v1041_v55, %v979_v56  ;;  %v983_v7 = vmul.f32 %v2358_v58, %v2358_v58  ;;  %v1768_v16 = vpack.c.bf16 %v2589_v2, %v866_v11 }
 0x1af   :  { %v910_v0 = vadd.f32 %v909_v63, %v2318_v14  ;;  %v1043_v40 = vadd.f32 %v1042_v59, %v980_v57  ;;  %1800 = vst [vmem:[%s2664_s3 + $0xf8] sm:$0xff] %v1768_v16   ;;  %v996_v63 = vmul.f32 %v2501_v12, %v2501_v12 }
 0x1b1   :  { %v911_v49 = vadd.f32 %v910_v0, %v2349_v48  ;;  %v1044_v9 = vadd.f32 %v1043_v40, %v981_v46  ;;  %v985_v48 = vmul.f32 %v2386_v29, %v2386_v29  ;;  %v997_v0 = vmul.f32 %v2505_v18, %v2505_v18 }
 0x1b3   :  { %v912_v6 = vadd.f32 %v911_v49, %v2358_v58  ;;  %v1045_v14 = vadd.f32 %v1044_v9, %v982_v37  ;;  %v986_v58 = vmul.f32 %v2405_v60, %v2405_v60  ;;  %v1000_v37 = vmul.f32 %v2556_v33, %v2556_v33 }
 0x1b4   :  { %v1001_v9 = vmul.f32 %v2558_v34, %v2558_v34 }
 0x1b5   :  { %v1046_v3 = vadd.f32 %v1045_v14, %v983_v7  ;;  %v913_v20 = vadd.f32 %v912_v6, %v2377_v21  ;;  %v1002_v6 = vmul.f32 %v866_v11, %v866_v11 }
 0x1b7   :  { %v914_v22 = vadd.f32 %v913_v20, %v2386_v29  ;;  %v1047_v31 = vadd.f32 %v1046_v3, %v984_v62  ;;  %v989_v29 = vmul.f32 %v2427_v28, %v2427_v28 }
 0x1b9   :  { %v915_v44 = vadd.f32 %v914_v22, %v2405_v60  ;;  %v1048_v23 = vadd.f32 %v1047_v31, %v985_v48  ;;  %v990_v60 = vmul.f32 %v2446_v47, %v2446_v47 }
 0x1bb   :  { %v916_v21 = vadd.f32 %v915_v44, %v2408_v1  ;;  %v1049_v52 = vadd.f32 %v1048_v23, %v986_v58  ;;  %v991_v1 = vmul.f32 %v2449_v53, %v2449_v53 }
 0x1bd   :  { %v917_v36 = vadd.f32 %v916_v21, %v2424_v25  ;;  %v1050_v38 = vadd.f32 %v1049_v52, %v987_v35  ;;  %v992_v25 = vmul.f32 %v2468_v10, %v2468_v10 }
 0x1bf   :  { %v918_v42 = vadd.f32 %v917_v36, %v2427_v28  ;;  %v1051_v17 = vadd.f32 %v1050_v38, %v988_v32  ;;  %v993_v28 = vmul.f32 %v2471_v15, %v2471_v15 }
 0x1c1   :  { %v919_v43 = vadd.f32 %v918_v42, %v2446_v47  ;;  %v1052_v13 = vadd.f32 %v1051_v17, %v989_v29  ;;  %v994_v47 = vmul.f32 %v2484_v41, %v2484_v41 }
 0x1c3   :  { %v920_v24 = vadd.f32 %v919_v43, %v2449_v53  ;;  %v1053_v50 = vadd.f32 %v1052_v13, %v990_v60  ;;  %v995_v53 = vmul.f32 %v2487_v45, %v2487_v45 }
 0x1c5   :  { %v921_v61 = vadd.f32 %v920_v24, %v2468_v10  ;;  %v1054_v39 = vadd.f32 %v1053_v50, %v991_v1 }
 0x1c7   :  { %v922_v19 = vadd.f32 %v921_v61, %v2471_v15  ;;  %v1055_v51 = vadd.f32 %v1054_v39, %v992_v25 }
 0x1c9   :  { %v923_v56 = vadd.f32 %v922_v19, %v2484_v41  ;;  %v1056_v54 = vadd.f32 %v1055_v51, %v993_v28 }
 0x1cb   :  { %v924_v55 = vadd.f32 %v923_v56, %v2487_v45  ;;  %v1057_v57 = vadd.f32 %v1056_v54, %v994_v47 }
 0x1cd   :  { %v925_v10 = vadd.f32 %v924_v55, %v2501_v12  ;;  %v1058_v59 = vadd.f32 %v1057_v57, %v995_v53 }
 0x1cf   :  { %v1059_v15 = vadd.f32 %v1058_v59, %v996_v63  ;;  %v926_v46 = vadd.f32 %v925_v10, %v2505_v18 }
 0x1d1   :  { %v1060_v41 = vadd.f32 %v1059_v15, %v997_v0  ;;  %v927_v40 = vadd.f32 %v926_v46, %v2532_v26 }
 0x1d3   :  { %v1061_v45 = vadd.f32 %v1060_v41, %v998_v30  ;;  %v928_v4 = vadd.f32 %v927_v40, %v2534_v27  ;;  %v1003_v27 = vmul.f32 %v2589_v2, %v2589_v2 }
 0x1d5   :  { %v1062_v12 = vadd.f32 %v1061_v45, %v999_v5  ;;  %v929_v8 = vadd.f32 %v928_v4, %v2556_v33 }
 0x1d7   :  { %v1063_v49 = vadd.f32 %v1062_v12, %v1000_v37  ;;  %v930_v18 = vadd.f32 %v929_v8, %v2558_v34 }
 0x1d9   :  { %v1064_v7 = vadd.f32 %v1063_v49, %v1001_v9  ;;  %v931_v26 = vadd.f32 %v930_v18, %v866_v11 }
 0x1db   :  { %v1065_v14 = vadd.f32 %v1064_v7, %v1002_v6  ;;  %v932_v16 = vadd.f32 %v931_v26, %v2589_v2 }
 0x1dd   :  { %v933_v62 = vrot.slane %v932_v16, 4  ;;  %v1066_v3 = vadd.f32 %v1065_v14, %v1003_v27 }
 0x1df   :  { %v934_v20 = vadd.f32 %v933_v62, %v932_v16  ;;  %v1067_v48 = vrot.slane %v1066_v3, 4 }
 0x1e1   :  { %v935_v33 = vrot.slane %v934_v20, 2  ;;  %v1068_v22 = vadd.f32 %v1067_v48, %v1066_v3 }
 0x1e3   :  { %v936_v31 = vadd.f32 %v935_v33, %v934_v20  ;;  %v1069_v58 = vrot.slane %v1068_v22, 2 }
 0x1e5   :  { %v937_v44 = vrot.slane %v936_v31, 1  ;;  %v1070_v23 = vadd.f32 %v1069_v58, %v1068_v22 }
 0x1e7   :  { %v938_v34 = vadd.f32 %v937_v44, %v936_v31  ;;  %v1071_v35 = vrot.slane %v1070_v23, 1 }
 0x1e9   :  { %939 = vst [vmem:[%s2665_s4] sm:$0x1] %v938_v34  ;;  %v1072_v11 = vadd.f32 %v1071_v35, %v1070_v23 }
 0x1eb   :  { %1073 = vst [vmem:[%s2665_s4 + $0x1] sm:$0x1] %v1072_v11 }

// kernel: discriminator_forward.6
= control target key start
LH: loop header
LB: loop body
LE: loop exit
PB: predicated region body
PF: predicated region fallthrough
CT: control target
= control target key end

     0   :  { %s1520_s1 = inlined_call_operand.vmem [shape: bf16[512,128], index: 1, kind: input, shape index: {}]   ;;  %s1521_s2 = inlined_call_operand.vmem [shape: f32[1,128], index: 2, kind: input, shape index: {}]   ;;  %s1522_s0 = inlined_call_operand.vmem [shape: bf16[128,512], index: 0, kind: input, shape index: {}]   ;;  %s1523_s3 = inlined_call_operand.vmem [shape: bf16[128,128], index: 3, kind: output, shape index: {0}]   ;;  %s1524_s4 = inlined_call_operand.vmem [shape: f32[1,8,128], index: 4, kind: output, shape index: {1}]  }
   0x1   :  { %v1059_v0 = vld [vmem:[%s1520_s1 + $0x38] sm:$0xff]  ;;  %v1058_v4 = vld [vmem:[%s1520_s1 + $0x30] sm:$0xff]  ;;  %v1057_v8 = vld [vmem:[%s1520_s1 + $0x28] sm:$0xff] }
   0x2   :  { %v1067_v1 = vld [vmem:[%s1520_s1 + $0x78] sm:$0xff]  ;;  %468 = vmatpush.bf16.msra.mxu0 %v1059_v0  ;;  %v1066_v5 = vld [vmem:[%s1520_s1 + $0x70] sm:$0xff]  ;;  %v1065_v9 = vld [vmem:[%s1520_s1 + $0x68] sm:$0xff] }
   0x3   :  { %v1075_v2 = vld [vmem:[%s1520_s1 + $0xb8] sm:$0xff]  ;;  %517 = vmatpush.bf16.msra.mxu1 %v1067_v1  ;;  %v1074_v6 = vld [vmem:[%s1520_s1 + $0xb0] sm:$0xff]  ;;  %v1073_v10 = vld [vmem:[%s1520_s1 + $0xa8] sm:$0xff] }
   0x4   :  { %v1083_v3 = vld [vmem:[%s1520_s1 + $0xf8] sm:$0xff]  ;;  %566 = vmatpush.bf16.msra.mxu2 %v1075_v2  ;;  %v1082_v7 = vld [vmem:[%s1520_s1 + $0xf0] sm:$0xff]  ;;  %v1081_v11 = vld [vmem:[%s1520_s1 + $0xe8] sm:$0xff] }
   0x5   :  { %615 = vmatpush.bf16.msra.mxu3 %v1083_v3  ;;  %v1056_v12 = vld [vmem:[%s1520_s1 + $0x20] sm:$0xff]  ;;  %v1055_v16 = vld [vmem:[%s1520_s1 + $0x18] sm:$0xff]  ;;  %v1054_v20 = vld [vmem:[%s1520_s1 + $0x10] sm:$0xff] }
   0x6   :  { %469 = vmatpush.bf16.msra.mxu0 %v1058_v4  ;;  %v1064_v13 = vld [vmem:[%s1520_s1 + $0x60] sm:$0xff]  ;;  %v1063_v17 = vld [vmem:[%s1520_s1 + $0x58] sm:$0xff]  ;;  %v1062_v21 = vld [vmem:[%s1520_s1 + $0x50] sm:$0xff] }
   0x7   :  { %518 = vmatpush.bf16.msra.mxu1 %v1066_v5  ;;  %v1072_v14 = vld [vmem:[%s1520_s1 + $0xa0] sm:$0xff]  ;;  %v1071_v18 = vld [vmem:[%s1520_s1 + $0x98] sm:$0xff]  ;;  %v1070_v22 = vld [vmem:[%s1520_s1 + $0x90] sm:$0xff] }
   0x8   :  { %567 = vmatpush.bf16.msra.mxu2 %v1074_v6  ;;  %v1080_v15 = vld [vmem:[%s1520_s1 + $0xe0] sm:$0xff]  ;;  %v1079_v19 = vld [vmem:[%s1520_s1 + $0xd8] sm:$0xff]  ;;  %v1078_v23 = vld [vmem:[%s1520_s1 + $0xd0] sm:$0xff] }
   0x9   :  { %616 = vmatpush.bf16.msra.mxu3 %v1082_v7  ;;  %v1053_v24 = vld [vmem:[%s1520_s1 + $0x8] sm:$0xff]  ;;  %v1052_v28 = vld [vmem:[%s1520_s1] sm:$0xff]  ;;  %v1022_v33 = vld [vmem:[%s1522_s0 + $0xc] sm:$0xf0] }
   0xa   :  { %470 = vmatpush.bf16.msra.mxu0 %v1057_v8  ;;  %v1061_v25 = vld [vmem:[%s1520_s1 + $0x48] sm:$0xff]  ;;  %v1060_v29 = vld [vmem:[%s1520_s1 + $0x40] sm:$0xff]  ;;  %v768_v35 = vld [vmem:[%s1522_s0 + $0x10] sm:$0xf0] }
   0xb   :  { %519 = vmatpush.bf16.msra.mxu1 %v1065_v9  ;;  %v1069_v26 = vld [vmem:[%s1520_s1 + $0x88] sm:$0xff]  ;;  %v1068_v30 = vld [vmem:[%s1520_s1 + $0x80] sm:$0xff]  ;;  %v1023_v37 = vld [vmem:[%s1522_s0 + $0x14] sm:$0xf0] }
   0xc   :  { %568 = vmatpush.bf16.msra.mxu2 %v1073_v10  ;;  %v1077_v27 = vld [vmem:[%s1520_s1 + $0xc8] sm:$0xff]  ;;  %v1076_v31 = vld [vmem:[%s1520_s1 + $0xc0] sm:$0xff]  ;;  %v776_v39 = vld [vmem:[%s1522_s0 + $0x18] sm:$0xf0] }
   0xd   :  { %617 = vmatpush.bf16.msra.mxu3 %v1081_v11  ;;  %v766_v32 = vld [vmem:[%s1522_s0] sm:$0xf]  ;;  %v1020_v34 = vld [vmem:[%s1522_s0 + $0x4] sm:$0xf]  ;;  %v774_v36 = vld [vmem:[%s1522_s0 + $0x8] sm:$0xf] }
   0xe   :  { %471 = vmatpush.bf16.msra.mxu0 %v1056_v12  ;;  %v1021_v38 = vld [vmem:[%s1522_s0 + $0xc] sm:$0xf]  ;;  %v767_v40 = vor.u32 %v1022_v33, %v766_v32  ;;  %v771_v41 = vor.u32 %v1020_v34, %v768_v35  ;;  %v775_v42 = vor.u32 %v1023_v37, %v774_v36  ;;  %v782_v44 = vld [vmem:[%s1522_s0 + $0x20] sm:$0xf]  ;;  %v1026_v45 = vld [vmem:[%s1522_s0 + $0x2c] sm:$0xf0] }
   0xf   :  { %520 = vmatpush.bf16.msra.mxu1 %v1064_v13  ;;  %v779_v43 = vor.u32 %v1021_v38, %v776_v39  ;;  %v1024_v46 = vld [vmem:[%s1522_s0 + $0x24] sm:$0xf]  ;;  %v784_v47 = vld [vmem:[%s1522_s0 + $0x30] sm:$0xf0]  ;;  %v790_v48 = vld [vmem:[%s1522_s0 + $0x28] sm:$0xf]  ;;  %v783_v52 = vor.u32 %v1026_v45, %v782_v44 }
  0x10   :  { %569 = vmatpush.bf16.msra.mxu2 %v1072_v14  ;;  %v1027_v49 = vld [vmem:[%s1522_s0 + $0x34] sm:$0xf0]  ;;  %v1025_v50 = vld [vmem:[%s1522_s0 + $0x2c] sm:$0xf]  ;;  %v792_v51 = vld [vmem:[%s1522_s0 + $0x38] sm:$0xf0]  ;;  %v787_v53 = vor.u32 %v1024_v46, %v784_v47 }
  0x11   :  { %618 = vmatpush.bf16.msra.mxu3 %v1080_v15  ;;  %v791_v54 = vor.u32 %v1027_v49, %v790_v48  ;;  %v795_v55 = vor.u32 %v1025_v50, %v792_v51  ;;  %v798_v56 = vld [vmem:[%s1522_s0 + $0x40] sm:$0xf]  ;;  %v1030_v57 = vld [vmem:[%s1522_s0 + $0x4c] sm:$0xf0]  ;;  %v1028_v58 = vld [vmem:[%s1522_s0 + $0x44] sm:$0xf] }
  0x12   :  { %472 = vmatpush.bf16.msra.mxu0 %v1055_v16  ;;  %v800_v59 = vld [vmem:[%s1522_s0 + $0x50] sm:$0xf0]  ;;  %v806_v60 = vld [vmem:[%s1522_s0 + $0x48] sm:$0xf]  ;;  %v1031_v61 = vld [vmem:[%s1522_s0 + $0x54] sm:$0xf0]  ;;  %v799_v0 = vor.u32 %v1030_v57, %v798_v56 }
  0x13   :  { %521 = vmatpush.bf16.msra.mxu1 %v1063_v17  ;;  %v1029_v62 = vld [vmem:[%s1522_s0 + $0x4c] sm:$0xf]  ;;  %v808_v63 = vld [vmem:[%s1522_s0 + $0x58] sm:$0xf0]  ;;  %v803_v1 = vor.u32 %v1028_v58, %v800_v59  ;;  %v807_v2 = vor.u32 %v1031_v61, %v806_v60  ;;  %v814_v4 = vld [vmem:[%s1522_s0 + $0x60] sm:$0xf] }
  0x14   :  { %570 = vmatpush.bf16.msra.mxu2 %v1071_v18  ;;  %v811_v3 = vor.u32 %v1029_v62, %v808_v63  ;;  %v1034_v5 = vld [vmem:[%s1522_s0 + $0x6c] sm:$0xf0]  ;;  %v1032_v6 = vld [vmem:[%s1522_s0 + $0x64] sm:$0xf]  ;;  %v816_v7 = vld [vmem:[%s1522_s0 + $0x70] sm:$0xf0] }
  0x15   :  { %619 = vmatpush.bf16.msra.mxu3 %v1079_v19  ;;  %v822_v8 = vld [vmem:[%s1522_s0 + $0x68] sm:$0xf]  ;;  %v1035_v9 = vld [vmem:[%s1522_s0 + $0x74] sm:$0xf0]  ;;  %v1033_v10 = vld [vmem:[%s1522_s0 + $0x6c] sm:$0xf]  ;;  %v815_v12 = vor.u32 %v1034_v5, %v814_v4  ;;  %v819_v13 = vor.u32 %v1032_v6, %v816_v7 }
  0x16   :  { %473 = vmatpush.bf16.msra.mxu0 %v1054_v20  ;;  %v824_v11 = vld [vmem:[%s1522_s0 + $0x78] sm:$0xf0]  ;;  %v823_v14 = vor.u32 %v1035_v9, %v822_v8  ;;  %v830_v16 = vld [vmem:[%s1522_s0 + $0x80] sm:$0xf]  ;;  %v1038_v17 = vld [vmem:[%s1522_s0 + $0x8c] sm:$0xf0] }
  0x17   :  { %522 = vmatpush.bf16.msra.mxu1 %v1062_v21  ;;  %v827_v15 = vor.u32 %v1033_v10, %v824_v11  ;;  %v1036_v18 = vld [vmem:[%s1522_s0 + $0x84] sm:$0xf]  ;;  %v832_v19 = vld [vmem:[%s1522_s0 + $0x90] sm:$0xf0]  ;;  %v838_v20 = vld [vmem:[%s1522_s0 + $0x88] sm:$0xf] }
  0x18   :  { %571 = vmatpush.bf16.msra.mxu2 %v1070_v22  ;;  %v1039_v21 = vld [vmem:[%s1522_s0 + $0x94] sm:$0xf0]  ;;  %v1037_v22 = vld [vmem:[%s1522_s0 + $0x8c] sm:$0xf]  ;;  %v854_v32 = vld [vmem:[%s1522_s0 + $0xa8] sm:$0xf] }
  0x19   :  { %620 = vmatpush.bf16.msra.mxu3 %v1078_v23  ;;  %v840_v23 = vld [vmem:[%s1522_s0 + $0x98] sm:$0xf0]  ;;  %v1043_v33 = vld [vmem:[%s1522_s0 + $0xb4] sm:$0xf0]  ;;  %v1041_v34 = vld [vmem:[%s1522_s0 + $0xac] sm:$0xf] }
  0x1a   :  { %474 = vmatpush.bf16.msra.mxu0 %v1053_v24  ;;  %v831_v24 = vor.u32 %v1038_v17, %v830_v16  ;;  %v856_v35 = vld [vmem:[%s1522_s0 + $0xb8] sm:$0xf0]  ;;  %v855_v38 = vor.u32 %v1043_v33, %v854_v32  ;;  %v870_v44 = vld [vmem:[%s1522_s0 + $0xc8] sm:$0xf]  ;;  %v1047_v45 = vld [vmem:[%s1522_s0 + $0xd4] sm:$0xf0] }
  0x1b   :  { %523 = vmatpush.bf16.msra.mxu1 %v1061_v25  ;;  %v835_v25 = vor.u32 %v1036_v18, %v832_v19  ;;  %v859_v39 = vor.u32 %v1041_v34, %v856_v35  ;;  %v1045_v46 = vld [vmem:[%s1522_s0 + $0xcc] sm:$0xf]  ;;  %v872_v47 = vld [vmem:[%s1522_s0 + $0xd8] sm:$0xf0]  ;;  %v871_v50 = vor.u32 %v1047_v45, %v870_v44  ;;  %v886_v56 = vld [vmem:[%s1522_s0 + $0xe8] sm:$0xf] }
  0x1c   :  { %572 = vmatpush.bf16.msra.mxu2 %v1069_v26  ;;  %v839_v26 = vor.u32 %v1039_v21, %v838_v20  ;;  %v875_v51 = vor.u32 %v1045_v46, %v872_v47  ;;  %v1051_v57 = vld [vmem:[%s1522_s0 + $0xf4] sm:$0xf0]  ;;  %v1049_v58 = vld [vmem:[%s1522_s0 + $0xec] sm:$0xf]  ;;  %v888_v59 = vld [vmem:[%s1522_s0 + $0xf8] sm:$0xf0] }
  0x1d   :  { %621 = vmatpush.bf16.msra.mxu3 %v1077_v27  ;;  %v843_v27 = vor.u32 %v1037_v22, %v840_v23  ;;  %v887_v62 = vor.u32 %v1051_v57, %v886_v56  ;;  %v891_v63 = vor.u32 %v1049_v58, %v888_v59 }
  0x1e   :  { %475 = vmatpush.bf16.msra.mxu0 %v1052_v28  ;;  %v846_v28 = vld [vmem:[%s1522_s0 + $0xa0] sm:$0xf] }
  0x1f   :  { %524 = vmatpush.bf16.msra.mxu1 %v1060_v29  ;;  %v1042_v29 = vld [vmem:[%s1522_s0 + $0xac] sm:$0xf0] }
  0x20   :  { %573 = vmatpush.bf16.msra.mxu2 %v1068_v30  ;;  %v1040_v30 = vld [vmem:[%s1522_s0 + $0xa4] sm:$0xf]  ;;  %v847_v36 = vor.u32 %v1042_v29, %v846_v28 }
  0x21   :  { %622 = vmatpush.bf16.msra.mxu3 %v1076_v31  ;;  %476 = vmatmul.bf16.vlgmr.msra.gmra.mxu0 %v767_v40  ;;  %v848_v31 = vld [vmem:[%s1522_s0 + $0xb0] sm:$0xf0]  ;;  %v862_v40 = vld [vmem:[%s1522_s0 + $0xc0] sm:$0xf] }
  0x22   :  { %525 = vmatmul.bf16.vlgmr.msra.gmra.mxu1 %v771_v41  ;;  %v851_v37 = vor.u32 %v1040_v30, %v848_v31  ;;  %v1046_v41 = vld [vmem:[%s1522_s0 + $0xcc] sm:$0xf0] }
  0x23   :  { %574 = vmatmul.bf16.vlgmr.msra.gmra.mxu2 %v775_v42  ;;  %v1044_v42 = vld [vmem:[%s1522_s0 + $0xc4] sm:$0xf]  ;;  %v863_v48 = vor.u32 %v1046_v41, %v862_v40 }
  0x24   :  { %623 = vmatmul.bf16.vlgmr.msra.gmra.mxu3 %v779_v43  ;;  %v864_v43 = vld [vmem:[%s1522_s0 + $0xd0] sm:$0xf0] }
  0x25   :  { %v867_v49 = vor.u32 %v1044_v42, %v864_v43 }
  0x31   :  { %481 = vmatmul.bf16.gmra.mxu0 %v783_v52  ;;  %v878_v52 = vld [vmem:[%s1522_s0 + $0xe0] sm:$0xf] }
  0x32   :  { %530 = vmatmul.bf16.gmra.mxu1 %v787_v53  ;;  %v1050_v53 = vld [vmem:[%s1522_s0 + $0xec] sm:$0xf0] }
  0x33   :  { %579 = vmatmul.bf16.gmra.mxu2 %v791_v54  ;;  %v1048_v54 = vld [vmem:[%s1522_s0 + $0xe4] sm:$0xf]  ;;  %v879_v60 = vor.u32 %v1050_v53, %v878_v52 }
  0x34   :  { %628 = vmatmul.bf16.gmra.mxu3 %v795_v55  ;;  %v880_v55 = vld [vmem:[%s1522_s0 + $0xf0] sm:$0xf0] }
  0x35   :  { %v883_v61 = vor.u32 %v1048_v54, %v880_v55 }
  0x41   :  { %486 = vmatmul.bf16.gmra.mxu0 %v799_v0  ;;  %v1448_v0 = vld [vmem:[%s1521_s2] ss:$0 sm:$0xff] }
  0x42   :  { %535 = vmatmul.bf16.gmra.mxu1 %v803_v1 }
  0x43   :  { %584 = vmatmul.bf16.gmra.mxu2 %v807_v2 }
  0x44   :  { %633 = vmatmul.bf16.gmra.mxu3 %v811_v3 }
  0x51   :  { %491 = vmatmul.bf16.gmra.mxu0 %v815_v12 }
  0x52   :  { %540 = vmatmul.bf16.gmra.mxu1 %v819_v13 }
  0x53   :  { %589 = vmatmul.bf16.gmra.mxu2 %v823_v14 }
  0x54   :  { %638 = vmatmul.bf16.gmra.mxu3 %v827_v15 }
  0x61   :  { %496 = vmatmul.bf16.gmra.mxu0 %v831_v24 }
  0x62   :  { %545 = vmatmul.bf16.gmra.mxu1 %v835_v25 }
  0x63   :  { %594 = vmatmul.bf16.gmra.mxu2 %v839_v26 }
  0x64   :  { %643 = vmatmul.bf16.gmra.mxu3 %v843_v27 }
  0x71   :  { %501 = vmatmul.bf16.gmra.mxu0 %v847_v36 }
  0x72   :  { %550 = vmatmul.bf16.gmra.mxu1 %v851_v37 }
  0x73   :  { %599 = vmatmul.bf16.gmra.mxu2 %v855_v38 }
  0x74   :  { %648 = vmatmul.bf16.gmra.mxu3 %v859_v39 }
  0x81   :  { %506 = vmatmul.bf16.gmra.mxu0 %v863_v48 }
  0x82   :  { %555 = vmatmul.bf16.gmra.mxu1 %v867_v49 }
  0x83   :  { %604 = vmatmul.bf16.gmra.mxu2 %v871_v50 }
  0x84   :  { %653 = vmatmul.bf16.gmra.mxu3 %v875_v51 }
  0x91   :  { %511 = vmatmul.bf16.gmra.mxu0 %v879_v60 }
  0x92   :  { %560 = vmatmul.bf16.gmra.mxu1 %v883_v61 }
  0x93   :  { %609 = vmatmul.bf16.gmra.mxu2 %v887_v62 }
  0x94   :  { %658 = vmatmul.bf16.gmra.mxu3 %v891_v63 }
  0x9e   :  { %v477_v1 = vpop.f32.mrf.mxu0 }
  0x9f   :  { %v526_v2 = vpop.f32.mrf.mxu1  ;;  %v478_v3 = vadd.f32 %v1448_v0, %v477_v1 }
  0xa1   :  { %v527_v4 = vadd.f32 %v526_v2, %v478_v3 }
  0xa6   :  { %v575_v5 = vpop.f32.mrf.mxu2  ;;  %v479_v7 = vpop.f32.mrf.mxu0 }
  0xa7   :  { %v624_v6 = vpop.f32.mrf.mxu3  ;;  %v528_v8 = vpop.f32.mrf.mxu1  ;;  %v480_v9 = vadd.f32 %v1448_v0, %v479_v7  ;;  %v576_v10 = vadd.f32 %v575_v5, %v527_v4 }
  0xa9   :  { %v529_v11 = vadd.f32 %v528_v8, %v480_v9  ;;  %v625_v12 = vadd.f32 %v624_v6, %v576_v10 }
  0xab   :  { %v686_v20 = vmul.f32 %v625_v12, %v625_v12 }
  0xae   :  { %v577_v13 = vpop.f32.mrf.mxu2  ;;  %v482_v16 = vpop.f32.mrf.mxu0 }
  0xaf   :  { %v626_v14 = vpop.f32.mrf.mxu3  ;;  %v578_v15 = vadd.f32 %v577_v13, %v529_v11  ;;  %v531_v17 = vpop.f32.mrf.mxu1  ;;  %v483_v18 = vadd.f32 %v1448_v0, %v482_v16 }
  0xb1   :  { %v627_v19 = vadd.f32 %v626_v14, %v578_v15  ;;  %v532_v24 = vadd.f32 %v531_v17, %v483_v18 }
  0xb3   :  { %v664_v21 = vadd.f32 %v627_v19, %v625_v12  ;;  %v687_v22 = vmul.f32 %v627_v19, %v627_v19  ;;  %v1087_v23 = vpack.c.bf16 %v627_v19, %v625_v12 }
  0xb5   :  { %v702_v25 = vadd.f32 %v687_v22, %v686_v20  ;;  %1088 = vst [vmem:[%s1523_s3] sm:$0xff] %v1087_v23  }
  0xb6   :  { %v580_v26 = vpop.f32.mrf.mxu2  ;;  %v484_v29 = vpop.f32.mrf.mxu0 }
  0xb7   :  { %v629_v27 = vpop.f32.mrf.mxu3  ;;  %v581_v28 = vadd.f32 %v580_v26, %v532_v24  ;;  %v533_v30 = vpop.f32.mrf.mxu1  ;;  %v485_v32 = vadd.f32 %v1448_v0, %v484_v29 }
  0xb9   :  { %v630_v31 = vadd.f32 %v629_v27, %v581_v28  ;;  %v534_v36 = vadd.f32 %v533_v30, %v485_v32 }
  0xbb   :  { %v665_v33 = vadd.f32 %v664_v21, %v630_v31  ;;  %v688_v34 = vmul.f32 %v630_v31, %v630_v31 }
  0xbd   :  { %v703_v35 = vadd.f32 %v702_v25, %v688_v34 }
  0xbe   :  { %v582_v37 = vpop.f32.mrf.mxu2  ;;  %v487_v40 = vpop.f32.mrf.mxu0 }
  0xbf   :  { %v631_v38 = vpop.f32.mrf.mxu3  ;;  %v583_v39 = vadd.f32 %v582_v37, %v534_v36  ;;  %v536_v41 = vpop.f32.mrf.mxu1  ;;  %v488_v47 = vadd.f32 %v1448_v0, %v487_v40 }
  0xc1   :  { %v632_v42 = vadd.f32 %v631_v38, %v583_v39  ;;  %v537_v52 = vadd.f32 %v536_v41, %v488_v47 }
  0xc3   :  { %v1457_v43 = vadd.f32 %v665_v33, %v632_v42  ;;  %v689_v44 = vmul.f32 %v632_v42, %v632_v42  ;;  %v1092_v45 = vpack.c.bf16 %v632_v42, %v630_v31 }
  0xc5   :  { %v1459_v46 = vadd.f32 %v703_v35, %v689_v44  ;;  %1124 = vst [vmem:[%s1523_s3 + $0x8] sm:$0xff] %v1092_v45  }
  0xc6   :  { %v585_v48 = vpop.f32.mrf.mxu2  ;;  %v489_v50 = vpop.f32.mrf.mxu0 }
  0xc7   :  { %v634_v49 = vpop.f32.mrf.mxu3  ;;  %v538_v51 = vpop.f32.mrf.mxu1  ;;  %v490_v53 = vadd.f32 %v1448_v0, %v489_v50  ;;  %v586_v54 = vadd.f32 %v585_v48, %v537_v52 }
  0xc9   :  { %v539_v55 = vadd.f32 %v538_v51, %v490_v53  ;;  %v1466_v61 = vadd.f32 %v634_v49, %v586_v54 }
  0xce   :  { %v587_v56 = vpop.f32.mrf.mxu2  ;;  %v492_v59 = vpop.f32.mrf.mxu0 }
  0xcf   :  { %v636_v57 = vpop.f32.mrf.mxu3  ;;  %v588_v58 = vadd.f32 %v587_v56, %v539_v55  ;;  %v541_v60 = vpop.f32.mrf.mxu1  ;;  %v493_v1 = vadd.f32 %v1448_v0, %v492_v59 }
  0xd1   :  { %v1468_v62 = vadd.f32 %v636_v57, %v588_v58  ;;  %v542_v6 = vadd.f32 %v541_v60, %v493_v1 }
  0xd3   :  { %v1097_v63 = vpack.c.bf16 %v1468_v62, %v1466_v61  ;;  %v691_v1 = vmul.f32 %v1468_v62, %v1468_v62 }
  0xd5   :  { %1125 = vst [vmem:[%s1523_s3 + $0x10] sm:$0xff] %v1097_v63   ;;  %v690_v63 = vmul.f32 %v1466_v61, %v1466_v61 }
  0xd6   :  { %v590_v2 = vpop.f32.mrf.mxu2  ;;  %v494_v4 = vpop.f32.mrf.mxu0 }
  0xd7   :  { %v639_v3 = vpop.f32.mrf.mxu3  ;;  %v543_v5 = vpop.f32.mrf.mxu1  ;;  %v495_v7 = vadd.f32 %v1448_v0, %v494_v4  ;;  %v591_v8 = vadd.f32 %v590_v2, %v542_v6  ;;  %v667_v2 = vadd.f32 %v1457_v43, %v1466_v61 }
  0xd9   :  { %v544_v9 = vadd.f32 %v543_v5, %v495_v7  ;;  %v640_v15 = vadd.f32 %v639_v3, %v591_v8  ;;  %v705_v5 = vadd.f32 %v1459_v46, %v690_v63 }
  0xdb   :  { %v692_v6 = vmul.f32 %v640_v15, %v640_v15 }
  0xde   :  { %v592_v10 = vpop.f32.mrf.mxu2  ;;  %v497_v13 = vpop.f32.mrf.mxu0 }
  0xdf   :  { %v641_v11 = vpop.f32.mrf.mxu3  ;;  %v593_v12 = vadd.f32 %v592_v10, %v544_v9  ;;  %v546_v14 = vpop.f32.mrf.mxu1  ;;  %v498_v18 = vadd.f32 %v1448_v0, %v497_v13  ;;  %v668_v9 = vadd.f32 %v667_v2, %v1468_v62 }
  0xe1   :  { %v1477_v16 = vadd.f32 %v641_v11, %v593_v12  ;;  %v547_v23 = vadd.f32 %v546_v14, %v498_v18  ;;  %v706_v12 = vadd.f32 %v705_v5, %v691_v1  ;;  %v669_v14 = vadd.f32 %v668_v9, %v640_v15 }
  0xe3   :  { %v1102_v17 = vpack.c.bf16 %v1477_v16, %v640_v15  ;;  %v707_v61 = vadd.f32 %v706_v12, %v692_v6  ;;  %v670_v46 = vadd.f32 %v669_v14, %v1477_v16 }
  0xe5   :  { %1126 = vst [vmem:[%s1523_s3 + $0x18] sm:$0xff] %v1102_v17   ;;  %v693_v17 = vmul.f32 %v1477_v16, %v1477_v16 }
  0xe6   :  { %v595_v19 = vpop.f32.mrf.mxu2  ;;  %v499_v21 = vpop.f32.mrf.mxu0 }
  0xe7   :  { %v644_v20 = vpop.f32.mrf.mxu3  ;;  %v548_v22 = vpop.f32.mrf.mxu1  ;;  %v500_v24 = vadd.f32 %v1448_v0, %v499_v21  ;;  %v596_v25 = vadd.f32 %v595_v19, %v547_v23  ;;  %v708_v23 = vadd.f32 %v707_v61, %v693_v17 }
  0xe9   :  { %v549_v26 = vadd.f32 %v548_v22, %v500_v24  ;;  %v645_v32 = vadd.f32 %v644_v20, %v596_v25 }
  0xeb   :  { %v694_v20 = vmul.f32 %v645_v32, %v645_v32  ;;  %v671_v62 = vadd.f32 %v670_v46, %v645_v32 }
  0xee   :  { %v597_v27 = vpop.f32.mrf.mxu2  ;;  %v502_v30 = vpop.f32.mrf.mxu0 }
  0xef   :  { %v646_v28 = vpop.f32.mrf.mxu3  ;;  %v598_v29 = vadd.f32 %v597_v27, %v549_v26  ;;  %v551_v31 = vpop.f32.mrf.mxu1  ;;  %v503_v35 = vadd.f32 %v1448_v0, %v502_v30  ;;  %v709_v26 = vadd.f32 %v708_v23, %v694_v20 }
  0xf1   :  { %v647_v33 = vadd.f32 %v646_v28, %v598_v29  ;;  %v552_v40 = vadd.f32 %v551_v31, %v503_v35 }
  0xf3   :  { %v1107_v34 = vpack.c.bf16 %v647_v33, %v645_v32  ;;  %v695_v24 = vmul.f32 %v647_v33, %v647_v33  ;;  %v672_v27 = vadd.f32 %v671_v62, %v647_v33 }
  0xf5   :  { %1127 = vst [vmem:[%s1523_s3 + $0x20] sm:$0xff] %v1107_v34   ;;  %v710_v31 = vadd.f32 %v709_v26, %v695_v24 }
  0xf6   :  { %v600_v36 = vpop.f32.mrf.mxu2  ;;  %v504_v38 = vpop.f32.mrf.mxu0 }
  0xf7   :  { %v649_v37 = vpop.f32.mrf.mxu3  ;;  %v553_v39 = vpop.f32.mrf.mxu1  ;;  %v505_v41 = vadd.f32 %v1448_v0, %v504_v38  ;;  %v601_v42 = vadd.f32 %v600_v36, %v552_v40 }
  0xf9   :  { %v554_v44 = vadd.f32 %v553_v39, %v505_v41  ;;  %v650_v51 = vadd.f32 %v649_v37, %v601_v42 }
  0xfb   :  { %v696_v28 = vmul.f32 %v650_v51, %v650_v51  ;;  %v673_v34 = vadd.f32 %v672_v27, %v650_v51 }
  0xfd   :  { %v711_v36 = vadd.f32 %v710_v31, %v696_v28 }
  0xfe   :  { %v602_v45 = vpop.f32.mrf.mxu2  ;;  %v507_v49 = vpop.f32.mrf.mxu0 }
  0xff   :  { %v651_v47 = vpop.f32.mrf.mxu3  ;;  %v603_v48 = vadd.f32 %v602_v45, %v554_v44  ;;  %v556_v50 = vpop.f32.mrf.mxu1  ;;  %v508_v54 = vadd.f32 %v1448_v0, %v507_v49 }
 0x101   :  { %v652_v52 = vadd.f32 %v651_v47, %v603_v48  ;;  %v557_v59 = vadd.f32 %v556_v50, %v508_v54 }
 0x103   :  { %v1112_v53 = vpack.c.bf16 %v652_v52, %v650_v51  ;;  %v697_v16 = vmul.f32 %v652_v52, %v652_v52  ;;  %v674_v37 = vadd.f32 %v673_v34, %v652_v52 }
 0x105   :  { %1128 = vst [vmem:[%s1523_s3 + $0x28] sm:$0xff] %v1112_v53   ;;  %v712_v40 = vadd.f32 %v711_v36, %v697_v16 }
 0x106   :  { %v605_v55 = vpop.f32.mrf.mxu2  ;;  %v509_v57 = vpop.f32.mrf.mxu0 }
 0x107   :  { %v654_v56 = vpop.f32.mrf.mxu3  ;;  %v558_v58 = vpop.f32.mrf.mxu1  ;;  %v510_v60 = vadd.f32 %v1448_v0, %v509_v57  ;;  %v606_v3 = vadd.f32 %v605_v55, %v557_v59 }
 0x109   :  { %v559_v4 = vadd.f32 %v558_v58, %v510_v60  ;;  %v655_v18 = vadd.f32 %v654_v56, %v606_v3 }
 0x10b   :  { %v698_v32 = vmul.f32 %v655_v18, %v655_v18  ;;  %v675_v41 = vadd.f32 %v674_v37, %v655_v18 }
 0x10d   :  { %v713_v47 = vadd.f32 %v712_v40, %v698_v32 }
 0x10e   :  { %v607_v7 = vpop.f32.mrf.mxu2  ;;  %v512_v11 = vpop.f32.mrf.mxu0 }
 0x10f   :  { %v656_v8 = vpop.f32.mrf.mxu3  ;;  %v608_v10 = vadd.f32 %v607_v7, %v559_v4  ;;  %v513_v13 = vadd.f32 %v1448_v0, %v512_v11  ;;  %v561_v19 = vpop.f32.mrf.mxu1 }
 0x111   :  { %v657_v43 = vadd.f32 %v656_v8, %v608_v10  ;;  %v562_v22 = vadd.f32 %v561_v19, %v513_v13 }
 0x113   :  { %v1117_v21 = vpack.c.bf16 %v657_v43, %v655_v18  ;;  %v699_v42 = vmul.f32 %v657_v43, %v657_v43  ;;  %v676_v33 = vadd.f32 %v675_v41, %v657_v43 }
 0x115   :  { %1129 = vst [vmem:[%s1523_s3 + $0x30] sm:$0xff] %v1117_v21   ;;  %v714_v53 = vadd.f32 %v713_v47, %v699_v42 }
 0x116   :  { %v610_v15 = vpop.f32.mrf.mxu2  ;;  %v514_v30 = vpop.f32.mrf.mxu0 }
 0x117   :  { %v659_v25 = vpop.f32.mrf.mxu3  ;;  %v611_v29 = vadd.f32 %v610_v15, %v562_v22  ;;  %v515_v35 = vadd.f32 %v1448_v0, %v514_v30  ;;  %v563_v39 = vpop.f32.mrf.mxu1 }
 0x119   :  { %v660_v38 = vadd.f32 %v659_v25, %v611_v29  ;;  %v564_v44 = vadd.f32 %v563_v39, %v515_v35 }
 0x11b   :  { %v700_v48 = vmul.f32 %v660_v38, %v660_v38  ;;  %v677_v51 = vadd.f32 %v676_v33, %v660_v38 }
 0x11d   :  { %v715_v55 = vadd.f32 %v714_v53, %v700_v48 }
 0x11e   :  { %v612_v45 = vpop.f32.mrf.mxu2 }
 0x11f   :  { %v613_v49 = vadd.f32 %v612_v45, %v564_v44  ;;  %v661_v50 = vpop.f32.mrf.mxu3 }
 0x121   :  { %v662_v54 = vadd.f32 %v661_v50, %v613_v49 }
 0x123   :  { %v678_v0 = vadd.f32 %v677_v51, %v662_v54  ;;  %v701_v56 = vmul.f32 %v662_v54, %v662_v54  ;;  %v1122_v52 = vpack.c.bf16 %v662_v54, %v660_v38 }
 0x125   :  { %v679_v57 = vrot.slane %v678_v0, 4  ;;  %v716_v58 = vadd.f32 %v715_v55, %v701_v56  ;;  %1130 = vst [vmem:[%s1523_s3 + $0x38] sm:$0xff] %v1122_v52  }
 0x127   :  { %v680_v59 = vadd.f32 %v679_v57, %v678_v0  ;;  %v717_v60 = vrot.slane %v716_v58, 4 }
 0x129   :  { %v681_v63 = vrot.slane %v680_v59, 2  ;;  %v718_v1 = vadd.f32 %v717_v60, %v716_v58 }
 0x12b   :  { %v682_v2 = vadd.f32 %v681_v63, %v680_v59  ;;  %v719_v3 = vrot.slane %v718_v1, 2 }
 0x12d   :  { %v683_v4 = vrot.slane %v682_v2, 1  ;;  %v720_v5 = vadd.f32 %v719_v3, %v718_v1 }
 0x12f   :  { %v684_v6 = vadd.f32 %v683_v4, %v682_v2  ;;  %v721_v7 = vrot.slane %v720_v5, 1 }
 0x131   :  { %685 = vst [vmem:[%s1524_s4] sm:$0x1] %v684_v6  ;;  %v722_v8 = vadd.f32 %v721_v7, %v720_v5 }
 0x133   :  { %723 = vst [vmem:[%s1524_s4 + $0x1] sm:$0x1] %v722_v8 }

// kernel: discriminator_forward.7
= control target key start
LH: loop header
LB: loop body
LE: loop exit
PB: predicated region body
PF: predicated region fallthrough
CT: control target
= control target key end

     0   :  { %s1560_s1 = inlined_call_operand.vmem [shape: bf16[1024,128], index: 1, kind: input, shape index: {}]   ;;  %s1561_s0 = inlined_call_operand.vmem [shape: bf16[32,1024], index: 0, kind: input, shape index: {}]   ;;  %s1562_s2 = inlined_call_operand.vmem [shape: f32[1,128], index: 2, kind: input, shape index: {}]   ;;  %s1563_s3 = inlined_call_operand.vmem [shape: bf16[32,128], index: 3, kind: output, shape index: {0}]   ;;  %s1564_s4 = inlined_call_operand.vmem [shape: f32[1,8,128], index: 4, kind: output, shape index: {1}]  }
   0x1   :  { %v1163_v0 = vld [vmem:[%s1560_s1 + $0x38] sm:$0xff]  ;;  %v1162_v4 = vld [vmem:[%s1560_s1 + $0x30] sm:$0xff]  ;;  %v1161_v8 = vld [vmem:[%s1560_s1 + $0x28] sm:$0xff] }
   0x2   :  { %v1171_v1 = vld [vmem:[%s1560_s1 + $0x78] sm:$0xff]  ;;  %628 = vmatpush.bf16.msra.mxu0 %v1163_v0  ;;  %v1170_v5 = vld [vmem:[%s1560_s1 + $0x70] sm:$0xff]  ;;  %v1169_v9 = vld [vmem:[%s1560_s1 + $0x68] sm:$0xff] }
   0x3   :  { %v1179_v2 = vld [vmem:[%s1560_s1 + $0xb8] sm:$0xff]  ;;  %647 = vmatpush.bf16.msra.mxu1 %v1171_v1  ;;  %v1178_v6 = vld [vmem:[%s1560_s1 + $0xb0] sm:$0xff]  ;;  %v1177_v10 = vld [vmem:[%s1560_s1 + $0xa8] sm:$0xff] }
   0x4   :  { %v1187_v3 = vld [vmem:[%s1560_s1 + $0xf8] sm:$0xff]  ;;  %666 = vmatpush.bf16.msra.mxu2 %v1179_v2  ;;  %v1186_v7 = vld [vmem:[%s1560_s1 + $0xf0] sm:$0xff]  ;;  %v1185_v11 = vld [vmem:[%s1560_s1 + $0xe8] sm:$0xff] }
   0x5   :  { %685 = vmatpush.bf16.msra.mxu3 %v1187_v3  ;;  %v1160_v12 = vld [vmem:[%s1560_s1 + $0x20] sm:$0xff]  ;;  %v1159_v16 = vld [vmem:[%s1560_s1 + $0x18] sm:$0xff]  ;;  %v1158_v20 = vld [vmem:[%s1560_s1 + $0x10] sm:$0xff] }
   0x6   :  { %629 = vmatpush.bf16.msra.mxu0 %v1162_v4  ;;  %v1168_v13 = vld [vmem:[%s1560_s1 + $0x60] sm:$0xff]  ;;  %v1167_v17 = vld [vmem:[%s1560_s1 + $0x58] sm:$0xff]  ;;  %v1166_v21 = vld [vmem:[%s1560_s1 + $0x50] sm:$0xff] }
   0x7   :  { %648 = vmatpush.bf16.msra.mxu1 %v1170_v5  ;;  %v1176_v14 = vld [vmem:[%s1560_s1 + $0xa0] sm:$0xff]  ;;  %v1175_v18 = vld [vmem:[%s1560_s1 + $0x98] sm:$0xff]  ;;  %v1174_v22 = vld [vmem:[%s1560_s1 + $0x90] sm:$0xff] }
   0x8   :  { %667 = vmatpush.bf16.msra.mxu2 %v1178_v6  ;;  %v1184_v15 = vld [vmem:[%s1560_s1 + $0xe0] sm:$0xff]  ;;  %v1183_v19 = vld [vmem:[%s1560_s1 + $0xd8] sm:$0xff]  ;;  %v1182_v23 = vld [vmem:[%s1560_s1 + $0xd0] sm:$0xff] }
   0x9   :  { %686 = vmatpush.bf16.msra.mxu3 %v1186_v7  ;;  %v1157_v24 = vld [vmem:[%s1560_s1 + $0x8] sm:$0xff]  ;;  %v1156_v28 = vld [vmem:[%s1560_s1] sm:$0xff]  ;;  %v1211_v40 = vld [vmem:[%s1560_s1 + $0x1b8] sm:$0xff] }
   0xa   :  { %630 = vmatpush.bf16.msra.mxu0 %v1161_v8  ;;  %v1165_v25 = vld [vmem:[%s1560_s1 + $0x48] sm:$0xff]  ;;  %v1164_v29 = vld [vmem:[%s1560_s1 + $0x40] sm:$0xff]  ;;  %v1195_v41 = vld [vmem:[%s1560_s1 + $0x138] sm:$0xff] }
   0xb   :  { %649 = vmatpush.bf16.msra.mxu1 %v1169_v9  ;;  %v1173_v26 = vld [vmem:[%s1560_s1 + $0x88] sm:$0xff]  ;;  %v1172_v30 = vld [vmem:[%s1560_s1 + $0x80] sm:$0xff]  ;;  %v1203_v46 = vld [vmem:[%s1560_s1 + $0x178] sm:$0xff] }
   0xc   :  { %668 = vmatpush.bf16.msra.mxu2 %v1177_v10  ;;  %v1181_v27 = vld [vmem:[%s1560_s1 + $0xc8] sm:$0xff]  ;;  %v1180_v31 = vld [vmem:[%s1560_s1 + $0xc0] sm:$0xff]  ;;  %v1219_v47 = vld [vmem:[%s1560_s1 + $0x1f8] sm:$0xff] }
   0xd   :  { %687 = vmatpush.bf16.msra.mxu3 %v1185_v11  ;;  %v822_v32 = vld [vmem:[%s1561_s0] sm:$0xf]  ;;  %v1140_v34 = vld [vmem:[%s1561_s0 + $0x4] sm:$0xf]  ;;  %v830_v36 = vld [vmem:[%s1561_s0 + $0x8] sm:$0xf] }
   0xe   :  { %631 = vmatpush.bf16.msra.mxu0 %v1160_v12  ;;  %v1144_v33 = vld [vmem:[%s1561_s0 + $0x1c] sm:$0xf0]  ;;  %v824_v35 = vld [vmem:[%s1561_s0 + $0x20] sm:$0xf0]  ;;  %v1145_v37 = vld [vmem:[%s1561_s0 + $0x24] sm:$0xf0] }
   0xf   :  { %650 = vmatpush.bf16.msra.mxu1 %v1168_v13  ;;  %v1141_v38 = vld [vmem:[%s1561_s0 + $0xc] sm:$0xf]  ;;  %v823_v42 = vor.u32 %v1144_v33, %v822_v32  ;;  %v827_v43 = vor.u32 %v1140_v34, %v824_v35  ;;  %v831_v44 = vor.u32 %v1145_v37, %v830_v36  ;;  %v1210_v48 = vld [vmem:[%s1560_s1 + $0x1b0] sm:$0xff]  ;;  %v1208_v56 = vld [vmem:[%s1560_s1 + $0x1a0] sm:$0xff] }
  0x10   :  { %669 = vmatpush.bf16.msra.mxu2 %v1176_v14  ;;  %v832_v39 = vld [vmem:[%s1561_s0 + $0x28] sm:$0xf0]  ;;  %v1194_v49 = vld [vmem:[%s1560_s1 + $0x130] sm:$0xff]  ;;  %v1192_v57 = vld [vmem:[%s1560_s1 + $0x120] sm:$0xff] }
  0x11   :  { %688 = vmatpush.bf16.msra.mxu3 %v1184_v15  ;;  %v835_v45 = vor.u32 %v1141_v38, %v832_v39  ;;  %v1202_v50 = vld [vmem:[%s1560_s1 + $0x170] sm:$0xff]  ;;  %v1209_v52 = vld [vmem:[%s1560_s1 + $0x1a8] sm:$0xff]  ;;  %v1200_v58 = vld [vmem:[%s1560_s1 + $0x160] sm:$0xff] }
  0x12   :  { %632 = vmatpush.bf16.msra.mxu0 %v1159_v16  ;;  %v1218_v51 = vld [vmem:[%s1560_s1 + $0x1f0] sm:$0xff]  ;;  %v1193_v53 = vld [vmem:[%s1560_s1 + $0x128] sm:$0xff]  ;;  %v1216_v59 = vld [vmem:[%s1560_s1 + $0x1e0] sm:$0xff] }
  0x13   :  { %651 = vmatpush.bf16.msra.mxu1 %v1167_v17  ;;  %v1201_v54 = vld [vmem:[%s1560_s1 + $0x168] sm:$0xff]  ;;  %v854_v60 = vld [vmem:[%s1561_s0 + $0x40] sm:$0xf]  ;;  %v1148_v62 = vld [vmem:[%s1561_s0 + $0x44] sm:$0xf] }
  0x14   :  { %670 = vmatpush.bf16.msra.mxu2 %v1175_v18  ;;  %v1217_v55 = vld [vmem:[%s1560_s1 + $0x1e8] sm:$0xff]  ;;  %v1152_v61 = vld [vmem:[%s1561_s0 + $0x5c] sm:$0xf0]  ;;  %v856_v63 = vld [vmem:[%s1561_s0 + $0x60] sm:$0xf0] }
  0x15   :  { %689 = vmatpush.bf16.msra.mxu3 %v1183_v19  ;;  %v862_v0 = vld [vmem:[%s1561_s0 + $0x48] sm:$0xf]  ;;  %v1149_v2 = vld [vmem:[%s1561_s0 + $0x4c] sm:$0xf]  ;;  %v1207_v4 = vld [vmem:[%s1560_s1 + $0x198] sm:$0xff]  ;;  %v855_v6 = vor.u32 %v1152_v61, %v854_v60  ;;  %v859_v7 = vor.u32 %v1148_v62, %v856_v63 }
  0x16   :  { %633 = vmatpush.bf16.msra.mxu0 %v1158_v20  ;;  %v1153_v1 = vld [vmem:[%s1561_s0 + $0x64] sm:$0xf0]  ;;  %v864_v3 = vld [vmem:[%s1561_s0 + $0x68] sm:$0xf0]  ;;  %v1191_v5 = vld [vmem:[%s1560_s1 + $0x118] sm:$0xff] }
  0x17   :  { %652 = vmatpush.bf16.msra.mxu1 %v1166_v21  ;;  %v863_v8 = vor.u32 %v1153_v1, %v862_v0  ;;  %v867_v9 = vor.u32 %v1149_v2, %v864_v3  ;;  %v1199_v10 = vld [vmem:[%s1560_s1 + $0x158] sm:$0xff]  ;;  %v1206_v12 = vld [vmem:[%s1560_s1 + $0x190] sm:$0xff]  ;;  %v1205_v16 = vld [vmem:[%s1560_s1 + $0x188] sm:$0xff] }
  0x18   :  { %671 = vmatpush.bf16.msra.mxu2 %v1174_v22  ;;  %v1215_v11 = vld [vmem:[%s1560_s1 + $0x1d8] sm:$0xff]  ;;  %v1190_v13 = vld [vmem:[%s1560_s1 + $0x110] sm:$0xff]  ;;  %v1189_v17 = vld [vmem:[%s1560_s1 + $0x108] sm:$0xff] }
  0x19   :  { %690 = vmatpush.bf16.msra.mxu3 %v1182_v23  ;;  %v1198_v14 = vld [vmem:[%s1560_s1 + $0x150] sm:$0xff]  ;;  %v1197_v18 = vld [vmem:[%s1560_s1 + $0x148] sm:$0xff]  ;;  %v1204_v20 = vld [vmem:[%s1560_s1 + $0x180] sm:$0xff] }
  0x1a   :  { %634 = vmatpush.bf16.msra.mxu0 %v1157_v24  ;;  %v1214_v15 = vld [vmem:[%s1560_s1 + $0x1d0] sm:$0xff]  ;;  %v1213_v19 = vld [vmem:[%s1560_s1 + $0x1c8] sm:$0xff]  ;;  %v1188_v21 = vld [vmem:[%s1560_s1 + $0x100] sm:$0xff] }
  0x1b   :  { %653 = vmatpush.bf16.msra.mxu1 %v1165_v25  ;;  %v1196_v22 = vld [vmem:[%s1560_s1 + $0x140] sm:$0xff]  ;;  %v838_v24 = vld [vmem:[%s1561_s0 + $0x10] sm:$0xf]  ;;  %v1150_v38 = vld [vmem:[%s1561_s0 + $0x54] sm:$0xf] }
  0x1c   :  { %672 = vmatpush.bf16.msra.mxu2 %v1173_v26  ;;  %v1212_v23 = vld [vmem:[%s1560_s1 + $0x1c0] sm:$0xff]  ;;  %v1146_v25 = vld [vmem:[%s1561_s0 + $0x2c] sm:$0xf0]  ;;  %v1142_v26 = vld [vmem:[%s1561_s0 + $0x14] sm:$0xf] }
  0x1d   :  { %691 = vmatpush.bf16.msra.mxu3 %v1181_v27  ;;  %v840_v27 = vld [vmem:[%s1561_s0 + $0x30] sm:$0xf0]  ;;  %v839_v32 = vor.u32 %v1146_v25, %v838_v24  ;;  %v870_v36 = vld [vmem:[%s1561_s0 + $0x50] sm:$0xf] }
  0x1e   :  { %635 = vmatpush.bf16.msra.mxu0 %v1156_v28  ;;  %v846_v28 = vld [vmem:[%s1561_s0 + $0x18] sm:$0xf]  ;;  %v843_v33 = vor.u32 %v1142_v26, %v840_v27  ;;  %v1154_v37 = vld [vmem:[%s1561_s0 + $0x6c] sm:$0xf0]  ;;  %v872_v39 = vld [vmem:[%s1561_s0 + $0x70] sm:$0xf0] }
  0x1f   :  { %654 = vmatpush.bf16.msra.mxu1 %v1164_v29  ;;  %v1147_v29 = vld [vmem:[%s1561_s0 + $0x34] sm:$0xf0] }
  0x20   :  { %673 = vmatpush.bf16.msra.mxu2 %v1172_v30  ;;  %v1143_v30 = vld [vmem:[%s1561_s0 + $0x1c] sm:$0xf]  ;;  %v847_v34 = vor.u32 %v1147_v29, %v846_v28 }
  0x21   :  { %692 = vmatpush.bf16.msra.mxu3 %v1180_v31  ;;  %636 = vmatmul.bf16.vlgmr.msra.gmra.mxu0 %v823_v42  ;;  %v848_v31 = vld [vmem:[%s1561_s0 + $0x38] sm:$0xf0] }
  0x22   :  { %704 = vmatpush.bf16.msrb.mxu0 %v1195_v41  ;;  %655 = vmatmul.bf16.vlgmr.msra.gmra.mxu1 %v827_v43  ;;  %v851_v35 = vor.u32 %v1143_v30, %v848_v31  ;;  %v1155_v41 = vld [vmem:[%s1561_s0 + $0x74] sm:$0xf0]  ;;  %v1151_v42 = vld [vmem:[%s1561_s0 + $0x5c] sm:$0xf] }
  0x23   :  { %674 = vmatmul.bf16.vlgmr.msra.gmra.mxu2 %v831_v44  ;;  %723 = vmatpush.bf16.msrb.mxu1 %v1203_v46  ;;  %v880_v43 = vld [vmem:[%s1561_s0 + $0x78] sm:$0xf0]  ;;  %v871_v44 = vor.u32 %v1154_v37, %v870_v36 }
  0x24   :  { %742 = vmatpush.bf16.msrb.mxu2 %v1211_v40  ;;  %693 = vmatmul.bf16.vlgmr.msra.gmra.mxu3 %v835_v45  ;;  %v878_v40 = vld [vmem:[%s1561_s0 + $0x58] sm:$0xf]  ;;  %v875_v45 = vor.u32 %v1150_v38, %v872_v39 }
  0x25   :  { %761 = vmatpush.bf16.msrb.mxu3 %v1219_v47  ;;  %v879_v46 = vor.u32 %v1155_v41, %v878_v40  ;;  %v883_v47 = vor.u32 %v1151_v42, %v880_v43 }
  0x26   :  { %705 = vmatpush.bf16.msrb.mxu0 %v1194_v49 }
  0x27   :  { %724 = vmatpush.bf16.msrb.mxu1 %v1202_v50 }
  0x28   :  { %743 = vmatpush.bf16.msrb.mxu2 %v1210_v48 }
  0x29   :  { %762 = vmatpush.bf16.msrb.mxu3 %v1218_v51 }
  0x2a   :  { %706 = vmatpush.bf16.msrb.mxu0 %v1193_v53 }
  0x2b   :  { %725 = vmatpush.bf16.msrb.mxu1 %v1201_v54 }
  0x2c   :  { %744 = vmatpush.bf16.msrb.mxu2 %v1209_v52 }
  0x2d   :  { %763 = vmatpush.bf16.msrb.mxu3 %v1217_v55 }
  0x2e   :  { %707 = vmatpush.bf16.msrb.mxu0 %v1192_v57 }
  0x2f   :  { %726 = vmatpush.bf16.msrb.mxu1 %v1200_v58  ;;  %v1231_v58 = vld [vmem:[%s1562_s2] ss:$0 sm:$0xff] }
  0x30   :  { %745 = vmatpush.bf16.msrb.mxu2 %v1208_v56 }
  0x31   :  { %764 = vmatpush.bf16.msrb.mxu3 %v1216_v59  ;;  %641 = vmatmul.bf16.gmra.mxu0 %v855_v6 }
  0x32   :  { %708 = vmatpush.bf16.msrb.mxu0 %v1191_v5  ;;  %660 = vmatmul.bf16.gmra.mxu1 %v859_v7 }
  0x33   :  { %679 = vmatmul.bf16.gmra.mxu2 %v863_v8  ;;  %727 = vmatpush.bf16.msrb.mxu1 %v1199_v10 }
  0x34   :  { %746 = vmatpush.bf16.msrb.mxu2 %v1207_v4  ;;  %698 = vmatmul.bf16.gmra.mxu3 %v867_v9 }
  0x35   :  { %765 = vmatpush.bf16.msrb.mxu3 %v1215_v11 }
  0x36   :  { %709 = vmatpush.bf16.msrb.mxu0 %v1190_v13 }
  0x37   :  { %728 = vmatpush.bf16.msrb.mxu1 %v1198_v14 }
  0x38   :  { %747 = vmatpush.bf16.msrb.mxu2 %v1206_v12 }
  0x39   :  { %766 = vmatpush.bf16.msrb.mxu3 %v1214_v15 }
  0x3a   :  { %710 = vmatpush.bf16.msrb.mxu0 %v1189_v17 }
  0x3b   :  { %729 = vmatpush.bf16.msrb.mxu1 %v1197_v18 }
  0x3c   :  { %748 = vmatpush.bf16.msrb.mxu2 %v1205_v16 }
  0x3d   :  { %767 = vmatpush.bf16.msrb.mxu3 %v1213_v19 }
  0x3e   :  { %711 = vmatpush.bf16.msrb.mxu0 %v1188_v21 }
  0x3f   :  { %730 = vmatpush.bf16.msrb.mxu1 %v1196_v22 }
  0x40   :  { %749 = vmatpush.bf16.msrb.mxu2 %v1204_v20 }
  0x41   :  { %768 = vmatpush.bf16.msrb.mxu3 %v1212_v23  ;;  %712 = vmatmul.bf16.vlgmr.msrb.gmra.mxu0 %v839_v32 }
  0x42   :  { %731 = vmatmul.bf16.vlgmr.msrb.gmra.mxu1 %v843_v33 }
  0x43   :  { %750 = vmatmul.bf16.vlgmr.msrb.gmra.mxu2 %v847_v34 }
  0x44   :  { %769 = vmatmul.bf16.vlgmr.msrb.gmra.mxu3 %v851_v35 }
  0x51   :  { %717 = vmatmul.bf16.gmra.mxu0 %v871_v44 }
  0x52   :  { %736 = vmatmul.bf16.gmra.mxu1 %v875_v45 }
  0x53   :  { %755 = vmatmul.bf16.gmra.mxu2 %v879_v46 }
  0x54   :  { %774 = vmatmul.bf16.gmra.mxu3 %v883_v47 }
  0x9e   :  { %v637_v48 = vpop.f32.mrf.mxu0 }
  0x9f   :  { %v656_v49 = vpop.f32.mrf.mxu1  ;;  %v638_v63 = vadd.f32 %v1231_v58, %v637_v48 }
  0xa1   :  { %v657_v0 = vadd.f32 %v656_v49, %v638_v63 }
  0xa6   :  { %v675_v50 = vpop.f32.mrf.mxu2  ;;  %v639_v52 = vpop.f32.mrf.mxu0 }
  0xa7   :  { %v694_v51 = vpop.f32.mrf.mxu3  ;;  %v658_v53 = vpop.f32.mrf.mxu1  ;;  %v640_v1 = vadd.f32 %v1231_v58, %v639_v52  ;;  %v676_v6 = vadd.f32 %v675_v50, %v657_v0 }
  0xa9   :  { %v659_v7 = vadd.f32 %v658_v53, %v640_v1  ;;  %v695_v10 = vadd.f32 %v694_v51, %v676_v6 }
  0xae   :  { %v677_v54 = vpop.f32.mrf.mxu2  ;;  %v642_v56 = vpop.f32.mrf.mxu0 }
  0xaf   :  { %v696_v55 = vpop.f32.mrf.mxu3  ;;  %v661_v57 = vpop.f32.mrf.mxu1  ;;  %v678_v8 = vadd.f32 %v677_v54, %v659_v7  ;;  %v643_v9 = vadd.f32 %v1231_v58, %v642_v56 }
  0xb1   :  { %v697_v12 = vadd.f32 %v696_v55, %v678_v8  ;;  %v662_v13 = vadd.f32 %v661_v57, %v643_v9 }
  0xb6   :  { %v680_v59 = vpop.f32.mrf.mxu2  ;;  %v644_v61 = vpop.f32.mrf.mxu0 }
  0xb7   :  { %v699_v60 = vpop.f32.mrf.mxu3  ;;  %v663_v62 = vpop.f32.mrf.mxu1  ;;  %v681_v19 = vadd.f32 %v680_v59, %v662_v13  ;;  %v645_v21 = vadd.f32 %v1231_v58, %v644_v61 }
  0xb9   :  { %v700_v25 = vadd.f32 %v699_v60, %v681_v19  ;;  %v664_v29 = vadd.f32 %v663_v62, %v645_v21 }
  0xbe   :  { %v682_v2 = vpop.f32.mrf.mxu2  ;;  %v713_v4 = vpop.f32.mrf.mxu0 }
  0xbf   :  { %v701_v3 = vpop.f32.mrf.mxu3  ;;  %v732_v5 = vpop.f32.mrf.mxu1  ;;  %v714_v14 = vadd.f32 %v713_v4, %v695_v10  ;;  %v683_v34 = vadd.f32 %v682_v2, %v664_v29 }
  0xc1   :  { %v733_v20 = vadd.f32 %v732_v5, %v714_v14  ;;  %v702_v38 = vadd.f32 %v701_v3, %v683_v34 }
  0xc6   :  { %v751_v11 = vpop.f32.mrf.mxu2  ;;  %v715_v16 = vpop.f32.mrf.mxu0 }
  0xc7   :  { %v770_v15 = vpop.f32.mrf.mxu3  ;;  %v734_v17 = vpop.f32.mrf.mxu1  ;;  %v716_v18 = vadd.f32 %v715_v16, %v697_v12  ;;  %v752_v22 = vadd.f32 %v751_v11, %v733_v20 }
  0xc9   :  { %v735_v23 = vadd.f32 %v734_v17, %v716_v18  ;;  %v771_v30 = vadd.f32 %v770_v15, %v752_v22 }
  0xcb   :  { %v790_v48 = vmul.f32 %v771_v30, %v771_v30 }
  0xce   :  { %v753_v24 = vpop.f32.mrf.mxu2  ;;  %v718_v28 = vpop.f32.mrf.mxu0 }
  0xcf   :  { %v754_v26 = vadd.f32 %v753_v24, %v735_v23  ;;  %v772_v27 = vpop.f32.mrf.mxu3  ;;  %v719_v32 = vadd.f32 %v718_v28, %v700_v25  ;;  %v737_v33 = vpop.f32.mrf.mxu1 }
  0xd1   :  { %v773_v31 = vadd.f32 %v772_v27, %v754_v26  ;;  %v738_v36 = vadd.f32 %v737_v33, %v719_v32 }
  0xd3   :  { %v1223_v35 = vpack.c.bf16 %v773_v31, %v771_v30  ;;  %v791_v45 = vmul.f32 %v773_v31, %v773_v31  ;;  %v780_v49 = vadd.f32 %v773_v31, %v771_v30 }
  0xd5   :  { %1224 = vst [vmem:[%s1563_s3] sm:$0xff] %v1223_v35   ;;  %v794_v53 = vadd.f32 %v791_v45, %v790_v48 }
  0xd6   :  { %v756_v37 = vpop.f32.mrf.mxu2  ;;  %v720_v41 = vpop.f32.mrf.mxu0 }
  0xd7   :  { %v757_v39 = vadd.f32 %v756_v37, %v738_v36  ;;  %v775_v40 = vpop.f32.mrf.mxu3  ;;  %v721_v42 = vadd.f32 %v720_v41, %v702_v38  ;;  %v739_v44 = vpop.f32.mrf.mxu1 }
  0xd9   :  { %v776_v43 = vadd.f32 %v775_v40, %v757_v39  ;;  %v740_v46 = vadd.f32 %v739_v44, %v721_v42 }
  0xdb   :  { %v792_v50 = vmul.f32 %v776_v43, %v776_v43  ;;  %v781_v54 = vadd.f32 %v780_v49, %v776_v43 }
  0xdd   :  { %v795_v56 = vadd.f32 %v794_v53, %v792_v50 }
  0xde   :  { %v758_v47 = vpop.f32.mrf.mxu2 }
  0xdf   :  { %v759_v51 = vadd.f32 %v758_v47, %v740_v46  ;;  %v777_v52 = vpop.f32.mrf.mxu3 }
  0xe1   :  { %v778_v55 = vadd.f32 %v777_v52, %v759_v51 }
  0xe3   :  { %v782_v57 = vadd.f32 %v781_v54, %v778_v55  ;;  %v793_v58 = vmul.f32 %v778_v55, %v778_v55  ;;  %v1228_v59 = vpack.c.bf16 %v778_v55, %v776_v43 }
  0xe5   :  { %v783_v60 = vrot.slane %v782_v57, 4  ;;  %v796_v61 = vadd.f32 %v795_v56, %v793_v58  ;;  %1230 = vst [vmem:[%s1563_s3 + $0x8] sm:$0xff] %v1228_v59  }
  0xe7   :  { %v784_v62 = vadd.f32 %v783_v60, %v782_v57  ;;  %v797_v63 = vrot.slane %v796_v61, 4 }
  0xe9   :  { %v785_v0 = vrot.slane %v784_v62, 2  ;;  %v798_v1 = vadd.f32 %v797_v63, %v796_v61 }
  0xeb   :  { %v786_v2 = vadd.f32 %v785_v0, %v784_v62  ;;  %v799_v3 = vrot.slane %v798_v1, 2 }
  0xed   :  { %v787_v4 = vrot.slane %v786_v2, 1  ;;  %v800_v5 = vadd.f32 %v799_v3, %v798_v1 }
  0xef   :  { %v788_v6 = vadd.f32 %v787_v4, %v786_v2  ;;  %v801_v7 = vrot.slane %v800_v5, 1 }
  0xf1   :  { %789 = vst [vmem:[%s1564_s4] sm:$0x1] %v788_v6  ;;  %v802_v8 = vadd.f32 %v801_v7, %v800_v5 }
  0xf3   :  { %803 = vst [vmem:[%s1564_s4 + $0x1] sm:$0x1] %v802_v8 }

</bundles_post_ra>
